<compile_context>
chip_gen: v7x
topology: tpu7x:2x2x1
jax: 0.10.0
libtpu: 0.0.40
codegen_flags: <defaults>
</compile_context>

<pallas_src>
import math
import functools

import jax
import jax.numpy as jnp
from jax.experimental import pallas as pl
from jax.experimental.pallas import tpu as pltpu


# ----------------------------------------------------------------------------
# Bicubic (a = -0.75, align_corners=False) x2 upsample expressed as a small
# (out, in) interpolation matrix per spatial axis (PyTorch border-clamped).
# ----------------------------------------------------------------------------
def _cubic_kernel(x, A=-0.75):
    x = abs(x)
    if x <= 1.0:
        return ((A + 2.0) * x - (A + 3.0)) * x * x + 1.0
    if x < 2.0:
        return (((x - 5.0) * x + 8.0) * x - 4.0) * A
    return 0.0


def _upsample_matrix(n_in, scale=2):
    n_out = n_in * scale
    rows = []
    for o in range(n_out):
        src = (o + 0.5) / scale - 0.5
        i0 = math.floor(src)
        t = src - i0
        row = [0.0] * n_in
        for k in range(4):
            idx = min(max(i0 - 1 + k, 0), n_in - 1)
            row[idx] += _cubic_kernel(t - (k - 1))
        rows.append(row)
    return jnp.array(rows, dtype=jnp.float32)


def _fold_bn(gamma, beta, mean, var, eps=1e-3):   # module uses eps=0.001
    scale = gamma / jnp.sqrt(var + eps)
    return scale, beta - mean * scale


def _gelu(x):
    # tanh-form GELU (tanh goes to the EUP slot); |err| vs exact erf GELU
    # < ~5e-4, well inside the test tolerance.
    return 0.5 * x * (1.0 + jnp.tanh(0.7978845608028654 *
                                     (x + 0.044715 * (x * x * x))))


# ----------------------------------------------------------------------------
# Pallas kernel: one group of Bt images per grid step.
# Activations are (Bt*C, HW): images*channels in sublanes, spatial in lanes.
# ----------------------------------------------------------------------------
def _unet_decoder_kernel(x_ref, skip_ref, ukron_ref, w1_ref, b1_ref,
                         mw_ref, bdw_ref, w2_ref, b2_ref, out_ref,
                         *, add_residual, n_dw, Bt, c, W):
    HW = out_ref.shape[2]
    cx = x_ref.shape[1] // Bt
    cs = skip_ref.shape[1] // Bt
    BC = Bt * c

    # ---- bicubic x2 upsample: one MXU matmul with the Kronecker operator.
    up = jnp.dot(x_ref[0], ukron_ref[...],
                 preferred_element_type=jnp.float32)           # (Bt*cx, HW)
    skip = skip_ref[0]                                         # (Bt*cs, HW)

    # ---- xcat = concat([up, skip]) per image (built once, reused for residual)
    pieces = []
    for b in range(Bt):
        pieces.append(up[b * cx:(b + 1) * cx, :])
        pieces.append(skip[b * cs:(b + 1) * cs, :])
    xcat = jnp.concatenate(pieces, axis=0)                     # (Bt*c1, HW) f32

    # ---- pwconv1: single bf16 MXU matmul (BN scale folded into w1) + bias + GELU
    pw1 = jnp.dot(w1_ref[...], xcat.astype(jnp.bfloat16),
                  preferred_element_type=jnp.float32)          # (Bt*cm, HW)
    pw1 = _gelu(pw1 + b1_ref[...])

    # even / odd output-channel halves (weights were pre-permuted in the
    # wrapper so each half is a contiguous sublane slab across all Bt images)
    x0 = pw1[0:BC, :]
    x1 = pw1[BC:2 * BC, :]

    # ---- pwconv2 fused as an accumulation over the N parts (no VMEM scratch);
    # BN scale is already folded into w2, MXU pushes hide under the dw chain.
    y = jnp.dot(w2_ref[0], x0 + x1, preferred_element_type=jnp.float32)

    # ---- depthwise 3x3 chain (zero pad 1) — XLU lane rolls with mask*scale
    # pre-folded tap weights; bias already lane-broadcast in the wrapper.
    cur = x1
    for i in range(n_dw):
        acc = cur * mw_ref[i * 9 + 4]                          # centre tap
        for dh in (-1, 0, 1):
            for dwv in (-1, 0, 1):
                if dh == 0 and dwv == 0:
                    continue
                t = (dh + 1) * 3 + (dwv + 1)
                shift = (-(dh * W + dwv)) % HW
                acc = acc + pltpu.roll(cur, shift, 1) * mw_ref[i * 9 + t]
        cur = acc + bdw_ref[i]
        y = y + jnp.dot(w2_ref[i + 1], cur, preferred_element_type=jnp.float32)

    y = _gelu(y + b2_ref[...])                                 # (Bt*c2, HW)

    # ---- residual: x_residual = concat([upsampled_x, skip]) == xcat
    if add_residual:
        out_ref[0] = xcat + y
    else:
        out_ref[0] = y


# ----------------------------------------------------------------------------
# Wrapper: parameter folding / layout plumbing + pallas_call.
# Interface is PyTorch-native NCHW: x (B, cx, h, w), skip (B, cs, 2h, 2w).
# ----------------------------------------------------------------------------
def unet_decoder_pallas(x, skip, params, out_channels, N=8, images_per_step=None):
    B, cx, h, w = x.shape
    Bs, cs, H, W = skip.shape
    assert Bs == B and (H, W) == (2 * h, 2 * w)
    c1 = cx + cs
    c2 = out_channels
    cm = c2 // N
    c = int(c2 * 0.5 / N)
    n_dw = N - 1
    assert cm == 2 * c, "c2 must be a multiple of 2*N"
    add_residual = (c1 == c2)
    hw, HW = h * w, H * W

    # ---- images packed per grid step (batch along sublanes) -----------------
    if images_per_step is None:
        # keep >= 2 grid steps when B >= 2 (v7x has 2 TensorCores); pack the
        # rest of the batch into sublanes (cap 4 -> dw chain fills <= 8 rows).
        Bt = 1
        for cand in range(min(B, 4), 0, -1):
            if B % cand == 0 and (B // cand >= 2 or B == 1):
                Bt = cand
                break
    else:
        Bt = images_per_step
        assert B % Bt == 0
    G = B // Bt

    # ---- bicubic upsample operator: up = x_flat @ ukron, ukron (hw, HW) -----
    # TODO(synk): for large spatial sizes switch to the separable two-matmul
    # form (or a row-block grid with 1-row halo) — the dense (hw, HW) operator
    # grows quadratically and would blow v7x's 64 MiB VMEM long before v5e/v6e.
    uh = _upsample_matrix(h)                     # (H, h)
    uw = _upsample_matrix(w)                     # (W, w)
    ukron = jnp.einsum('Hh,Ww->hwHW', uh, uw).reshape(hw, HW)

    # ---- fold BatchNorm scales into conv weights (only bias adds stay) ------
    s1, b1 = _fold_bn(params['bn1_gamma'], params['bn1_beta'],
                      params['bn1_mean'], params['bn1_var'])
    sd, bd = _fold_bn(params['bndw_gamma'], params['bndw_beta'],
                      params['bndw_mean'], params['bndw_var'])
    s2, b2 = _fold_bn(params['bn2_gamma'], params['bn2_beta'],
                      params['bn2_mean'], params['bn2_var'])

    # pwconv1: scale rows by s1, permute outputs evens-then-odds, block-diag
    # over the Bt packed images with a global (half, image, channel) row order
    # so x0/x1 are contiguous sublane slabs in the kernel.
    perm = jnp.array(list(range(0, cm, 2)) + list(range(1, cm, 2)), jnp.int32)
    w1p = (params['w1'] * s1[:, None])[perm, :]                 # (cm, c1)
    b1p = b1[perm]
    w1_eff = jnp.zeros((Bt * cm, Bt * c1), jnp.float32)
    b1_eff = jnp.zeros((Bt * cm,), jnp.float32)
    for half in range(2):
        for bI in range(Bt):
            r0 = (half * Bt + bI) * c
            w1_eff = w1_eff.at[r0:r0 + c, bI * c1:(bI + 1) * c1].set(
                w1p[half * c:(half + 1) * c, :])
            b1_eff = b1_eff.at[r0:r0 + c].set(b1p[half * c:(half + 1) * c])
    w1_eff = w1_eff.astype(jnp.bfloat16)
    b1_lane = jnp.broadcast_to(b1_eff[:, None], (Bt * cm, HW))

    # depthwise taps: fold BN scale AND zero-pad boundary masks into per-tap,
    # lane-dense weight maps mw[(i,t)] of shape (Bt*c, HW).
    rr = jnp.arange(HW, dtype=jnp.int32) // W
    cc = jnp.arange(HW, dtype=jnp.int32) % W
    mk = []
    for dh in (-1, 0, 1):
        for dwv in (-1, 0, 1):
            valid = ((rr + dh >= 0) & (rr + dh < H) &
                     (cc + dwv >= 0) & (cc + dwv < W))
            mk.append(valid.astype(jnp.float32))
    masks = jnp.stack(mk, axis=0)                               # (9, HW)

    wdw_s = params['wdw'] * sd[:, :, None, None]                # (n_dw, c, 3, 3)
    wt = jnp.transpose(wdw_s.reshape(n_dw, c, 9), (0, 2, 1))    # (n_dw, 9, c)
    wt = jnp.tile(wt[:, :, None, :], (1, 1, Bt, 1)).reshape(n_dw, 9, Bt * c)
    mw = (wt[:, :, :, None] * masks[None, :, None, :]).reshape(n_dw * 9, Bt * c, HW)
    bdw = jnp.tile(bd[:, None, :], (1, Bt, 1)).reshape(n_dw, Bt * c)
    bdw_lane = jnp.broadcast_to(bdw[:, :, None], (n_dw, Bt * c, HW))

    # pwconv2: scale rows by s2, split per part and block-diag over images.
    w2s = params['w2'] * s2[:, None]                            # (c2, N*c)
    w2_eff = jnp.zeros((N, Bt * c2, Bt * c), jnp.float32)
    for i in range(N):
        for bI in range(Bt):
            w2_eff = w2_eff.at[i, bI * c2:(bI + 1) * c2,
                               bI * c:(bI + 1) * c].set(w2s[:, i * c:(i + 1) * c])
    b2_eff = jnp.tile(b2, (Bt,))                                # (Bt*c2,)
    b2_lane = jnp.broadcast_to(b2_eff[:, None], (Bt * c2, HW))

    # activations: pack Bt images into the sublane (row) axis
    xg = x.reshape(G, Bt * cx, hw)
    skg = skip.reshape(G, Bt * cs, HW)

    kernel = functools.partial(_unet_decoder_kernel, add_residual=add_residual,
                               n_dw=n_dw, Bt=Bt, c=c, W=W)

    def bcast(arr):
        nd = arr.ndim
        return pl.BlockSpec(arr.shape, lambda g, _n=nd: (0,) * _n)

    grid_spec = pltpu.PrefetchScalarGridSpec(
        num_scalar_prefetch=0,
        grid=(G,),
        in_specs=[
            pl.BlockSpec((1, Bt * cx, hw), lambda g: (g, 0, 0)),
            pl.BlockSpec((1, Bt * cs, HW), lambda g: (g, 0, 0)),
            bcast(ukron),
            bcast(w1_eff), bcast(b1_lane),
            bcast(mw), bcast(bdw_lane),
            bcast(w2_eff), bcast(b2_lane),
        ],
        out_specs=pl.BlockSpec((1, Bt * c2, HW), lambda g: (g, 0, 0)),
    )

    out = pl.pallas_call(
        kernel,
        out_shape=jax.ShapeDtypeStruct((G, Bt * c2, HW), jnp.float32),
        grid_spec=grid_spec,
        compiler_params=pltpu.CompilerParams(
            dimension_semantics=("parallel",)),
    )(xg, skg, ukron, w1_eff, b1_lane, mw, bdw_lane, w2_eff, b2_lane)

    return out.reshape(B, c2, H, W)


# ----------------------------------------------------------------------------
# Deterministic parameter init (shapes follow the PyTorch module __init__).
# ----------------------------------------------------------------------------
def init_params(key, in_channels, out_channels, N=8):
    c1, c2 = in_channels, out_channels
    cm = c2 // N
    c = int(c2 * 0.5 / N)
    n_dw = N - 1
    ks = jax.random.split(key, 8)
    return {
        'w1': 0.2 * jax.random.normal(ks[0], (cm, c1), jnp.float32),
        'bn1_gamma': 1.0 + 0.1 * jax.random.normal(ks[1], (cm,), jnp.float32),
        'bn1_beta': 0.1 * jax.random.normal(ks[2], (cm,), jnp.float32),
        'bn1_mean': jnp.zeros((cm,), jnp.float32),
        'bn1_var': jnp.ones((cm,), jnp.float32),
        'wdw': 0.2 * jax.random.normal(ks[3], (n_dw, c, 3, 3), jnp.float32),
        'bndw_gamma': 1.0 + 0.1 * jax.random.normal(ks[4], (n_dw, c), jnp.float32),
        'bndw_beta': 0.1 * jax.random.normal(ks[5], (n_dw, c), jnp.float32),
        'bndw_mean': jnp.zeros((n_dw, c), jnp.float32),
        'bndw_var': jnp.ones((n_dw, c), jnp.float32),
        'w2': 0.2 * jax.random.normal(ks[6], (c2, c2 // 2), jnp.float32),
        'bn2_gamma': 1.0 + 0.1 * jax.random.normal(ks[7], (c2,), jnp.float32),
        'bn2_beta': jnp.zeros((c2,), jnp.float32),
        'bn2_mean': jnp.zeros((c2,), jnp.float32),
        'bn2_var': jnp.ones((c2,), jnp.float32),
    }


# ----------------------------------------------------------------------------
# Pure-JAX reference (NCHW, exact-erf GELU) for a sanity check.
# ----------------------------------------------------------------------------
def unet_decoder_reference(x, skip, params, out_channels, N=8):
    B, cx, h, w = x.shape
    _, cs, H, W = skip.shape
    c1 = cx + cs
    c2 = out_channels
    n_dw = N - 1

    def gelu(v):
        return 0.5 * v * (1.0 + jax.lax.erf(v * 0.7071067811865476))

    uh = _upsample_matrix(h)
    uw = _upsample_matrix(w)
    up = jnp.einsum('Hh,bchw->bcHw', uh, x)
    up = jnp.einsum('Ww,bcHw->bcHW', uw, up)
    xcat = jnp.concatenate([up, skip], axis=1)

    s1, b1 = _fold_bn(params['bn1_gamma'], params['bn1_beta'],
                      params['bn1_mean'], params['bn1_var'])
    t = jnp.einsum('oi,bihw->bohw', params['w1'], xcat)
    t = gelu(t * s1[None, :, None, None] + b1[None, :, None, None])
    x0, x1 = t[:, 0::2], t[:, 1::2]

    sd, bd = _fold_bn(params['bndw_gamma'], params['bndw_beta'],
                      params['bndw_mean'], params['bndw_var'])
    parts = [x0 + x1]
    cur = x1
    for i in range(n_dw):
        pad = jnp.pad(cur, ((0, 0), (0, 0), (1, 1), (1, 1)))
        o = jnp.zeros_like(cur)
        for kh in range(3):
            for kw in range(3):
                o = o + pad[:, :, kh:kh + H, kw:kw + W] * \
                    params['wdw'][i, :, kh, kw][None, :, None, None]
        cur = o * sd[i][None, :, None, None] + bd[i][None, :, None, None]
        parts.append(cur)

    y = jnp.concatenate(parts, axis=1)
    s2, b2 = _fold_bn(params['bn2_gamma'], params['bn2_beta'],
                      params['bn2_mean'], params['bn2_var'])
    y = jnp.einsum('oi,bihw->bohw', params['w2'], y)
    y = gelu(y * s2[None, :, None, None] + b2[None, :, None, None])
    return xcat + y if c1 == c2 else y


if __name__ == "__main__":
    B = 4              # B=4 -> 2 images packed per grid step, 2 parallel steps
    h = w = 8          # low-res input spatial
    cx = cs = 16       # channels of x and skip_connection
    in_channels = cx + cs      # 32  (channels after upsample + concat)
    out_channels = 32          # => residual add is active (c1 == c2)

    key = jax.random.PRNGKey(0)
    kx, ksk, kp = jax.random.split(key, 3)
    x = jax.random.normal(kx, (B, cx, h, w), jnp.float32)
    skip = jax.random.normal(ksk, (B, cs, 2 * h, 2 * w), jnp.float32)
    params = init_params(kp, in_channels, out_channels)

    out = jax.block_until_ready(unet_decoder_pallas(x, skip, params, out_channels))
    ref = jax.block_until_ready(unet_decoder_reference(x, skip, params, out_channels))

    assert out.shape == (B, out_channels, 2 * h, 2 * w), out.shape
    max_diff = float(jnp.max(jnp.abs(out - ref)))
    assert max_diff < 1e-2, f"max abs diff vs reference = {max_diff}"
    print("KERNEL_OK")
</pallas_src>

<mosaic_0001>
module attributes {stable_mosaic.version = 11 : i64} {
  func.func @_unet_decoder_kernel(%arg0: i32, %arg1: memref<1x32x64xf32, #tpu.memory_space<vmem>>, %arg2: memref<1x32x256xf32, #tpu.memory_space<vmem>>, %arg3: memref<64x256xf32, #tpu.memory_space<vmem>>, %arg4: memref<8x64xbf16, #tpu.memory_space<vmem>>, %arg5: memref<8x256xf32, #tpu.memory_space<vmem>>, %arg6: memref<63x4x256xf32, #tpu.memory_space<vmem>>, %arg7: memref<7x4x256xf32, #tpu.memory_space<vmem>>, %arg8: memref<8x64x4xf32, #tpu.memory_space<vmem>>, %arg9: memref<64x256xf32, #tpu.memory_space<vmem>>, %arg10: memref<1x64x256xf32, #tpu.memory_space<vmem>>) attributes {dimension_semantics = [#tpu.dimension_semantics<parallel>], iteration_bounds = array<i64: 2>, scalar_prefetch = 0 : i64, scratch_operands = 0 : i64, tpu.core_type = #tpu.core_type<tc>, window_params = [{transform_indices = @transform_0, window_bounds = array<i64: 1, 32, 64>}, {transform_indices = @transform_1, window_bounds = array<i64: 1, 32, 256>}, {pipeline_mode = #tpu.pipeline_mode<synchronous>, transform_indices = @transform_2, window_bounds = array<i64: 64, 256>}, {pipeline_mode = #tpu.pipeline_mode<synchronous>, transform_indices = @transform_3, window_bounds = array<i64: 8, 64>}, {pipeline_mode = #tpu.pipeline_mode<synchronous>, transform_indices = @transform_4, window_bounds = array<i64: 8, 256>}, {pipeline_mode = #tpu.pipeline_mode<synchronous>, transform_indices = @transform_5, window_bounds = array<i64: 63, 4, 256>}, {pipeline_mode = #tpu.pipeline_mode<synchronous>, transform_indices = @transform_6, window_bounds = array<i64: 7, 4, 256>}, {pipeline_mode = #tpu.pipeline_mode<synchronous>, transform_indices = @transform_7, window_bounds = array<i64: 8, 64, 4>}, {pipeline_mode = #tpu.pipeline_mode<synchronous>, transform_indices = @transform_8, window_bounds = array<i64: 64, 256>}, {transform_indices = @transform_9, window_bounds = array<i64: 1, 64, 256>}]} {
    %c0 = arith.constant 0 : index
    %c0_0 = arith.constant 0 : index
    %c0_1 = arith.constant 0 : index
    %0 = vector.load %arg1[%c0, %c0_0, %c0_1] : memref<1x32x64xf32, #tpu.memory_space<vmem>>, vector<1x32x64xf32>
    %1 = vector.shape_cast %0 : vector<1x32x64xf32> to vector<32x64xf32>
    %c0_2 = arith.constant 0 : index
    %c0_3 = arith.constant 0 : index
    %2 = vector.load %arg3[%c0_2, %c0_3] : memref<64x256xf32, #tpu.memory_space<vmem>>, vector<64x256xf32>
    %cst = arith.constant dense<0.000000e+00> : vector<32x256xf32>
    %3 = tpu.matmul %1, %2, %cst {dimension_numbers = #tpu.dot_dimension_numbers<[1], [0], [0], [1], [0, 0, 1, 1], [], []>} : vector<32x64xf32>, vector<64x256xf32>, vector<32x256xf32> -> vector<32x256xf32>
    %c0_4 = arith.constant 0 : index
    %c0_5 = arith.constant 0 : index
    %c0_6 = arith.constant 0 : index
    %4 = vector.load %arg2[%c0_4, %c0_5, %c0_6] : memref<1x32x256xf32, #tpu.memory_space<vmem>>, vector<1x32x256xf32>
    %5 = vector.shape_cast %4 : vector<1x32x256xf32> to vector<32x256xf32>
    %6 = vector.extract_strided_slice %3 {offsets = [0, 0], sizes = [16, 256], strides = [1, 1]} : vector<32x256xf32> to vector<16x256xf32>
    %7 = vector.extract_strided_slice %5 {offsets = [0, 0], sizes = [16, 256], strides = [1, 1]} : vector<32x256xf32> to vector<16x256xf32>
    %8 = vector.extract_strided_slice %3 {offsets = [16, 0], sizes = [16, 256], strides = [1, 1]} : vector<32x256xf32> to vector<16x256xf32>
    %9 = vector.extract_strided_slice %5 {offsets = [16, 0], sizes = [16, 256], strides = [1, 1]} : vector<32x256xf32> to vector<16x256xf32>
    %10 = tpu.concatenate %6, %7, %8, %9 in 0 : vector<16x256xf32>, vector<16x256xf32>, vector<16x256xf32>, vector<16x256xf32> -> vector<64x256xf32>
    %c0_7 = arith.constant 0 : index
    %c0_8 = arith.constant 0 : index
    %11 = vector.load %arg4[%c0_7, %c0_8] : memref<8x64xbf16, #tpu.memory_space<vmem>>, vector<8x64xbf16>
    %12 = arith.truncf %10 : vector<64x256xf32> to vector<64x256xbf16>
    %cst_9 = arith.constant dense<0.000000e+00> : vector<8x256xf32>
    %13 = tpu.matmul %11, %12, %cst_9 {dimension_numbers = #tpu.dot_dimension_numbers<[1], [0], [0], [1], [0, 0, 1, 1], [], []>} : vector<8x64xbf16>, vector<64x256xbf16>, vector<8x256xf32> -> vector<8x256xf32>
    %c0_10 = arith.constant 0 : index
    %c0_11 = arith.constant 0 : index
    %14 = vector.load %arg5[%c0_10, %c0_11] : memref<8x256xf32, #tpu.memory_space<vmem>>, vector<8x256xf32>
    %15 = arith.addf %13, %14 : vector<8x256xf32>
    %cst_12 = arith.constant 5.000000e-01 : f32
    %16 = vector.broadcast %cst_12 : f32 to vector<8x256xf32>
    %17 = arith.mulf %16, %15 : vector<8x256xf32>
    %18 = arith.mulf %15, %15 : vector<8x256xf32>
    %19 = arith.mulf %18, %15 : vector<8x256xf32>
    %cst_13 = arith.constant 4.471500e-02 : f32
    %20 = vector.broadcast %cst_13 : f32 to vector<8x256xf32>
    %21 = arith.mulf %20, %19 : vector<8x256xf32>
    %22 = arith.addf %15, %21 : vector<8x256xf32>
    %cst_14 = arith.constant 0.797884583 : f32
    %23 = vector.broadcast %cst_14 : f32 to vector<8x256xf32>
    %24 = arith.mulf %23, %22 : vector<8x256xf32>
    %25 = math.tanh %24 : vector<8x256xf32>
    %cst_15 = arith.constant 1.000000e+00 : f32
    %26 = vector.broadcast %cst_15 : f32 to vector<8x256xf32>
    %27 = arith.addf %26, %25 : vector<8x256xf32>
    %28 = arith.mulf %17, %27 : vector<8x256xf32>
    %29 = vector.extract_strided_slice %28 {offsets = [0, 0], sizes = [4, 256], strides = [1, 1]} : vector<8x256xf32> to vector<4x256xf32>
    %30 = vector.extract_strided_slice %28 {offsets = [4, 0], sizes = [4, 256], strides = [1, 1]} : vector<8x256xf32> to vector<4x256xf32>
    %c0_16 = arith.constant 0 : index
    %c0_17 = arith.constant 0 : index
    %c0_18 = arith.constant 0 : index
    %31 = vector.load %arg8[%c0_16, %c0_17, %c0_18] : memref<8x64x4xf32, #tpu.memory_space<vmem>>, vector<1x64x4xf32>
    %32 = vector.shape_cast %31 : vector<1x64x4xf32> to vector<64x4xf32>
    %33 = arith.addf %29, %30 : vector<4x256xf32>
    %cst_19 = arith.constant dense<0.000000e+00> : vector<64x256xf32>
    %34 = tpu.matmul %32, %33, %cst_19 {dimension_numbers = #tpu.dot_dimension_numbers<[1], [0], [0], [1], [0, 0, 1, 1], [], []>} : vector<64x4xf32>, vector<4x256xf32>, vector<64x256xf32> -> vector<64x256xf32>
    %c4 = arith.constant 4 : index
    %c0_20 = arith.constant 0 : index
    %c0_21 = arith.constant 0 : index
    %35 = vector.load %arg6[%c4, %c0_20, %c0_21] : memref<63x4x256xf32, #tpu.memory_space<vmem>>, vector<1x4x256xf32>
    %36 = vector.shape_cast %35 : vector<1x4x256xf32> to vector<4x256xf32>
    %37 = arith.mulf %30, %36 : vector<4x256xf32>
    %c17_i32 = arith.constant 17 : i32
    %38 = tpu.dynamic_rotate %30 by %c17_i32 dim 1 : vector<4x256xf32>, i32 -> vector<4x256xf32>
    %c0_22 = arith.constant 0 : index
    %c0_23 = arith.constant 0 : index
    %c0_24 = arith.constant 0 : index
    %39 = vector.load %arg6[%c0_22, %c0_23, %c0_24] : memref<63x4x256xf32, #tpu.memory_space<vmem>>, vector<1x4x256xf32>
    %40 = vector.shape_cast %39 : vector<1x4x256xf32> to vector<4x256xf32>
    %41 = arith.mulf %38, %40 : vector<4x256xf32>
    %42 = arith.addf %37, %41 : vector<4x256xf32>
    %c16_i32 = arith.constant 16 : i32
    %43 = tpu.dynamic_rotate %30 by %c16_i32 dim 1 : vector<4x256xf32>, i32 -> vector<4x256xf32>
    %c1 = arith.constant 1 : index
    %c0_25 = arith.constant 0 : index
    %c0_26 = arith.constant 0 : index
    %44 = vector.load %arg6[%c1, %c0_25, %c0_26] : memref<63x4x256xf32, #tpu.memory_space<vmem>>, vector<1x4x256xf32>
    %45 = vector.shape_cast %44 : vector<1x4x256xf32> to vector<4x256xf32>
    %46 = arith.mulf %43, %45 : vector<4x256xf32>
    %47 = arith.addf %42, %46 : vector<4x256xf32>
    %c15_i32 = arith.constant 15 : i32
    %48 = tpu.dynamic_rotate %30 by %c15_i32 dim 1 : vector<4x256xf32>, i32 -> vector<4x256xf32>
    %c2 = arith.constant 2 : index
    %c0_27 = arith.constant 0 : index
    %c0_28 = arith.constant 0 : index
    %49 = vector.load %arg6[%c2, %c0_27, %c0_28] : memref<63x4x256xf32, #tpu.memory_space<vmem>>, vector<1x4x256xf32>
    %50 = vector.shape_cast %49 : vector<1x4x256xf32> to vector<4x256xf32>
    %51 = arith.mulf %48, %50 : vector<4x256xf32>
    %52 = arith.addf %47, %51 : vector<4x256xf32>
    %c1_i32 = arith.constant 1 : i32
    %53 = tpu.dynamic_rotate %30 by %c1_i32 dim 1 : vector<4x256xf32>, i32 -> vector<4x256xf32>
    %c3 = arith.constant 3 : index
    %c0_29 = arith.constant 0 : index
    %c0_30 = arith.constant 0 : index
    %54 = vector.load %arg6[%c3, %c0_29, %c0_30] : memref<63x4x256xf32, #tpu.memory_space<vmem>>, vector<1x4x256xf32>
    %55 = vector.shape_cast %54 : vector<1x4x256xf32> to vector<4x256xf32>
    %56 = arith.mulf %53, %55 : vector<4x256xf32>
    %57 = arith.addf %52, %56 : vector<4x256xf32>
    %c255_i32 = arith.constant 255 : i32
    %58 = tpu.dynamic_rotate %30 by %c255_i32 dim 1 : vector<4x256xf32>, i32 -> vector<4x256xf32>
    %c5 = arith.constant 5 : index
    %c0_31 = arith.constant 0 : index
    %c0_32 = arith.constant 0 : index
    %59 = vector.load %arg6[%c5, %c0_31, %c0_32] : memref<63x4x256xf32, #tpu.memory_space<vmem>>, vector<1x4x256xf32>
    %60 = vector.shape_cast %59 : vector<1x4x256xf32> to vector<4x256xf32>
    %61 = arith.mulf %58, %60 : vector<4x256xf32>
    %62 = arith.addf %57, %61 : vector<4x256xf32>
    %c241_i32 = arith.constant 241 : i32
    %63 = tpu.dynamic_rotate %30 by %c241_i32 dim 1 : vector<4x256xf32>, i32 -> vector<4x256xf32>
    %c6 = arith.constant 6 : index
    %c0_33 = arith.constant 0 : index
    %c0_34 = arith.constant 0 : index
    %64 = vector.load %arg6[%c6, %c0_33, %c0_34] : memref<63x4x256xf32, #tpu.memory_space<vmem>>, vector<1x4x256xf32>
    %65 = vector.shape_cast %64 : vector<1x4x256xf32> to vector<4x256xf32>
    %66 = arith.mulf %63, %65 : vector<4x256xf32>
    %67 = arith.addf %62, %66 : vector<4x256xf32>
    %c240_i32 = arith.constant 240 : i32
    %68 = tpu.dynamic_rotate %30 by %c240_i32 dim 1 : vector<4x256xf32>, i32 -> vector<4x256xf32>
    %c7 = arith.constant 7 : index
    %c0_35 = arith.constant 0 : index
    %c0_36 = arith.constant 0 : index
    %69 = vector.load %arg6[%c7, %c0_35, %c0_36] : memref<63x4x256xf32, #tpu.memory_space<vmem>>, vector<1x4x256xf32>
    %70 = vector.shape_cast %69 : vector<1x4x256xf32> to vector<4x256xf32>
    %71 = arith.mulf %68, %70 : vector<4x256xf32>
    %72 = arith.addf %67, %71 : vector<4x256xf32>
    %c239_i32 = arith.constant 239 : i32
    %73 = tpu.dynamic_rotate %30 by %c239_i32 dim 1 : vector<4x256xf32>, i32 -> vector<4x256xf32>
    %c8 = arith.constant 8 : index
    %c0_37 = arith.constant 0 : index
    %c0_38 = arith.constant 0 : index
    %74 = vector.load %arg6[%c8, %c0_37, %c0_38] : memref<63x4x256xf32, #tpu.memory_space<vmem>>, vector<1x4x256xf32>
    %75 = vector.shape_cast %74 : vector<1x4x256xf32> to vector<4x256xf32>
    %76 = arith.mulf %73, %75 : vector<4x256xf32>
    %77 = arith.addf %72, %76 : vector<4x256xf32>
    %c0_39 = arith.constant 0 : index
    %c0_40 = arith.constant 0 : index
    %c0_41 = arith.constant 0 : index
    %78 = vector.load %arg7[%c0_39, %c0_40, %c0_41] : memref<7x4x256xf32, #tpu.memory_space<vmem>>, vector<1x4x256xf32>
    %79 = vector.shape_cast %78 : vector<1x4x256xf32> to vector<4x256xf32>
    %80 = arith.addf %77, %79 : vector<4x256xf32>
    %c1_42 = arith.constant 1 : index
    %c0_43 = arith.constant 0 : index
    %c0_44 = arith.constant 0 : index
    %81 = vector.load %arg8[%c1_42, %c0_43, %c0_44] : memref<8x64x4xf32, #tpu.memory_space<vmem>>, vector<1x64x4xf32>
    %82 = vector.shape_cast %81 : vector<1x64x4xf32> to vector<64x4xf32>
    %cst_45 = arith.constant dense<0.000000e+00> : vector<64x256xf32>
    %83 = tpu.matmul %82, %80, %cst_45 {dimension_numbers = #tpu.dot_dimension_numbers<[1], [0], [0], [1], [0, 0, 1, 1], [], []>} : vector<64x4xf32>, vector<4x256xf32>, vector<64x256xf32> -> vector<64x256xf32>
    %84 = arith.addf %34, %83 : vector<64x256xf32>
    %c13 = arith.constant 13 : index
    %c0_46 = arith.constant 0 : index
    %c0_47 = arith.constant 0 : index
    %85 = vector.load %arg6[%c13, %c0_46, %c0_47] : memref<63x4x256xf32, #tpu.memory_space<vmem>>, vector<1x4x256xf32>
    %86 = vector.shape_cast %85 : vector<1x4x256xf32> to vector<4x256xf32>
    %87 = arith.mulf %80, %86 : vector<4x256xf32>
    %c17_i32_48 = arith.constant 17 : i32
    %88 = tpu.dynamic_rotate %80 by %c17_i32_48 dim 1 : vector<4x256xf32>, i32 -> vector<4x256xf32>
    %c9 = arith.constant 9 : index
    %c0_49 = arith.constant 0 : index
    %c0_50 = arith.constant 0 : index
    %89 = vector.load %arg6[%c9, %c0_49, %c0_50] : memref<63x4x256xf32, #tpu.memory_space<vmem>>, vector<1x4x256xf32>
    %90 = vector.shape_cast %89 : vector<1x4x256xf32> to vector<4x256xf32>
    %91 = arith.mulf %88, %90 : vector<4x256xf32>
    %92 = arith.addf %87, %91 : vector<4x256xf32>
    %c16_i32_51 = arith.constant 16 : i32
    %93 = tpu.dynamic_rotate %80 by %c16_i32_51 dim 1 : vector<4x256xf32>, i32 -> vector<4x256xf32>
    %c10 = arith.constant 10 : index
    %c0_52 = arith.constant 0 : index
    %c0_53 = arith.constant 0 : index
    %94 = vector.load %arg6[%c10, %c0_52, %c0_53] : memref<63x4x256xf32, #tpu.memory_space<vmem>>, vector<1x4x256xf32>
    %95 = vector.shape_cast %94 : vector<1x4x256xf32> to vector<4x256xf32>
    %96 = arith.mulf %93, %95 : vector<4x256xf32>
    %97 = arith.addf %92, %96 : vector<4x256xf32>
    %c15_i32_54 = arith.constant 15 : i32
    %98 = tpu.dynamic_rotate %80 by %c15_i32_54 dim 1 : vector<4x256xf32>, i32 -> vector<4x256xf32>
    %c11 = arith.constant 11 : index
    %c0_55 = arith.constant 0 : index
    %c0_56 = arith.constant 0 : index
    %99 = vector.load %arg6[%c11, %c0_55, %c0_56] : memref<63x4x256xf32, #tpu.memory_space<vmem>>, vector<1x4x256xf32>
    %100 = vector.shape_cast %99 : vector<1x4x256xf32> to vector<4x256xf32>
    %101 = arith.mulf %98, %100 : vector<4x256xf32>
    %102 = arith.addf %97, %101 : vector<4x256xf32>
    %c1_i32_57 = arith.constant 1 : i32
    %103 = tpu.dynamic_rotate %80 by %c1_i32_57 dim 1 : vector<4x256xf32>, i32 -> vector<4x256xf32>
    %c12 = arith.constant 12 : index
    %c0_58 = arith.constant 0 : index
    %c0_59 = arith.constant 0 : index
    %104 = vector.load %arg6[%c12, %c0_58, %c0_59] : memref<63x4x256xf32, #tpu.memory_space<vmem>>, vector<1x4x256xf32>
    %105 = vector.shape_cast %104 : vector<1x4x256xf32> to vector<4x256xf32>
    %106 = arith.mulf %103, %105 : vector<4x256xf32>
    %107 = arith.addf %102, %106 : vector<4x256xf32>
    %c255_i32_60 = arith.constant 255 : i32
    %108 = tpu.dynamic_rotate %80 by %c255_i32_60 dim 1 : vector<4x256xf32>, i32 -> vector<4x256xf32>
    %c14 = arith.constant 14 : index
    %c0_61 = arith.constant 0 : index
    %c0_62 = arith.constant 0 : index
    %109 = vector.load %arg6[%c14, %c0_61, %c0_62] : memref<63x4x256xf32, #tpu.memory_space<vmem>>, vector<1x4x256xf32>
    %110 = vector.shape_cast %109 : vector<1x4x256xf32> to vector<4x256xf32>
    %111 = arith.mulf %108, %110 : vector<4x256xf32>
    %112 = arith.addf %107, %111 : vector<4x256xf32>
    %c241_i32_63 = arith.constant 241 : i32
    %113 = tpu.dynamic_rotate %80 by %c241_i32_63 dim 1 : vector<4x256xf32>, i32 -> vector<4x256xf32>
    %c15 = arith.constant 15 : index
    %c0_64 = arith.constant 0 : index
    %c0_65 = arith.constant 0 : index
    %114 = vector.load %arg6[%c15, %c0_64, %c0_65] : memref<63x4x256xf32, #tpu.memory_space<vmem>>, vector<1x4x256xf32>
    %115 = vector.shape_cast %114 : vector<1x4x256xf32> to vector<4x256xf32>
    %116 = arith.mulf %113, %115 : vector<4x256xf32>
    %117 = arith.addf %112, %116 : vector<4x256xf32>
    %c240_i32_66 = arith.constant 240 : i32
    %118 = tpu.dynamic_rotate %80 by %c240_i32_66 dim 1 : vector<4x256xf32>, i32 -> vector<4x256xf32>
    %c16 = arith.constant 16 : index
    %c0_67 = arith.constant 0 : index
    %c0_68 = arith.constant 0 : index
    %119 = vector.load %arg6[%c16, %c0_67, %c0_68] : memref<63x4x256xf32, #tpu.memory_space<vmem>>, vector<1x4x256xf32>
    %120 = vector.shape_cast %119 : vector<1x4x256xf32> to vector<4x256xf32>
    %121 = arith.mulf %118, %120 : vector<4x256xf32>
    %122 = arith.addf %117, %121 : vector<4x256xf32>
    %c239_i32_69 = arith.constant 239 : i32
    %123 = tpu.dynamic_rotate %80 by %c239_i32_69 dim 1 : vector<4x256xf32>, i32 -> vector<4x256xf32>
    %c17 = arith.constant 17 : index
    %c0_70 = arith.constant 0 : index
    %c0_71 = arith.constant 0 : index
    %124 = vector.load %arg6[%c17, %c0_70, %c0_71] : memref<63x4x256xf32, #tpu.memory_space<vmem>>, vector<1x4x256xf32>
    %125 = vector.shape_cast %124 : vector<1x4x256xf32> to vector<4x256xf32>
    %126 = arith.mulf %123, %125 : vector<4x256xf32>
    %127 = arith.addf %122, %126 : vector<4x256xf32>
    %c1_72 = arith.constant 1 : index
    %c0_73 = arith.constant 0 : index
    %c0_74 = arith.constant 0 : index
    %128 = vector.load %arg7[%c1_72, %c0_73, %c0_74] : memref<7x4x256xf32, #tpu.memory_space<vmem>>, vector<1x4x256xf32>
    %129 = vector.shape_cast %128 : vector<1x4x256xf32> to vector<4x256xf32>
    %130 = arith.addf %127, %129 : vector<4x256xf32>
    %c2_75 = arith.constant 2 : index
    %c0_76 = arith.constant 0 : index
    %c0_77 = arith.constant 0 : index
    %131 = vector.load %arg8[%c2_75, %c0_76, %c0_77] : memref<8x64x4xf32, #tpu.memory_space<vmem>>, vector<1x64x4xf32>
    %132 = vector.shape_cast %131 : vector<1x64x4xf32> to vector<64x4xf32>
    %cst_78 = arith.constant dense<0.000000e+00> : vector<64x256xf32>
    %133 = tpu.matmul %132, %130, %cst_78 {dimension_numbers = #tpu.dot_dimension_numbers<[1], [0], [0], [1], [0, 0, 1, 1], [], []>} : vector<64x4xf32>, vector<4x256xf32>, vector<64x256xf32> -> vector<64x256xf32>
    %134 = arith.addf %84, %133 : vector<64x256xf32>
    %c22 = arith.constant 22 : index
    %c0_79 = arith.constant 0 : index
    %c0_80 = arith.constant 0 : index
    %135 = vector.load %arg6[%c22, %c0_79, %c0_80] : memref<63x4x256xf32, #tpu.memory_space<vmem>>, vector<1x4x256xf32>
    %136 = vector.shape_cast %135 : vector<1x4x256xf32> to vector<4x256xf32>
    %137 = arith.mulf %130, %136 : vector<4x256xf32>
    %c17_i32_81 = arith.constant 17 : i32
    %138 = tpu.dynamic_rotate %130 by %c17_i32_81 dim 1 : vector<4x256xf32>, i32 -> vector<4x256xf32>
    %c18 = arith.constant 18 : index
    %c0_82 = arith.constant 0 : index
    %c0_83 = arith.constant 0 : index
    %139 = vector.load %arg6[%c18, %c0_82, %c0_83] : memref<63x4x256xf32, #tpu.memory_space<vmem>>, vector<1x4x256xf32>
    %140 = vector.shape_cast %139 : vector<1x4x256xf32> to vector<4x256xf32>
    %141 = arith.mulf %138, %140 : vector<4x256xf32>
    %142 = arith.addf %137, %141 : vector<4x256xf32>
    %c16_i32_84 = arith.constant 16 : i32
    %143 = tpu.dynamic_rotate %130 by %c16_i32_84 dim 1 : vector<4x256xf32>, i32 -> vector<4x256xf32>
    %c19 = arith.constant 19 : index
    %c0_85 = arith.constant 0 : index
    %c0_86 = arith.constant 0 : index
    %144 = vector.load %arg6[%c19, %c0_85, %c0_86] : memref<63x4x256xf32, #tpu.memory_space<vmem>>, vector<1x4x256xf32>
    %145 = vector.shape_cast %144 : vector<1x4x256xf32> to vector<4x256xf32>
    %146 = arith.mulf %143, %145 : vector<4x256xf32>
    %147 = arith.addf %142, %146 : vector<4x256xf32>
    %c15_i32_87 = arith.constant 15 : i32
    %148 = tpu.dynamic_rotate %130 by %c15_i32_87 dim 1 : vector<4x256xf32>, i32 -> vector<4x256xf32>
    %c20 = arith.constant 20 : index
    %c0_88 = arith.constant 0 : index
    %c0_89 = arith.constant 0 : index
    %149 = vector.load %arg6[%c20, %c0_88, %c0_89] : memref<63x4x256xf32, #tpu.memory_space<vmem>>, vector<1x4x256xf32>
    %150 = vector.shape_cast %149 : vector<1x4x256xf32> to vector<4x256xf32>
    %151 = arith.mulf %148, %150 : vector<4x256xf32>
    %152 = arith.addf %147, %151 : vector<4x256xf32>
    %c1_i32_90 = arith.constant 1 : i32
    %153 = tpu.dynamic_rotate %130 by %c1_i32_90 dim 1 : vector<4x256xf32>, i32 -> vector<4x256xf32>
    %c21 = arith.constant 21 : index
    %c0_91 = arith.constant 0 : index
    %c0_92 = arith.constant 0 : index
    %154 = vector.load %arg6[%c21, %c0_91, %c0_92] : memref<63x4x256xf32, #tpu.memory_space<vmem>>, vector<1x4x256xf32>
    %155 = vector.shape_cast %154 : vector<1x4x256xf32> to vector<4x256xf32>
    %156 = arith.mulf %153, %155 : vector<4x256xf32>
    %157 = arith.addf %152, %156 : vector<4x256xf32>
    %c255_i32_93 = arith.constant 255 : i32
    %158 = tpu.dynamic_rotate %130 by %c255_i32_93 dim 1 : vector<4x256xf32>, i32 -> vector<4x256xf32>
    %c23 = arith.constant 23 : index
    %c0_94 = arith.constant 0 : index
    %c0_95 = arith.constant 0 : index
    %159 = vector.load %arg6[%c23, %c0_94, %c0_95] : memref<63x4x256xf32, #tpu.memory_space<vmem>>, vector<1x4x256xf32>
    %160 = vector.shape_cast %159 : vector<1x4x256xf32> to vector<4x256xf32>
    %161 = arith.mulf %158, %160 : vector<4x256xf32>
    %162 = arith.addf %157, %161 : vector<4x256xf32>
    %c241_i32_96 = arith.constant 241 : i32
    %163 = tpu.dynamic_rotate %130 by %c241_i32_96 dim 1 : vector<4x256xf32>, i32 -> vector<4x256xf32>
    %c24 = arith.constant 24 : index
    %c0_97 = arith.constant 0 : index
    %c0_98 = arith.constant 0 : index
    %164 = vector.load %arg6[%c24, %c0_97, %c0_98] : memref<63x4x256xf32, #tpu.memory_space<vmem>>, vector<1x4x256xf32>
    %165 = vector.shape_cast %164 : vector<1x4x256xf32> to vector<4x256xf32>
    %166 = arith.mulf %163, %165 : vector<4x256xf32>
    %167 = arith.addf %162, %166 : vector<4x256xf32>
    %c240_i32_99 = arith.constant 240 : i32
    %168 = tpu.dynamic_rotate %130 by %c240_i32_99 dim 1 : vector<4x256xf32>, i32 -> vector<4x256xf32>
    %c25 = arith.constant 25 : index
    %c0_100 = arith.constant 0 : index
    %c0_101 = arith.constant 0 : index
    %169 = vector.load %arg6[%c25, %c0_100, %c0_101] : memref<63x4x256xf32, #tpu.memory_space<vmem>>, vector<1x4x256xf32>
    %170 = vector.shape_cast %169 : vector<1x4x256xf32> to vector<4x256xf32>
    %171 = arith.mulf %168, %170 : vector<4x256xf32>
    %172 = arith.addf %167, %171 : vector<4x256xf32>
    %c239_i32_102 = arith.constant 239 : i32
    %173 = tpu.dynamic_rotate %130 by %c239_i32_102 dim 1 : vector<4x256xf32>, i32 -> vector<4x256xf32>
    %c26 = arith.constant 26 : index
    %c0_103 = arith.constant 0 : index
    %c0_104 = arith.constant 0 : index
    %174 = vector.load %arg6[%c26, %c0_103, %c0_104] : memref<63x4x256xf32, #tpu.memory_space<vmem>>, vector<1x4x256xf32>
    %175 = vector.shape_cast %174 : vector<1x4x256xf32> to vector<4x256xf32>
    %176 = arith.mulf %173, %175 : vector<4x256xf32>
    %177 = arith.addf %172, %176 : vector<4x256xf32>
    %c2_105 = arith.constant 2 : index
    %c0_106 = arith.constant 0 : index
    %c0_107 = arith.constant 0 : index
    %178 = vector.load %arg7[%c2_105, %c0_106, %c0_107] : memref<7x4x256xf32, #tpu.memory_space<vmem>>, vector<1x4x256xf32>
    %179 = vector.shape_cast %178 : vector<1x4x256xf32> to vector<4x256xf32>
    %180 = arith.addf %177, %179 : vector<4x256xf32>
    %c3_108 = arith.constant 3 : index
    %c0_109 = arith.constant 0 : index
    %c0_110 = arith.constant 0 : index
    %181 = vector.load %arg8[%c3_108, %c0_109, %c0_110] : memref<8x64x4xf32, #tpu.memory_space<vmem>>, vector<1x64x4xf32>
    %182 = vector.shape_cast %181 : vector<1x64x4xf32> to vector<64x4xf32>
    %cst_111 = arith.constant dense<0.000000e+00> : vector<64x256xf32>
    %183 = tpu.matmul %182, %180, %cst_111 {dimension_numbers = #tpu.dot_dimension_numbers<[1], [0], [0], [1], [0, 0, 1, 1], [], []>} : vector<64x4xf32>, vector<4x256xf32>, vector<64x256xf32> -> vector<64x256xf32>
    %184 = arith.addf %134, %183 : vector<64x256xf32>
    %c31 = arith.constant 31 : index
    %c0_112 = arith.constant 0 : index
    %c0_113 = arith.constant 0 : index
    %185 = vector.load %arg6[%c31, %c0_112, %c0_113] : memref<63x4x256xf32, #tpu.memory_space<vmem>>, vector<1x4x256xf32>
    %186 = vector.shape_cast %185 : vector<1x4x256xf32> to vector<4x256xf32>
    %187 = arith.mulf %180, %186 : vector<4x256xf32>
    %c17_i32_114 = arith.constant 17 : i32
    %188 = tpu.dynamic_rotate %180 by %c17_i32_114 dim 1 : vector<4x256xf32>, i32 -> vector<4x256xf32>
    %c27 = arith.constant 27 : index
    %c0_115 = arith.constant 0 : index
    %c0_116 = arith.constant 0 : index
    %189 = vector.load %arg6[%c27, %c0_115, %c0_116] : memref<63x4x256xf32, #tpu.memory_space<vmem>>, vector<1x4x256xf32>
    %190 = vector.shape_cast %189 : vector<1x4x256xf32> to vector<4x256xf32>
    %191 = arith.mulf %188, %190 : vector<4x256xf32>
    %192 = arith.addf %187, %191 : vector<4x256xf32>
    %c16_i32_117 = arith.constant 16 : i32
    %193 = tpu.dynamic_rotate %180 by %c16_i32_117 dim 1 : vector<4x256xf32>, i32 -> vector<4x256xf32>
    %c28 = arith.constant 28 : index
    %c0_118 = arith.constant 0 : index
    %c0_119 = arith.constant 0 : index
    %194 = vector.load %arg6[%c28, %c0_118, %c0_119] : memref<63x4x256xf32, #tpu.memory_space<vmem>>, vector<1x4x256xf32>
    %195 = vector.shape_cast %194 : vector<1x4x256xf32> to vector<4x256xf32>
    %196 = arith.mulf %193, %195 : vector<4x256xf32>
    %197 = arith.addf %192, %196 : vector<4x256xf32>
    %c15_i32_120 = arith.constant 15 : i32
    %198 = tpu.dynamic_rotate %180 by %c15_i32_120 dim 1 : vector<4x256xf32>, i32 -> vector<4x256xf32>
    %c29 = arith.constant 29 : index
    %c0_121 = arith.constant 0 : index
    %c0_122 = arith.constant 0 : index
    %199 = vector.load %arg6[%c29, %c0_121, %c0_122] : memref<63x4x256xf32, #tpu.memory_space<vmem>>, vector<1x4x256xf32>
    %200 = vector.shape_cast %199 : vector<1x4x256xf32> to vector<4x256xf32>
    %201 = arith.mulf %198, %200 : vector<4x256xf32>
    %202 = arith.addf %197, %201 : vector<4x256xf32>
    %c1_i32_123 = arith.constant 1 : i32
    %203 = tpu.dynamic_rotate %180 by %c1_i32_123 dim 1 : vector<4x256xf32>, i32 -> vector<4x256xf32>
    %c30 = arith.constant 30 : index
    %c0_124 = arith.constant 0 : index
    %c0_125 = arith.constant 0 : index
    %204 = vector.load %arg6[%c30, %c0_124, %c0_125] : memref<63x4x256xf32, #tpu.memory_space<vmem>>, vector<1x4x256xf32>
    %205 = vector.shape_cast %204 : vector<1x4x256xf32> to vector<4x256xf32>
    %206 = arith.mulf %203, %205 : vector<4x256xf32>
    %207 = arith.addf %202, %206 : vector<4x256xf32>
    %c255_i32_126 = arith.constant 255 : i32
    %208 = tpu.dynamic_rotate %180 by %c255_i32_126 dim 1 : vector<4x256xf32>, i32 -> vector<4x256xf32>
    %c32 = arith.constant 32 : index
    %c0_127 = arith.constant 0 : index
    %c0_128 = arith.constant 0 : index
    %209 = vector.load %arg6[%c32, %c0_127, %c0_128] : memref<63x4x256xf32, #tpu.memory_space<vmem>>, vector<1x4x256xf32>
    %210 = vector.shape_cast %209 : vector<1x4x256xf32> to vector<4x256xf32>
    %211 = arith.mulf %208, %210 : vector<4x256xf32>
    %212 = arith.addf %207, %211 : vector<4x256xf32>
    %c241_i32_129 = arith.constant 241 : i32
    %213 = tpu.dynamic_rotate %180 by %c241_i32_129 dim 1 : vector<4x256xf32>, i32 -> vector<4x256xf32>
    %c33 = arith.constant 33 : index
    %c0_130 = arith.constant 0 : index
    %c0_131 = arith.constant 0 : index
    %214 = vector.load %arg6[%c33, %c0_130, %c0_131] : memref<63x4x256xf32, #tpu.memory_space<vmem>>, vector<1x4x256xf32>
    %215 = vector.shape_cast %214 : vector<1x4x256xf32> to vector<4x256xf32>
    %216 = arith.mulf %213, %215 : vector<4x256xf32>
    %217 = arith.addf %212, %216 : vector<4x256xf32>
    %c240_i32_132 = arith.constant 240 : i32
    %218 = tpu.dynamic_rotate %180 by %c240_i32_132 dim 1 : vector<4x256xf32>, i32 -> vector<4x256xf32>
    %c34 = arith.constant 34 : index
    %c0_133 = arith.constant 0 : index
    %c0_134 = arith.constant 0 : index
    %219 = vector.load %arg6[%c34, %c0_133, %c0_134] : memref<63x4x256xf32, #tpu.memory_space<vmem>>, vector<1x4x256xf32>
    %220 = vector.shape_cast %219 : vector<1x4x256xf32> to vector<4x256xf32>
    %221 = arith.mulf %218, %220 : vector<4x256xf32>
    %222 = arith.addf %217, %221 : vector<4x256xf32>
    %c239_i32_135 = arith.constant 239 : i32
    %223 = tpu.dynamic_rotate %180 by %c239_i32_135 dim 1 : vector<4x256xf32>, i32 -> vector<4x256xf32>
    %c35 = arith.constant 35 : index
    %c0_136 = arith.constant 0 : index
    %c0_137 = arith.constant 0 : index
    %224 = vector.load %arg6[%c35, %c0_136, %c0_137] : memref<63x4x256xf32, #tpu.memory_space<vmem>>, vector<1x4x256xf32>
    %225 = vector.shape_cast %224 : vector<1x4x256xf32> to vector<4x256xf32>
    %226 = arith.mulf %223, %225 : vector<4x256xf32>
    %227 = arith.addf %222, %226 : vector<4x256xf32>
    %c3_138 = arith.constant 3 : index
    %c0_139 = arith.constant 0 : index
    %c0_140 = arith.constant 0 : index
    %228 = vector.load %arg7[%c3_138, %c0_139, %c0_140] : memref<7x4x256xf32, #tpu.memory_space<vmem>>, vector<1x4x256xf32>
    %229 = vector.shape_cast %228 : vector<1x4x256xf32> to vector<4x256xf32>
    %230 = arith.addf %227, %229 : vector<4x256xf32>
    %c4_141 = arith.constant 4 : index
    %c0_142 = arith.constant 0 : index
    %c0_143 = arith.constant 0 : index
    %231 = vector.load %arg8[%c4_141, %c0_142, %c0_143] : memref<8x64x4xf32, #tpu.memory_space<vmem>>, vector<1x64x4xf32>
    %232 = vector.shape_cast %231 : vector<1x64x4xf32> to vector<64x4xf32>
    %cst_144 = arith.constant dense<0.000000e+00> : vector<64x256xf32>
    %233 = tpu.matmul %232, %230, %cst_144 {dimension_numbers = #tpu.dot_dimension_numbers<[1], [0], [0], [1], [0, 0, 1, 1], [], []>} : vector<64x4xf32>, vector<4x256xf32>, vector<64x256xf32> -> vector<64x256xf32>
    %234 = arith.addf %184, %233 : vector<64x256xf32>
    %c40 = arith.constant 40 : index
    %c0_145 = arith.constant 0 : index
    %c0_146 = arith.constant 0 : index
    %235 = vector.load %arg6[%c40, %c0_145, %c0_146] : memref<63x4x256xf32, #tpu.memory_space<vmem>>, vector<1x4x256xf32>
    %236 = vector.shape_cast %235 : vector<1x4x256xf32> to vector<4x256xf32>
    %237 = arith.mulf %230, %236 : vector<4x256xf32>
    %c17_i32_147 = arith.constant 17 : i32
    %238 = tpu.dynamic_rotate %230 by %c17_i32_147 dim 1 : vector<4x256xf32>, i32 -> vector<4x256xf32>
    %c36 = arith.constant 36 : index
    %c0_148 = arith.constant 0 : index
    %c0_149 = arith.constant 0 : index
    %239 = vector.load %arg6[%c36, %c0_148, %c0_149] : memref<63x4x256xf32, #tpu.memory_space<vmem>>, vector<1x4x256xf32>
    %240 = vector.shape_cast %239 : vector<1x4x256xf32> to vector<4x256xf32>
    %241 = arith.mulf %238, %240 : vector<4x256xf32>
    %242 = arith.addf %237, %241 : vector<4x256xf32>
    %c16_i32_150 = arith.constant 16 : i32
    %243 = tpu.dynamic_rotate %230 by %c16_i32_150 dim 1 : vector<4x256xf32>, i32 -> vector<4x256xf32>
    %c37 = arith.constant 37 : index
    %c0_151 = arith.constant 0 : index
    %c0_152 = arith.constant 0 : index
    %244 = vector.load %arg6[%c37, %c0_151, %c0_152] : memref<63x4x256xf32, #tpu.memory_space<vmem>>, vector<1x4x256xf32>
    %245 = vector.shape_cast %244 : vector<1x4x256xf32> to vector<4x256xf32>
    %246 = arith.mulf %243, %245 : vector<4x256xf32>
    %247 = arith.addf %242, %246 : vector<4x256xf32>
    %c15_i32_153 = arith.constant 15 : i32
    %248 = tpu.dynamic_rotate %230 by %c15_i32_153 dim 1 : vector<4x256xf32>, i32 -> vector<4x256xf32>
    %c38 = arith.constant 38 : index
    %c0_154 = arith.constant 0 : index
    %c0_155 = arith.constant 0 : index
    %249 = vector.load %arg6[%c38, %c0_154, %c0_155] : memref<63x4x256xf32, #tpu.memory_space<vmem>>, vector<1x4x256xf32>
    %250 = vector.shape_cast %249 : vector<1x4x256xf32> to vector<4x256xf32>
    %251 = arith.mulf %248, %250 : vector<4x256xf32>
    %252 = arith.addf %247, %251 : vector<4x256xf32>
    %c1_i32_156 = arith.constant 1 : i32
    %253 = tpu.dynamic_rotate %230 by %c1_i32_156 dim 1 : vector<4x256xf32>, i32 -> vector<4x256xf32>
    %c39 = arith.constant 39 : index
    %c0_157 = arith.constant 0 : index
    %c0_158 = arith.constant 0 : index
    %254 = vector.load %arg6[%c39, %c0_157, %c0_158] : memref<63x4x256xf32, #tpu.memory_space<vmem>>, vector<1x4x256xf32>
    %255 = vector.shape_cast %254 : vector<1x4x256xf32> to vector<4x256xf32>
    %256 = arith.mulf %253, %255 : vector<4x256xf32>
    %257 = arith.addf %252, %256 : vector<4x256xf32>
    %c255_i32_159 = arith.constant 255 : i32
    %258 = tpu.dynamic_rotate %230 by %c255_i32_159 dim 1 : vector<4x256xf32>, i32 -> vector<4x256xf32>
    %c41 = arith.constant 41 : index
    %c0_160 = arith.constant 0 : index
    %c0_161 = arith.constant 0 : index
    %259 = vector.load %arg6[%c41, %c0_160, %c0_161] : memref<63x4x256xf32, #tpu.memory_space<vmem>>, vector<1x4x256xf32>
    %260 = vector.shape_cast %259 : vector<1x4x256xf32> to vector<4x256xf32>
    %261 = arith.mulf %258, %260 : vector<4x256xf32>
    %262 = arith.addf %257, %261 : vector<4x256xf32>
    %c241_i32_162 = arith.constant 241 : i32
    %263 = tpu.dynamic_rotate %230 by %c241_i32_162 dim 1 : vector<4x256xf32>, i32 -> vector<4x256xf32>
    %c42 = arith.constant 42 : index
    %c0_163 = arith.constant 0 : index
    %c0_164 = arith.constant 0 : index
    %264 = vector.load %arg6[%c42, %c0_163, %c0_164] : memref<63x4x256xf32, #tpu.memory_space<vmem>>, vector<1x4x256xf32>
    %265 = vector.shape_cast %264 : vector<1x4x256xf32> to vector<4x256xf32>
    %266 = arith.mulf %263, %265 : vector<4x256xf32>
    %267 = arith.addf %262, %266 : vector<4x256xf32>
    %c240_i32_165 = arith.constant 240 : i32
    %268 = tpu.dynamic_rotate %230 by %c240_i32_165 dim 1 : vector<4x256xf32>, i32 -> vector<4x256xf32>
    %c43 = arith.constant 43 : index
    %c0_166 = arith.constant 0 : index
    %c0_167 = arith.constant 0 : index
    %269 = vector.load %arg6[%c43, %c0_166, %c0_167] : memref<63x4x256xf32, #tpu.memory_space<vmem>>, vector<1x4x256xf32>
    %270 = vector.shape_cast %269 : vector<1x4x256xf32> to vector<4x256xf32>
    %271 = arith.mulf %268, %270 : vector<4x256xf32>
    %272 = arith.addf %267, %271 : vector<4x256xf32>
    %c239_i32_168 = arith.constant 239 : i32
    %273 = tpu.dynamic_rotate %230 by %c239_i32_168 dim 1 : vector<4x256xf32>, i32 -> vector<4x256xf32>
    %c44 = arith.constant 44 : index
    %c0_169 = arith.constant 0 : index
    %c0_170 = arith.constant 0 : index
    %274 = vector.load %arg6[%c44, %c0_169, %c0_170] : memref<63x4x256xf32, #tpu.memory_space<vmem>>, vector<1x4x256xf32>
    %275 = vector.shape_cast %274 : vector<1x4x256xf32> to vector<4x256xf32>
    %276 = arith.mulf %273, %275 : vector<4x256xf32>
    %277 = arith.addf %272, %276 : vector<4x256xf32>
    %c4_171 = arith.constant 4 : index
    %c0_172 = arith.constant 0 : index
    %c0_173 = arith.constant 0 : index
    %278 = vector.load %arg7[%c4_171, %c0_172, %c0_173] : memref<7x4x256xf32, #tpu.memory_space<vmem>>, vector<1x4x256xf32>
    %279 = vector.shape_cast %278 : vector<1x4x256xf32> to vector<4x256xf32>
    %280 = arith.addf %277, %279 : vector<4x256xf32>
    %c5_174 = arith.constant 5 : index
    %c0_175 = arith.constant 0 : index
    %c0_176 = arith.constant 0 : index
    %281 = vector.load %arg8[%c5_174, %c0_175, %c0_176] : memref<8x64x4xf32, #tpu.memory_space<vmem>>, vector<1x64x4xf32>
    %282 = vector.shape_cast %281 : vector<1x64x4xf32> to vector<64x4xf32>
    %cst_177 = arith.constant dense<0.000000e+00> : vector<64x256xf32>
    %283 = tpu.matmul %282, %280, %cst_177 {dimension_numbers = #tpu.dot_dimension_numbers<[1], [0], [0], [1], [0, 0, 1, 1], [], []>} : vector<64x4xf32>, vector<4x256xf32>, vector<64x256xf32> -> vector<64x256xf32>
    %284 = arith.addf %234, %283 : vector<64x256xf32>
    %c49 = arith.constant 49 : index
    %c0_178 = arith.constant 0 : index
    %c0_179 = arith.constant 0 : index
    %285 = vector.load %arg6[%c49, %c0_178, %c0_179] : memref<63x4x256xf32, #tpu.memory_space<vmem>>, vector<1x4x256xf32>
    %286 = vector.shape_cast %285 : vector<1x4x256xf32> to vector<4x256xf32>
    %287 = arith.mulf %280, %286 : vector<4x256xf32>
    %c17_i32_180 = arith.constant 17 : i32
    %288 = tpu.dynamic_rotate %280 by %c17_i32_180 dim 1 : vector<4x256xf32>, i32 -> vector<4x256xf32>
    %c45 = arith.constant 45 : index
    %c0_181 = arith.constant 0 : index
    %c0_182 = arith.constant 0 : index
    %289 = vector.load %arg6[%c45, %c0_181, %c0_182] : memref<63x4x256xf32, #tpu.memory_space<vmem>>, vector<1x4x256xf32>
    %290 = vector.shape_cast %289 : vector<1x4x256xf32> to vector<4x256xf32>
    %291 = arith.mulf %288, %290 : vector<4x256xf32>
    %292 = arith.addf %287, %291 : vector<4x256xf32>
    %c16_i32_183 = arith.constant 16 : i32
    %293 = tpu.dynamic_rotate %280 by %c16_i32_183 dim 1 : vector<4x256xf32>, i32 -> vector<4x256xf32>
    %c46 = arith.constant 46 : index
    %c0_184 = arith.constant 0 : index
    %c0_185 = arith.constant 0 : index
    %294 = vector.load %arg6[%c46, %c0_184, %c0_185] : memref<63x4x256xf32, #tpu.memory_space<vmem>>, vector<1x4x256xf32>
    %295 = vector.shape_cast %294 : vector<1x4x256xf32> to vector<4x256xf32>
    %296 = arith.mulf %293, %295 : vector<4x256xf32>
    %297 = arith.addf %292, %296 : vector<4x256xf32>
    %c15_i32_186 = arith.constant 15 : i32
    %298 = tpu.dynamic_rotate %280 by %c15_i32_186 dim 1 : vector<4x256xf32>, i32 -> vector<4x256xf32>
    %c47 = arith.constant 47 : index
    %c0_187 = arith.constant 0 : index
    %c0_188 = arith.constant 0 : index
    %299 = vector.load %arg6[%c47, %c0_187, %c0_188] : memref<63x4x256xf32, #tpu.memory_space<vmem>>, vector<1x4x256xf32>
    %300 = vector.shape_cast %299 : vector<1x4x256xf32> to vector<4x256xf32>
    %301 = arith.mulf %298, %300 : vector<4x256xf32>
    %302 = arith.addf %297, %301 : vector<4x256xf32>
    %c1_i32_189 = arith.constant 1 : i32
    %303 = tpu.dynamic_rotate %280 by %c1_i32_189 dim 1 : vector<4x256xf32>, i32 -> vector<4x256xf32>
    %c48 = arith.constant 48 : index
    %c0_190 = arith.constant 0 : index
    %c0_191 = arith.constant 0 : index
    %304 = vector.load %arg6[%c48, %c0_190, %c0_191] : memref<63x4x256xf32, #tpu.memory_space<vmem>>, vector<1x4x256xf32>
    %305 = vector.shape_cast %304 : vector<1x4x256xf32> to vector<4x256xf32>
    %306 = arith.mulf %303, %305 : vector<4x256xf32>
    %307 = arith.addf %302, %306 : vector<4x256xf32>
    %c255_i32_192 = arith.constant 255 : i32
    %308 = tpu.dynamic_rotate %280 by %c255_i32_192 dim 1 : vector<4x256xf32>, i32 -> vector<4x256xf32>
    %c50 = arith.constant 50 : index
    %c0_193 = arith.constant 0 : index
    %c0_194 = arith.constant 0 : index
    %309 = vector.load %arg6[%c50, %c0_193, %c0_194] : memref<63x4x256xf32, #tpu.memory_space<vmem>>, vector<1x4x256xf32>
    %310 = vector.shape_cast %309 : vector<1x4x256xf32> to vector<4x256xf32>
    %311 = arith.mulf %308, %310 : vector<4x256xf32>
    %312 = arith.addf %307, %311 : vector<4x256xf32>
    %c241_i32_195 = arith.constant 241 : i32
    %313 = tpu.dynamic_rotate %280 by %c241_i32_195 dim 1 : vector<4x256xf32>, i32 -> vector<4x256xf32>
    %c51 = arith.constant 51 : index
    %c0_196 = arith.constant 0 : index
    %c0_197 = arith.constant 0 : index
    %314 = vector.load %arg6[%c51, %c0_196, %c0_197] : memref<63x4x256xf32, #tpu.memory_space<vmem>>, vector<1x4x256xf32>
    %315 = vector.shape_cast %314 : vector<1x4x256xf32> to vector<4x256xf32>
    %316 = arith.mulf %313, %315 : vector<4x256xf32>
    %317 = arith.addf %312, %316 : vector<4x256xf32>
    %c240_i32_198 = arith.constant 240 : i32
    %318 = tpu.dynamic_rotate %280 by %c240_i32_198 dim 1 : vector<4x256xf32>, i32 -> vector<4x256xf32>
    %c52 = arith.constant 52 : index
    %c0_199 = arith.constant 0 : index
    %c0_200 = arith.constant 0 : index
    %319 = vector.load %arg6[%c52, %c0_199, %c0_200] : memref<63x4x256xf32, #tpu.memory_space<vmem>>, vector<1x4x256xf32>
    %320 = vector.shape_cast %319 : vector<1x4x256xf32> to vector<4x256xf32>
    %321 = arith.mulf %318, %320 : vector<4x256xf32>
    %322 = arith.addf %317, %321 : vector<4x256xf32>
    %c239_i32_201 = arith.constant 239 : i32
    %323 = tpu.dynamic_rotate %280 by %c239_i32_201 dim 1 : vector<4x256xf32>, i32 -> vector<4x256xf32>
    %c53 = arith.constant 53 : index
    %c0_202 = arith.constant 0 : index
    %c0_203 = arith.constant 0 : index
    %324 = vector.load %arg6[%c53, %c0_202, %c0_203] : memref<63x4x256xf32, #tpu.memory_space<vmem>>, vector<1x4x256xf32>
    %325 = vector.shape_cast %324 : vector<1x4x256xf32> to vector<4x256xf32>
    %326 = arith.mulf %323, %325 : vector<4x256xf32>
    %327 = arith.addf %322, %326 : vector<4x256xf32>
    %c5_204 = arith.constant 5 : index
    %c0_205 = arith.constant 0 : index
    %c0_206 = arith.constant 0 : index
    %328 = vector.load %arg7[%c5_204, %c0_205, %c0_206] : memref<7x4x256xf32, #tpu.memory_space<vmem>>, vector<1x4x256xf32>
    %329 = vector.shape_cast %328 : vector<1x4x256xf32> to vector<4x256xf32>
    %330 = arith.addf %327, %329 : vector<4x256xf32>
    %c6_207 = arith.constant 6 : index
    %c0_208 = arith.constant 0 : index
    %c0_209 = arith.constant 0 : index
    %331 = vector.load %arg8[%c6_207, %c0_208, %c0_209] : memref<8x64x4xf32, #tpu.memory_space<vmem>>, vector<1x64x4xf32>
    %332 = vector.shape_cast %331 : vector<1x64x4xf32> to vector<64x4xf32>
    %cst_210 = arith.constant dense<0.000000e+00> : vector<64x256xf32>
    %333 = tpu.matmul %332, %330, %cst_210 {dimension_numbers = #tpu.dot_dimension_numbers<[1], [0], [0], [1], [0, 0, 1, 1], [], []>} : vector<64x4xf32>, vector<4x256xf32>, vector<64x256xf32> -> vector<64x256xf32>
    %334 = arith.addf %284, %333 : vector<64x256xf32>
    %c58 = arith.constant 58 : index
    %c0_211 = arith.constant 0 : index
    %c0_212 = arith.constant 0 : index
    %335 = vector.load %arg6[%c58, %c0_211, %c0_212] : memref<63x4x256xf32, #tpu.memory_space<vmem>>, vector<1x4x256xf32>
    %336 = vector.shape_cast %335 : vector<1x4x256xf32> to vector<4x256xf32>
    %337 = arith.mulf %330, %336 : vector<4x256xf32>
    %c17_i32_213 = arith.constant 17 : i32
    %338 = tpu.dynamic_rotate %330 by %c17_i32_213 dim 1 : vector<4x256xf32>, i32 -> vector<4x256xf32>
    %c54 = arith.constant 54 : index
    %c0_214 = arith.constant 0 : index
    %c0_215 = arith.constant 0 : index
    %339 = vector.load %arg6[%c54, %c0_214, %c0_215] : memref<63x4x256xf32, #tpu.memory_space<vmem>>, vector<1x4x256xf32>
    %340 = vector.shape_cast %339 : vector<1x4x256xf32> to vector<4x256xf32>
    %341 = arith.mulf %338, %340 : vector<4x256xf32>
    %342 = arith.addf %337, %341 : vector<4x256xf32>
    %c16_i32_216 = arith.constant 16 : i32
    %343 = tpu.dynamic_rotate %330 by %c16_i32_216 dim 1 : vector<4x256xf32>, i32 -> vector<4x256xf32>
    %c55 = arith.constant 55 : index
    %c0_217 = arith.constant 0 : index
    %c0_218 = arith.constant 0 : index
    %344 = vector.load %arg6[%c55, %c0_217, %c0_218] : memref<63x4x256xf32, #tpu.memory_space<vmem>>, vector<1x4x256xf32>
    %345 = vector.shape_cast %344 : vector<1x4x256xf32> to vector<4x256xf32>
    %346 = arith.mulf %343, %345 : vector<4x256xf32>
    %347 = arith.addf %342, %346 : vector<4x256xf32>
    %c15_i32_219 = arith.constant 15 : i32
    %348 = tpu.dynamic_rotate %330 by %c15_i32_219 dim 1 : vector<4x256xf32>, i32 -> vector<4x256xf32>
    %c56 = arith.constant 56 : index
    %c0_220 = arith.constant 0 : index
    %c0_221 = arith.constant 0 : index
    %349 = vector.load %arg6[%c56, %c0_220, %c0_221] : memref<63x4x256xf32, #tpu.memory_space<vmem>>, vector<1x4x256xf32>
    %350 = vector.shape_cast %349 : vector<1x4x256xf32> to vector<4x256xf32>
    %351 = arith.mulf %348, %350 : vector<4x256xf32>
    %352 = arith.addf %347, %351 : vector<4x256xf32>
    %c1_i32_222 = arith.constant 1 : i32
    %353 = tpu.dynamic_rotate %330 by %c1_i32_222 dim 1 : vector<4x256xf32>, i32 -> vector<4x256xf32>
    %c57 = arith.constant 57 : index
    %c0_223 = arith.constant 0 : index
    %c0_224 = arith.constant 0 : index
    %354 = vector.load %arg6[%c57, %c0_223, %c0_224] : memref<63x4x256xf32, #tpu.memory_space<vmem>>, vector<1x4x256xf32>
    %355 = vector.shape_cast %354 : vector<1x4x256xf32> to vector<4x256xf32>
    %356 = arith.mulf %353, %355 : vector<4x256xf32>
    %357 = arith.addf %352, %356 : vector<4x256xf32>
    %c255_i32_225 = arith.constant 255 : i32
    %358 = tpu.dynamic_rotate %330 by %c255_i32_225 dim 1 : vector<4x256xf32>, i32 -> vector<4x256xf32>
    %c59 = arith.constant 59 : index
    %c0_226 = arith.constant 0 : index
    %c0_227 = arith.constant 0 : index
    %359 = vector.load %arg6[%c59, %c0_226, %c0_227] : memref<63x4x256xf32, #tpu.memory_space<vmem>>, vector<1x4x256xf32>
    %360 = vector.shape_cast %359 : vector<1x4x256xf32> to vector<4x256xf32>
    %361 = arith.mulf %358, %360 : vector<4x256xf32>
    %362 = arith.addf %357, %361 : vector<4x256xf32>
    %c241_i32_228 = arith.constant 241 : i32
    %363 = tpu.dynamic_rotate %330 by %c241_i32_228 dim 1 : vector<4x256xf32>, i32 -> vector<4x256xf32>
    %c60 = arith.constant 60 : index
    %c0_229 = arith.constant 0 : index
    %c0_230 = arith.constant 0 : index
    %364 = vector.load %arg6[%c60, %c0_229, %c0_230] : memref<63x4x256xf32, #tpu.memory_space<vmem>>, vector<1x4x256xf32>
    %365 = vector.shape_cast %364 : vector<1x4x256xf32> to vector<4x256xf32>
    %366 = arith.mulf %363, %365 : vector<4x256xf32>
    %367 = arith.addf %362, %366 : vector<4x256xf32>
    %c240_i32_231 = arith.constant 240 : i32
    %368 = tpu.dynamic_rotate %330 by %c240_i32_231 dim 1 : vector<4x256xf32>, i32 -> vector<4x256xf32>
    %c61 = arith.constant 61 : index
    %c0_232 = arith.constant 0 : index
    %c0_233 = arith.constant 0 : index
    %369 = vector.load %arg6[%c61, %c0_232, %c0_233] : memref<63x4x256xf32, #tpu.memory_space<vmem>>, vector<1x4x256xf32>
    %370 = vector.shape_cast %369 : vector<1x4x256xf32> to vector<4x256xf32>
    %371 = arith.mulf %368, %370 : vector<4x256xf32>
    %372 = arith.addf %367, %371 : vector<4x256xf32>
    %c239_i32_234 = arith.constant 239 : i32
    %373 = tpu.dynamic_rotate %330 by %c239_i32_234 dim 1 : vector<4x256xf32>, i32 -> vector<4x256xf32>
    %c62 = arith.constant 62 : index
    %c0_235 = arith.constant 0 : index
    %c0_236 = arith.constant 0 : index
    %374 = vector.load %arg6[%c62, %c0_235, %c0_236] : memref<63x4x256xf32, #tpu.memory_space<vmem>>, vector<1x4x256xf32>
    %375 = vector.shape_cast %374 : vector<1x4x256xf32> to vector<4x256xf32>
    %376 = arith.mulf %373, %375 : vector<4x256xf32>
    %377 = arith.addf %372, %376 : vector<4x256xf32>
    %c6_237 = arith.constant 6 : index
    %c0_238 = arith.constant 0 : index
    %c0_239 = arith.constant 0 : index
    %378 = vector.load %arg7[%c6_237, %c0_238, %c0_239] : memref<7x4x256xf32, #tpu.memory_space<vmem>>, vector<1x4x256xf32>
    %379 = vector.shape_cast %378 : vector<1x4x256xf32> to vector<4x256xf32>
    %380 = arith.addf %377, %379 : vector<4x256xf32>
    %c7_240 = arith.constant 7 : index
    %c0_241 = arith.constant 0 : index
    %c0_242 = arith.constant 0 : index
    %381 = vector.load %arg8[%c7_240, %c0_241, %c0_242] : memref<8x64x4xf32, #tpu.memory_space<vmem>>, vector<1x64x4xf32>
    %382 = vector.shape_cast %381 : vector<1x64x4xf32> to vector<64x4xf32>
    %cst_243 = arith.constant dense<0.000000e+00> : vector<64x256xf32>
    %383 = tpu.matmul %382, %380, %cst_243 {dimension_numbers = #tpu.dot_dimension_numbers<[1], [0], [0], [1], [0, 0, 1, 1], [], []>} : vector<64x4xf32>, vector<4x256xf32>, vector<64x256xf32> -> vector<64x256xf32>
    %384 = arith.addf %334, %383 : vector<64x256xf32>
    %c0_244 = arith.constant 0 : index
    %c0_245 = arith.constant 0 : index
    %385 = vector.load %arg9[%c0_244, %c0_245] : memref<64x256xf32, #tpu.memory_space<vmem>>, vector<64x256xf32>
    %386 = arith.addf %384, %385 : vector<64x256xf32>
    %cst_246 = arith.constant 5.000000e-01 : f32
    %387 = vector.broadcast %cst_246 : f32 to vector<64x256xf32>
    %388 = arith.mulf %387, %386 : vector<64x256xf32>
    %389 = arith.mulf %386, %386 : vector<64x256xf32>
    %390 = arith.mulf %389, %386 : vector<64x256xf32>
    %cst_247 = arith.constant 4.471500e-02 : f32
    %391 = vector.broadcast %cst_247 : f32 to vector<64x256xf32>
    %392 = arith.mulf %391, %390 : vector<64x256xf32>
    %393 = arith.addf %386, %392 : vector<64x256xf32>
    %cst_248 = arith.constant 0.797884583 : f32
    %394 = vector.broadcast %cst_248 : f32 to vector<64x256xf32>
    %395 = arith.mulf %394, %393 : vector<64x256xf32>
    %396 = math.tanh %395 : vector<64x256xf32>
    %cst_249 = arith.constant 1.000000e+00 : f32
    %397 = vector.broadcast %cst_249 : f32 to vector<64x256xf32>
    %398 = arith.addf %397, %396 : vector<64x256xf32>
    %399 = arith.mulf %388, %398 : vector<64x256xf32>
    %400 = arith.addf %10, %399 : vector<64x256xf32>
    %c0_250 = arith.constant 0 : index
    %c0_251 = arith.constant 0 : index
    %c0_252 = arith.constant 0 : index
    %401 = vector.load %arg10[%c0_250, %c0_251, %c0_252] : memref<1x64x256xf32, #tpu.memory_space<vmem>>, vector<1x64x256xf32>
    %402 = vector.shape_cast %401 : vector<1x64x256xf32> to vector<64x256xf32>
    %403 = vector.shape_cast %400 : vector<64x256xf32> to vector<1x64x256xf32>
    tpu.vector_store %arg10[%c0_250, %c0_251, %c0_252], %403 {strides = array<i32>} : memref<1x64x256xf32, #tpu.memory_space<vmem>>, vector<1x64x256xf32>,
    return
  }
  func.func @transform_0(%arg0: i32) -> (i32, i32, i32) {
    %c0_i32 = arith.constant 0 : i32
    %c0_i32_0 = arith.constant 0 : i32
    %c0_i32_1 = arith.constant 0 : i32
    return %arg0, %c0_i32, %c0_i32_0 : i32, i32, i32
  }
  func.func @transform_1(%arg0: i32) -> (i32, i32, i32) {
    %c0_i32 = arith.constant 0 : i32
    %c0_i32_0 = arith.constant 0 : i32
    %c0_i32_1 = arith.constant 0 : i32
    return %arg0, %c0_i32, %c0_i32_0 : i32, i32, i32
  }
  func.func @transform_2(%arg0: i32) -> (i32, i32) {
    %c0_i32 = arith.constant 0 : i32
    %c0_i32_0 = arith.constant 0 : i32
    %c0_i32_1 = arith.constant 0 : i32
    return %c0_i32, %c0_i32_0 : i32, i32
  }
  func.func @transform_3(%arg0: i32) -> (i32, i32) {
    %c0_i32 = arith.constant 0 : i32
    %c0_i32_0 = arith.constant 0 : i32
    %c0_i32_1 = arith.constant 0 : i32
    return %c0_i32, %c0_i32_0 : i32, i32
  }
  func.func @transform_4(%arg0: i32) -> (i32, i32) {
    %c0_i32 = arith.constant 0 : i32
    %c0_i32_0 = arith.constant 0 : i32
    %c0_i32_1 = arith.constant 0 : i32
    return %c0_i32, %c0_i32_0 : i32, i32
  }
  func.func @transform_5(%arg0: i32) -> (i32, i32, i32) {
    %c0_i32 = arith.constant 0 : i32
    %c0_i32_0 = arith.constant 0 : i32
    %c0_i32_1 = arith.constant 0 : i32
    %c0_i32_2 = arith.constant 0 : i32
    return %c0_i32, %c0_i32_0, %c0_i32_1 : i32, i32, i32
  }
  func.func @transform_6(%arg0: i32) -> (i32, i32, i32) {
    %c0_i32 = arith.constant 0 : i32
    %c0_i32_0 = arith.constant 0 : i32
    %c0_i32_1 = arith.constant 0 : i32
    %c0_i32_2 = arith.constant 0 : i32
    return %c0_i32, %c0_i32_0, %c0_i32_1 : i32, i32, i32
  }
  func.func @transform_7(%arg0: i32) -> (i32, i32, i32) {
    %c0_i32 = arith.constant 0 : i32
    %c0_i32_0 = arith.constant 0 : i32
    %c0_i32_1 = arith.constant 0 : i32
    %c0_i32_2 = arith.constant 0 : i32
    return %c0_i32, %c0_i32_0, %c0_i32_1 : i32, i32, i32
  }
  func.func @transform_8(%arg0: i32) -> (i32, i32) {
    %c0_i32 = arith.constant 0 : i32
    %c0_i32_0 = arith.constant 0 : i32
    %c0_i32_1 = arith.constant 0 : i32
    return %c0_i32, %c0_i32_0 : i32, i32
  }
  func.func @transform_9(%arg0: i32) -> (i32, i32, i32) {
    %c0_i32 = arith.constant 0 : i32
    %c0_i32_0 = arith.constant 0 : i32
    %c0_i32_1 = arith.constant 0 : i32
    return %arg0, %c0_i32, %c0_i32_0 : i32, i32, i32
  }
}

</mosaic_0001>

<bundles_post_ra>
// kernel: tpu_custom_call.1
= control target key start
LH: loop header
LB: loop body
LE: loop exit
PB: predicated region body
PF: predicated region fallthrough
CT: control target
= control target key end

     0   :  { %s6069_s0 = inlined_call_operand.hbm [shape: f32[2,32,64], index: 0, kind: input, shape index: {}]   ;;  %s6070_s1 = inlined_call_operand.hbm [shape: f32[2,32,256], index: 1, kind: input, shape index: {}]   ;;  %s6071_s2 = inlined_call_operand.hbm [shape: f32[64,256], index: 2, kind: input, shape index: {}]   ;;  %s6072_s3 = inlined_call_operand.hbm [shape: bf16[8,64], index: 3, kind: input, shape index: {}]   ;;  %s6073_s4 = inlined_call_operand.hbm [shape: f32[8,256], index: 4, kind: input, shape index: {}]   ;;  %s6074_s5 = inlined_call_operand.vmem [shape: f32[63,4,256], index: 5, kind: input, shape index: {}]   ;;  %s6075_s6 = inlined_call_operand.vmem [shape: f32[7,4,256], index: 6, kind: input, shape index: {}]   ;;  %s6076_s7 = inlined_call_operand.vmem [shape: f32[8,64,4], index: 7, kind: input, shape index: {}]   ;;  %s6077_s8 = inlined_call_operand.hbm [shape: f32[64,256], index: 8, kind: input, shape index: {}]   ;;  %s6078_s9 = inlined_call_operand.hbm [shape: f32[2,64,256], index: 9, kind: output, shape index: {}]  }
   0x1   :  { %6089 = sst [smem:[#allocation22_spill]] %s6069_s0 }
   0x2   :  { %6090 = sst [smem:[#allocation23_spill]] %s6071_s2 }
   0x3   :  { %6091 = sst [smem:[#allocation24_spill]] %s6072_s3 }
   0x4   :  { %6092 = sst [smem:[#allocation25_spill]] %s6073_s4 }
   0x5   :  { %6093 = sst [smem:[#allocation26_spill]] %s6078_s9 }
   0x6   :  { %14 = vsyncpa [#allocation3], 0 }
   0x7   :  { %16 = vsyncpa [#allocation3 + $0x1], 0 }
   0x8   :  { %17 = vsyncpa [#allocation6], 0 }
   0x9   :  { %19 = vsyncpa [#allocation6 + $0x1], 0 }
   0xa   :  { %20 = vsyncpa [#allocation9], 0 }
   0xb   :  { %21 = vsyncpa [#allocation12], 0 }
   0xc   :  { %22 = vsyncpa [#allocation4], 0 }
   0xd   :  { %24 = vsyncpa [#allocation4 + $0x1], 0  ;;  %s4551_s30 = smov 0   ;;  %s4553_s10 = smov 0  }
   0xe   :  { %s4555_s11 = smov 0   ;;  %s4557_s12 = smov 0  }
   0xf LB: > { %6094 = sst [smem:[#allocation20_spill]] %s4465_s30  ;;  %s4572_s13 = sadd.s32 4294967295, %s4477_s12   ;;  %s4477_s12 = sphi %s4557_s12, %s6129_s12   ;;  %s4473_s11 = sphi %s4555_s11, %s6128_s11   ;;  %s4469_s10 = sphi %s4553_s10, %s6127_s10   ;;  %s4465_s30 = sphi %s4551_s30, %s6126_s30  }
  0x10   : > { %s3634_s14 = sadd.s32 4294967294, %s4477_s12   ;;  %p50_p0 = scmp.ne.s32.totalorder %s4469_s10, %s4465_s30 }
  0x11   : > { %p6079_p1 = scmp.eq.s32.totalorder %s4572_s13, 0  ;;  %p253_p3 = scmp.eq.s32.totalorder %s3634_s14, 1 }
  0x12   : > { %p3635_p5 = scmp.ge.s32.totalorder %s4477_s12, 1  ;;  %p260_p7 = scmp.lt.s32.totalorder %s4477_s12, 3 }
  0x13   : > { %p4581_p4 = por %p6079_p1, %p50_p0  ;;  %p4586_p6 = por %p253_p3, %p50_p0 }
  0x14   : > { %p4591_p8 = pnand %p3635_p5, %p260_p7  ;;  %s4479_s18 = smov [#allocation7]  }
  0x15   : > { %s6095_s15 = scalar_select %p4581_p4, 1, 0 }
  0x16   : > { %s6096_s16 = scalar_select %p4586_p6, 1, 0 }
  0x17   : > { %s6098_s17 = scalar_select %p4591_p8, 1, 0 }
  0x18   : > { %6097 = sst [smem:[#allocation21_spill]] %s6096_s16  ;;  %s272_s19 = sshll.u32 %s4479_s18, 4  ;;  %s4595_s19 = int_to_ptr.vmem [resolvable:$true] %s272_s19 }
  0x19   : > { %p4024_p9 = pneg %p4591_p8  ;;  %s4480_s21 = smov [#allocation8]  }
  0x1a   : > { %s286_s22 = sshll.u32 %s4480_s21, 4  ;;  %s4481_s23 = smov [#allocation10]   ;;  %s4606_s22 = int_to_ptr.vmem [resolvable:$true] %s286_s22 }
  0x1b   : > { %p4602_p11 = pnand %p4024_p9, %p6079_p1  ;;  %s4608_s24 = sshll.u32 %s4481_s23, 4  ;;  %s298_s24 = int_to_ptr.vmem [resolvable:$true] %s4608_s24 }
  0x1c   : > { %s6100_s2 = sld [smem:[#allocation23_spill]] }
  0x1d   : > { %p4618_p13 = pneg %p4602_p11 }
  0x22   : > { %s4223_s27 = scalar_lea.hbm %s6100_s2, 2048 }
  0x23   : > { %p4224_p12 = scmp.ne.s32.totalorder %s6100_s2, %s4223_s27  ;;  %p4230_p5 = scmp.lt.u32.totalorder %s4223_s27, %s6100_s2 }
  0x25   : > { %p4226_p0 = pnand %p4618_p13, %p4224_p12 }
  0x27   : > { %p4227_p3 = pneg %p4226_p0 }
  0x29   : > { %p4232_p7 = pnand %p4230_p5, %p4227_p3 }
  0x2b   : > { %4235 = shalt.err (!%p4232_p7)
}
  0x2c   : > { %s4236_s23 = scalar_lea.vmem %s4595_s19, 2048  ;;  %p4244_p2 = scmp.lt.s32.totalorder %s4595_s19, %s4595_s19 }
  0x2d   : > { %p4237_p9 = scmp.ne.s32.totalorder %s4595_s19, %s4236_s23  ;;  %p4245_p6 = scmp.lt.s32.totalorder %s4236_s23, %s4236_s23 }
  0x2f   : > { %p4239_p10 = pnand %p4237_p9, %p4618_p13  ;;  %p4246_p12 = por %p4245_p6, %p4244_p2 }
  0x31   : > { %p4240_p1 = pneg %p4239_p10 }
  0x33   : > { %p4247_p0 = pnand %p4246_p12, %p4240_p1 }
  0x35   : > { %4250 = shalt.err (!%p4247_p0)
}
  0x36   : > { %s6085_s25 = smov 256   ;;  %s6086_s26 = smov 16  }
  0x37   : > { %4027 = dma.hbm_to_vmem [thread:$0]  (!%p4602_p11), %s6100_s2, 2048, %s4595_s19, [#allocation6], %s6085_s25, %s6085_s25, %s6086_s26  }
  0x38   : > { %s6102_s3 = sld [smem:[#allocation24_spill]] }
  0x3e   : > { %s4251_s21 = scalar_lea.hbm %s6102_s3, 64 }
  0x3f   : > { %p4252_p1 = scmp.ne.s32.totalorder %s6102_s3, %s4251_s21  ;;  %p4258_p10 = scmp.lt.u32.totalorder %s4251_s21, %s6102_s3 }
  0x41   : > { %p4254_p2 = pnand %p4252_p1, %p4618_p13 }
  0x43   : > { %p4255_p6 = pneg %p4254_p2 }
  0x45   : > { %p4260_p3 = pnand %p4258_p10, %p4255_p6 }
  0x47   : > { %4263 = shalt.err (!%p4260_p3)
}
  0x48   : > { %s4264_s19 = scalar_lea.vmem %s4606_s22, 64  ;;  %p4272_p12 = scmp.lt.s32.totalorder %s4606_s22, %s4606_s22 }
  0x49   : > { %p4265_p5 = scmp.ne.s32.totalorder %s4606_s22, %s4264_s19  ;;  %p4273_p0 = scmp.lt.s32.totalorder %s4264_s19, %s4264_s19 }
  0x4b   : > { %p4267_p7 = pnand %p4265_p5, %p4618_p13  ;;  %p4274_p1 = por %p4273_p0, %p4272_p12 }
  0x4d   : > { %p4268_p9 = pneg %p4267_p7 }
  0x4f   : > { %p4275_p2 = pnand %p4274_p1, %p4268_p9 }
  0x51   : > { %4278 = shalt.err (!%p4275_p2)
}
  0x52   : > { %4030 = dma.hbm_to_vmem [thread:$0]  (!%p4602_p11), %s6102_s3, 64, %s4606_s22, [#allocation9]  }
  0x53   : > { %s6103_s4 = sld [smem:[#allocation25_spill]] }
  0x59   : > { %s4279_s28 = scalar_lea.hbm %s6103_s4, 256 }
  0x5a   : > { %p4280_p6 = scmp.ne.s32.totalorder %s6103_s4, %s4279_s28  ;;  %p4286_p5 = scmp.lt.u32.totalorder %s4279_s28, %s6103_s4 }
  0x5c   : > { %p4282_p10 = pnand %p4280_p6, %p4618_p13 }
  0x5e   : > { %p4283_p3 = pneg %p4282_p10 }
  0x60   : > { %p4288_p7 = pnand %p4286_p5, %p4283_p3 }
  0x62   : > { %4291 = shalt.err (!%p4288_p7)
}
  0x63   : > { %s4292_s19 = scalar_lea.vmem %s298_s24, 256  ;;  %p4300_p1 = scmp.lt.s32.totalorder %s298_s24, %s298_s24 }
  0x64   : > { %p4293_p9 = scmp.ne.s32.totalorder %s298_s24, %s4292_s19  ;;  %p4301_p2 = scmp.lt.s32.totalorder %s4292_s19, %s4292_s19 }
  0x66   : > { %p4295_p12 = pnand %p4293_p9, %p4618_p13  ;;  %p4302_p4 = por %p4301_p2, %p4300_p1 }
  0x68   : > { %p4296_p0 = pneg %p4295_p12 }
  0x6a   : > { %p4303_p8 = pnand %p4302_p4, %p4296_p0 }
  0x6c   : > { %4306 = shalt.err (!%p4303_p8)
}
  0x6d   : > { %4033 = dma.hbm_to_vmem [thread:$0]  (!%p4602_p11), %s6103_s4, 256, %s298_s24, [#allocation9]  }
  0x6e   : > { %s4484_s30 = smov [#allocation11]   ;;  %s4307_s29 = scalar_lea.hbm %s6077_s8, 2048 }
  0x6f   : > { %s316_s16 = sshll.u32 %s4484_s30, 4  ;;  %p4308_p6 = scmp.ne.s32.totalorder %s6077_s8, %s4307_s29  ;;  %s317_s16 = int_to_ptr.vmem [resolvable:$true] %s316_s16 }
  0x70   : > { %p4314_p10 = scmp.lt.u32.totalorder %s4307_s29, %s6077_s8 }
  0x71   : > { %p4310_p4 = pnand %p4308_p6, %p4618_p13 }
  0x73   : > { %p4311_p8 = pneg %p4310_p4 }
  0x75   : > { %p4316_p3 = pnand %p4314_p10, %p4311_p8 }
  0x77   : > { %4319 = shalt.err (!%p4316_p3)
}
  0x78   : > { %s4320_s24 = scalar_lea.vmem %s317_s16, 2048  ;;  %p4328_p12 = scmp.lt.s32.totalorder %s317_s16, %s317_s16 }
  0x79   : > { %p4321_p5 = scmp.ne.s32.totalorder %s317_s16, %s4320_s24  ;;  %p4329_p0 = scmp.lt.s32.totalorder %s4320_s24, %s4320_s24 }
  0x7b   : > { %p4323_p7 = pnand %p4321_p5, %p4618_p13  ;;  %p4330_p1 = por %p4329_p0, %p4328_p12 }
  0x7d   : > { %p4324_p9 = pneg %p4323_p7 }
  0x7f   : > { %p4331_p2 = pnand %p4330_p1, %p4324_p9 }
  0x81   : > { %4334 = shalt.err (!%p4331_p2)
}
  0x82   : > { %4036 = dma.hbm_to_vmem [thread:$0]  (!%p4602_p11), %s6077_s8, 2048, %s317_s16, [#allocation12], %s6085_s25, %s6085_s25, %s6086_s26  }
  0x83   : > { %s4706_s14 = sadd.s32 1, %s4477_s12   ;;  %s37_s20 = sadd.s32 1, %s4473_s11 }
  0x84   : > { %s34_s30 = ssub.s32 %s4477_s12, %s4706_s14  ;;  %p44_p13 = scmp.ne.s32.totalorder %s4473_s11, %s4469_s10 }
  0x85   : > { %p35_p6 = scmp.eq.s32.totalorder %s34_s30, 0  ;;  %p45_p4 = scmp.eq.s32.totalorder %s4477_s12, 0 }
  0x86   : > { %p6104_p8 = scmp.eq.s32.totalorder %s4572_s13, 1  ;;  %p4052_p3 = scmp.lt.s32.totalorder %s4477_s12, 2 }
  0x87   : > { %s4722_s28 = scalar_select %p35_p6, %s4473_s11, %s37_s20  }
  0x88   : > { %p4716_p10 = por %p6104_p8, %p44_p13  ;;  %p46_p5 = por %p45_p4, %p44_p13 }
  0x89   : > { %s4725_s29 = sand.u32 1, %s4473_s11   ;;  %s3869_s18 = sshll.u32 %s4477_s12, 9 }
  0x8a   : > { %s3641_s16 = sshll.u32 %s4725_s29, 5  ;;  %s6106_s0 = sld [smem:[#allocation22_spill]] }
  0x8b   : > { %s334_s24 = scalar_lea.vmem [#allocation2], %s3641_s16  ;;  %p4736_p11 = pnand %p4052_p3, %p46_p5 }
  0x8c   : > { %s341_s22 = sshll.u32 %s334_s24, 4  ;;  %s331_s30 = scalar_lea.sflag [#allocation3], %s4725_s29  ;;  %s4734_s22 = int_to_ptr.vmem [resolvable:$true] %s341_s22 }
  0x8d   : > { %p4337_p9 = pneg %p4736_p11 }
  0x90   : > { %s4732_s19 = scalar_lea.hbm %s6106_s0, %s3869_s18  ;;  %s4340_s21 = scalar_lea.hbm %s6106_s0, 1024 }
  0x91   : > { %s4335_s25 = scalar_lea.hbm %s4732_s19, 512  ;;  %p4341_p1 = scmp.lt.u32.totalorder %s4732_s19, %s6106_s0 }
  0x92   : > { %p4336_p7 = scmp.ne.s32.totalorder %s4732_s19, %s4335_s25  ;;  %p4342_p2 = scmp.lt.u32.totalorder %s4340_s21, %s4335_s25 }
  0x93   : > { %p4344_p6 = scmp.lt.u32.totalorder %s4335_s25, %s4732_s19 }
  0x94   : > { %p4338_p12 = pnand %p4337_p9, %p4336_p7  ;;  %p4343_p13 = por %p4342_p2, %p4341_p1 }
  0x96   : > { %p4339_p0 = pneg %p4338_p12  ;;  %p4345_p4 = por %p4344_p6, %p4343_p13 }
  0x98   : > { %p4346_p8 = pnand %p4345_p4, %p4339_p0 }
  0x9a   : > { %4349 = shalt.err (!%p4346_p8)
}
  0x9b   : > { %s4350_s26 = scalar_lea.vmem %s4734_s22, 512  ;;  %s4485_s16 = smov [#allocation2]  }
  0x9c   : > { %p4351_p3 = scmp.ne.s32.totalorder %s4734_s22, %s4350_s26  ;;  %s4355_s18 = sshll.u32 %s4485_s16, 4  ;;  %s4356_s18 = int_to_ptr.vmem [resolvable:$false] %s4355_s18 }
  0x9d   : > { %s4357_s23 = scalar_lea.vmem %s4356_s18, 1024  ;;  %p4358_p12 = scmp.lt.s32.totalorder %s4734_s22, %s4356_s18 }
  0x9e   : > { %p4353_p5 = pnand %p4351_p3, %p4337_p9  ;;  %p4359_p1 = scmp.lt.s32.totalorder %s4357_s23, %s4350_s26 }
  0xa0   : > { %p4354_p7 = pneg %p4353_p5  ;;  %p4360_p2 = por %p4359_p1, %p4358_p12 }
  0xa2   : > { %p4361_p13 = pnand %p4360_p2, %p4354_p7 }
  0xa4   : > { %4364 = shalt.err (!%p4361_p13)
}
  0xa5   : > { %s4486_s25 = smov 128   ;;  %s4487_s21 = smov 8  }
  0xa6   : > { %4040 = dma.hbm_to_vmem [thread:$0]  (!%p4736_p11), %s4732_s19, 512, %s4734_s22, %s331_s30, %s4486_s25, %s4486_s25, %s4487_s21  }
  0xa7   : > { %s3644_s24 = sshll.u32 %s4725_s29, 6  ;;  %s3870_s16 = sshll.u32 %s4477_s12, 10 }
  0xa8   : > { %s4774_s23 = scalar_lea.hbm %s6070_s1, %s3870_s16  ;;  %s355_s20 = scalar_lea.vmem [#allocation5], %s3644_s24 }
  0xa9   : > { %s362_s0 = sshll.u32 %s355_s20, 4  ;;  %s6108_s2 = sand.u32 1, %s4477_s12   ;;  %s4776_s0 = int_to_ptr.vmem [resolvable:$true] %s362_s0 }
  0xaa   : > { %s4780_s3 = scalar_lea.sflag [#allocation6], %s6108_s2  ;;  %s4365_s4 = scalar_lea.hbm %s4774_s23, 1024 }
  0xab   : > { %p4366_p0 = scmp.ne.s32.totalorder %s4774_s23, %s4365_s4  ;;  %s4370_s22 = scalar_lea.hbm %s6070_s1, 2048 }
  0xac   : > { %p4371_p8 = scmp.lt.u32.totalorder %s4774_s23, %s6070_s1  ;;  %p4372_p3 = scmp.lt.u32.totalorder %s4370_s22, %s4365_s4 }
  0xad   : > { %p4368_p6 = pnand %p4366_p0, %p4337_p9  ;;  %p4374_p7 = scmp.lt.u32.totalorder %s4365_s4, %s4774_s23 }
  0xae   : > { %p4373_p5 = por %p4372_p3, %p4371_p8 }
  0xaf   : > { %p4369_p4 = pneg %p4368_p6 }
  0xb0   : > { %p4375_p12 = por %p4374_p7, %p4373_p5 }
  0xb2   : > { %p4376_p1 = pnand %p4375_p12, %p4369_p4 }
  0xb4   : > { %4379 = shalt.err (!%p4376_p1)
}
  0xb5   : > { %s4380_s2 = scalar_lea.vmem %s4776_s0, 1024  ;;  %s4488_s20 = smov [#allocation5]  }
  0xb6   : > { %p4381_p2 = scmp.ne.s32.totalorder %s4776_s0, %s4380_s2  ;;  %s4385_s21 = sshll.u32 %s4488_s20, 4  ;;  %s4386_s21 = int_to_ptr.vmem [resolvable:$false] %s4385_s21 }
  0xb7   : > { %s4387_s24 = scalar_lea.vmem %s4386_s21, 2048  ;;  %p4388_p6 = scmp.lt.s32.totalorder %s4776_s0, %s4386_s21 }
  0xb8   : > { %p4383_p13 = pnand %p4381_p2, %p4337_p9  ;;  %p4389_p8 = scmp.lt.s32.totalorder %s4387_s24, %s4380_s2 }
  0xba   : > { %p4384_p0 = pneg %p4383_p13  ;;  %p4390_p3 = por %p4389_p8, %p4388_p6 }
  0xbc   : > { %p4391_p5 = pnand %p4390_p3, %p4384_p0 }
  0xbe   : > { %4394 = shalt.err (!%p4391_p5)
}
  0xbf   : > { %s6109_s4 = smov 16   ;;  %s6110_s16 = smov 256  }
  0xc0   : > { %4043 = dma.hbm_to_vmem [thread:$0]  (!%p4736_p11), %s4774_s23, 1024, %s4776_s0, %s4780_s3, %s6110_s16, %s6110_s16, %s6109_s4  }
  0xc1   : > { %p6111_p9 = scmp.ne.s32.totalorder %s6098_s17, 0 }
  0xc2   : > { %s4812_s18 = sand.u32 (!%p6111_p9), 1, %s4469_s10   ;;  %p6112_p4 = scmp.ne.s32.totalorder (!%p6111_p9), %s6095_s15, 0 }
  0xc3   : > { %374 = sbr.rel (%p6111_p9) target bundleno = 2089 (0x829), region = 56  ;;  %s3648_s26 = sshll.u32 (!%p6111_p9), %s4812_s18, 5 }
  0xc4   : > { %s377_s29 = scalar_lea.sflag (!%p6111_p9), [#allocation3], %s4812_s18  ;;  %s4816_s19 = scalar_lea.vmem (!%p6111_p9), [#allocation2], %s3648_s26 }
  0xca   : > { %4440 = dma.done.wait (%p6112_p4), %s377_s29, 512  }
  0xcb   : > { %4442 = vsyncadd (%p6112_p4), %s377_s29, 4294966784  ;;  %s385_s0 = sand.u32 1, %s4572_s13   ;;  %s3649_s3 = sshll.u32 %s4812_s18, 6 }
  0xcc   : > { %s386_s17 = scalar_lea.sflag [#allocation6], %s385_s0  ;;  %s4824_s9 = scalar_lea.vmem [#allocation5], %s3649_s3 }
  0xcd   : > { %4444 = dma.done.wait (%p6112_p4), %s386_s17, 1024  }
  0xce   : > { %4446 = vsyncadd (%p6112_p4), %s386_s17, 4294966272  ;;  %p6113_p11 = scmp.eq.s32.totalorder %s4572_s13, 0 }
  0xd0   : > { %4448 = dma.done.wait (%p6113_p11), [#allocation6], 2048   ;;  %p6114_p7 = pmov %p6113_p11 }
  0xd2   : > { %4450 = vsyncadd (%p6114_p7), [#allocation6], 4294965248  ;;  %p6115_p12 = pmov %p6114_p7 }
  0xd3   : > { %p6116_p1 = pmov %p6114_p7 }
  0xd4   : > { %4452 = dma.done.wait (%p6115_p12), [#allocation9], 320  }
  0xd5   : > { %4454 = vsyncadd (%p6116_p1), [#allocation9], 4294966976  ;;  %p6117_p2 = pmov %p6116_p1 }
  0xd6   : > { %p6118_p13 = pmov %p6116_p1 }
  0xd7   : > { %4456 = dma.done.wait (%p6117_p2), [#allocation12], 2048  }
  0xd8   : > { %4458 = vsyncadd (%p6118_p13), [#allocation12], 4294965248  ;;  %v4489_v0 = vmov 0.0   ;;  %v451_v1 = vld [vmem:[#allocation7 + $0x8] sm:$0xff]  ;;  %v453_v2 = vld [vmem:[#allocation7 + $0x18] sm:$0xff]  ;;  %vm466_vm0 = vcmask 523264  }
  0xd9   : > { %543 = vmatprep.mubr.f32.mxu0 %v4489_v0  ;;  %v450_v3 = vld [vmem:[#allocation7] sm:$0xff]  ;;  %v3872_v4 = vpack.c.bf16 %v453_v2, %v451_v1  ;;  %v452_v5 = vld [vmem:[#allocation7 + $0x10] sm:$0xff]  ;;  %v455_v6 = vld [vmem:[#allocation7 + $0x28] sm:$0xff]  ;;  %v4490_v29 = vmov 0   ;;  %s4491_s15 = smov 16   ;;  %s4492_s23 = smov 17  }
  0xda   : > { %v457_v7 = vld [vmem:[#allocation7 + $0x38] sm:$0xff]  ;;  %v3874_v8 = vpack.c.bf16 %v452_v5, %v450_v3  ;;  %v454_v10 = vld [vmem:[#allocation7 + $0x20] sm:$0xff]  ;;  %v456_v11 = vld [vmem:[#allocation7 + $0x30] sm:$0xff]  ;;  %622 = vmatprep.mubr.bf16.mxu1 %v4490_v29  ;;  %s4493_s22 = smov 15   ;;  %s4494_s30 = smov 1   ;;  %vm893_vm9 = vcmask 1043456  }
  0xdb   : > { %v3876_v9 = vpack.c.bf16 %v457_v7, %v455_v6  ;;  %v459_v12 = vld [vmem:[#allocation7 + $0x48] sm:$0xff]  ;;  %3873 = vmatprep.subr.bf16.mxu0 %v3872_v4  ;;  %v461_v13 = vld [vmem:[#allocation7 + $0x58] sm:$0xff]  ;;  %v3878_v14 = vpack.c.bf16 %v456_v11, %v454_v10  ;;  %v458_v16 = vld [vmem:[#allocation7 + $0x40] sm:$0xff]  ;;  %s4495_s25 = smov 127   ;;  %s4496_s2 = smov 113   ;;  %vm868_vm10 = vcmask 31744  }
  0xdc   : > { %3875 = vmatpush1.bf16.msra.mxu0 %v3874_v8  ;;  %v3880_v15 = vpack.c.bf16 %v461_v13, %v459_v12  ;;  %v460_v17 = vld [vmem:[#allocation7 + $0x50] sm:$0xff]  ;;  %v463_v18 = vld [vmem:[#allocation7 + $0x68] sm:$0xff]  ;;  %v465_v19 = vld [vmem:[#allocation7 + $0x78] sm:$0xff]  ;;  %s4497_s20 = smov 112   ;;  %s6087_s21 = smov 111  }
  0xdd   : > { %3877 = vmatprep.subr.bf16.mxu0 %v3876_v9  ;;  %v3882_v20 = vpack.c.bf16 %v460_v17, %v458_v16  ;;  %v3884_v21 = vpack.c.bf16 %v465_v19, %v463_v18  ;;  %v462_v22 = vld [vmem:[#allocation7 + $0x60] sm:$0xff]  ;;  %v464_v23 = vld [vmem:[#allocation7 + $0x70] sm:$0xff]  ;;  %v447_v26 = vld [vmem:[%s4816_s19 + $0x8] sm:$0xff]  ;;  %s3871_s4 = sshll.u32 %s4572_s13, 11  ;;  %s3487_s13 = scalar_lea.sflag [#allocation4], %s4812_s18 }
  0xde   : > { %v3886_v24 = vpack.c.bf16 %v464_v23, %v462_v22  ;;  %v446_v25 = vld [vmem:[%s4816_s19] sm:$0xff]  ;;  %v448_v27 = vld [vmem:[%s4816_s19 + $0x10] sm:$0xff]  ;;  %v449_v28 = vld [vmem:[%s4816_s19 + $0x18] sm:$0xff]  ;;  %v676_v22 = vlaneseq  ;;  %s6119_s19 = smov 111  }
  0xdf   : > { %v569_v32 = vld [vmem:[%s4824_s9 + $0x8] sm:$0xff]  ;;  %v571_v33 = vld [vmem:[%s4824_s9 + $0x18] sm:$0xff]  ;;  %v568_v39 = vld [vmem:[%s4824_s9] sm:$0xff] }
  0xe0   : > { %3879 = vmatpush1.bf16.msra.mxu0 %v3878_v14  ;;  %v580_v38 = vpack.c.bf16 %v571_v33, %v569_v32  ;;  %v570_v40 = vld [vmem:[%s4824_s9 + $0x10] sm:$0xff]  ;;  %v573_v44 = vld [vmem:[%s4824_s9 + $0x28] sm:$0xff]  ;;  %v575_v45 = vld [vmem:[%s4824_s9 + $0x38] sm:$0xff] }
  0xe1   : > { %3881 = vmatprep.subr.bf16.mxu0 %v3880_v15  ;;  %v579_v43 = vpack.c.bf16 %v570_v40, %v568_v39  ;;  %v584_v50 = vpack.c.bf16 %v575_v45, %v573_v44  ;;  %v572_v51 = vld [vmem:[%s4824_s9 + $0x20] sm:$0xff]  ;;  %v574_v52 = vld [vmem:[%s4824_s9 + $0x30] sm:$0xff]  ;;  %v3661_v29 = vld [vmem:[%s6074_s5 + $0x8] sm:$0xff] }
  0xe2   : > { %v583_v53 = vpack.c.bf16 %v574_v52, %v572_v51  ;;  %v576_v54 = vld [vmem:[#allocation8] sm:$0xf]  ;;  %v585_v55 = vld [vmem:[#allocation10] sm:$0xff]  ;;  %v586_v56 = vld [vmem:[#allocation10 + $0x8] sm:$0xff]  ;;  %v705_v40 = vcombine.high %v3661_v29, %v3661_v29 }
  0xe3   : > { %v681_v32 = vld [vmem:[%s6074_s5] sm:$0xff]  ;;  %v3662_v33 = vld [vmem:[%s6074_s5 + $0x10] sm:$0xff] }
  0xe4   : > { %3883 = vmatpush1.bf16.msra.mxu0 %v3882_v20  ;;  %v683_v45 = vcombine.high %v681_v32, %v681_v32 }
  0xe5   : > { %3885 = vmatprep.subr.bf16.mxu0 %v3884_v21 }
  0xe8   : > { %3887 = vmatpush1.bf16.msra.mxu0 %v3886_v24 }
  0xeb   : > { %3655 = vmatmul.mubr.msk.f32.vlgmr.msra.gmra.mrb[0].mxu0 %vm466_vm0, %v446_v25  ;;  %v4913_v25 = vand.u32 127, %v676_v22 }
  0xec   : > { %549 = vmatprep.mubr.f32.mxu0 %v4489_v0 }
  0xed   : > { %vm699_vm1 = vcmp.lt.s32.totalorder %v4913_v25, 16  ;;  %vm721_vm2 = vcmp.lt.s32.totalorder %v4913_v25, 15  ;;  %vm678_vm3 = vcmp.lt.s32.totalorder %v4913_v25, 17  ;;  %vm743_vm4 = vcmp.lt.s32.totalorder %v4913_v25, 1 }
  0xee   : > { %vm765_vm5 = vcmp.lt.s32.totalorder %v4913_v25, 127  ;;  %vm787_vm6 = vcmp.lt.s32.totalorder %v4913_v25, 113  ;;  %vm809_vm7 = vcmp.lt.s32.totalorder %v4913_v25, 112  ;;  %vm831_vm8 = vcmp.lt.s32.totalorder %v4913_v25, 111 }
  0xef   : > { %3656 = vmatmul.mubr.msk.f32.gmra.mrb[2].mxu0 %vm466_vm0, %v447_v26 }
  0xf0   : > { %555 = vmatprep.mubr.f32.mxu0 %v4489_v0 }
  0xf3   : > { %3657 = vmatmul.mubr.msk.f32.gmra.mrb[4].mxu0 %vm466_vm0, %v448_v27 }
  0xf4   : > { %561 = vmatprep.mubr.f32.mxu0 %v4489_v0 }
  0xf7   : > { %3658 = vmatmul.mubr.msk.f32.gmra.mrb[6].mxu0 %vm466_vm0, %v449_v28  ;;  %v3660_v28 = vld [vmem:[%s6074_s5 + $0x20] sm:$0xff] }
  0xf8   : > { %962 = vmatprep.mubr.f32.mxu0 %v4489_v0  ;;  %v668_v39 = vcombine.low %v3660_v28, %v3660_v28 }
 0x1be   : > { %v4855_v30 = vpop.f32.mrb[0].mxu0 }
 0x1bf   : > { %v4857_v31 = vpop.f32.mrb[1].mxu0 }
 0x1c2   : > { %v4861_v34 = vpop.f32.mrb[2].mxu0 }
 0x1c3   : > { %v4863_v35 = vpop.f32.mrb[3].mxu0  ;;  %v577_v36 = vpack.c.bf16 %v4861_v34, %v4855_v30 }
 0x1c4   : > { %v578_v37 = vpack.c.bf16 %v4863_v35, %v4857_v31 }
 0x1c6   : > { %v4871_v41 = vpop.f32.mrb[4].mxu0  ;;  %590 = vmatprep.subr.bf16.mxu1 %v578_v37 }
 0x1c7   : > { %v4873_v42 = vpop.f32.mrb[5].mxu0  ;;  %591 = vmatpush1.bf16.msra.mxu1 %v577_v36 }
 0x1c8   : > { %592 = vmatprep.subr.bf16.mxu1 %v580_v38  ;;  %v3663_v38 = vld [vmem:[%s6074_s5 + $0x18] sm:$0xff] }
 0x1ca   : > { %v4877_v46 = vpop.f32.mrb[6].mxu0 }
 0x1cb   : > { %v581_v47 = vpack.c.bf16 %v4877_v46, %v4871_v41  ;;  %v4881_v48 = vpop.f32.mrb[7].mxu0  ;;  %593 = vmatpush1.bf16.msra.mxu1 %v579_v43 }
 0x1cc   : > { %v582_v49 = vpack.c.bf16 %v4881_v48, %v4873_v42 }
 0x1ce   : > { %594 = vmatprep.subr.bf16.mxu1 %v582_v49  ;;  %v749_v49 = vcombine.high %v3663_v38, %v3663_v38 }
 0x1cf   : > { %595 = vmatpush1.bf16.msra.mxu1 %v581_v47  ;;  %v727_v47 = vcombine.high %v3662_v33, %v3662_v33 }
 0x1d0   : > { %596 = vmatprep.subr.bf16.mxu1 %v584_v50 }
 0x1d3   : > { %597 = vmatpush1.bf16.msra.mxu1 %v583_v53 }
 0x1d6   : > { %3659 = vmatmul.mubr.msk.bf16.vlgmr.msra.gmra.mrb[0].mxu1 %vm466_vm0, %v576_v54 }
 0x1d7   : > { %1839 = vmatprep.mubr.f32.mxu1 %v4489_v0 }
 0x2a9   : > { %v624_v57 = vpop.f32.mrb[0].mxu1 }
 0x2aa   : > { %v625_v58 = vadd.f32 %v624_v57, %v585_v55  ;;  %v626_v59 = vpop.f32.mrb[1].mxu1  ;;  %v3664_v55 = vld [vmem:[%s6074_s5 + $0x28] sm:$0xff] }
 0x2ab   : > { %v627_v60 = vadd.f32 %v626_v59, %v586_v56  ;;  %v628_v61 = vpop.f32.mrb[2].mxu1 }
 0x2ac   : > { %v633_v62 = vmul.f32 %v625_v58, %v625_v58  ;;  %v629_v63 = vpop.f32.mrb[3].mxu1  ;;  %v631_v12 = vmul.f32 0.5, %v625_v58 }
 0x2ad   : > { %v634_v1 = vmul.f32 %v627_v60, %v627_v60  ;;  %v632_v14 = vmul.f32 0.5, %v627_v60 }
 0x2ae   : > { %v635_v2 = vmul.f32 %v633_v62, %v625_v58 }
 0x2af   : > { %v636_v3 = vmul.f32 %v634_v1, %v627_v60 }
 0x2b0   : > { %v637_v4 = vmul.f32 0.044715, %v635_v2 }
 0x2b1   : > { %v638_v5 = vmul.f32 0.044715, %v636_v3 }
 0x2b2   : > { %v639_v6 = vadd.f32 %v637_v4, %v625_v58 }
 0x2b3   : > { %v640_v7 = vadd.f32 %v638_v5, %v627_v60  ;;  %v3665_v60 = vld [vmem:[%s6074_s5 + $0x30] sm:$0xff]  ;;  %v771_v5 = vcombine.high %v3664_v55, %v3664_v55 }
 0x2b4   : > { %v641_v8 = vmul.f32 0.7978846, %v639_v6 }
 0x2b5   : > { %v642_v9 = vmul.f32 0.7978846, %v640_v7 }
 0x2b6   : > { %4179 = vtanh.f32 %v641_v8 }
 0x2b7   : > { %4181 = vtanh.f32 %v642_v9 }
 0x2c0   : > { %v4180_v10 = vpop.eup %4179 }
 0x2c1   : > { %v4182_v11 = vpop.eup %4181  ;;  %v645_v13 = vadd.f32 1.0, %v4180_v10  ;;  %v793_v10 = vcombine.high %v3665_v60, %v3665_v60 }
 0x2c2   : > { %v646_v15 = vadd.f32 1.0, %v4182_v11  ;;  %v3666_v11 = vld [vmem:[%s6074_s5 + $0x38] sm:$0xff] }
 0x2c3   : > { %v647_v16 = vmul.f32 %v645_v13, %v631_v12 }
 0x2c4   : > { %v4889_v17 = vmul.f32 %v646_v15, %v632_v14 }
 0x2c5   : > { %v659_v18 = vrot.slane %v647_v16, 4  ;;  %v670_v53 = vmul.f32 %v668_v39, %v647_v16 }
 0x2c6   : > { %v660_v19 = vrot.slane %v4889_v17, 4  ;;  %v671_v4 = vmul.f32 %v3660_v28, %v4889_v17 }
 0x2c7   : > { %695 = vrot.lane.b32.xlu1 %v659_v18, %s4491_s15  ;;  %672 = vrot.lane.b32.xlu0 %v659_v18, %s4492_s23  ;;  %v4894_v20 = vadd.f32 %v659_v18, %v647_v16 }
 0x2c8   : > { %v4897_v21 = vadd.f32 %v660_v19, %v4889_v17 }
 0x2cb   : > { %697 = vrot.lane.b32.xlu1 %v660_v19, %s4491_s15  ;;  %717 = vrot.lane.b32.xlu0 %v659_v18, %s4493_s22 }
 0x2cf   : > { %719 = vrot.lane.b32.xlu1 %v660_v19, %s4493_s22  ;;  %739 = vrot.lane.b32.xlu0 %v659_v18, %s4494_s30 }
 0x2d3   : > { %741 = vrot.lane.b32.xlu1 %v660_v19, %s4494_s30  ;;  %674 = vrot.lane.b32.xlu0 %v660_v19, %s4492_s23 }
 0x2d7   : > { %763 = vrot.lane.b32.xlu1 %v660_v19, %s4495_s25  ;;  %761 = vrot.lane.b32.xlu0 %v659_v18, %s4495_s25 }
 0x2db   : > { %785 = vrot.lane.b32.xlu1 %v660_v19, %s4496_s2  ;;  %783 = vrot.lane.b32.xlu0 %v659_v18, %s4496_s2 }
 0x2df   : > { %807 = vrot.lane.b32.xlu1 %v660_v19, %s4497_s20  ;;  %805 = vrot.lane.b32.xlu0 %v659_v18, %s4497_s20 }
 0x2e3   : > { %829 = vrot.lane.b32.xlu1 %v660_v19, %s6087_s21  ;;  %827 = vrot.lane.b32.xlu0 %v659_v18, %s6087_s21 }
 0x339   : > { %v696_v23 = vpop.permute.xlu1 %695  ;;  %v673_v24 = vpop.permute.xlu0 %672 }
 0x33d   : > { %v698_v26 = vpop.permute.xlu1 %697  ;;  %v718_v27 = vpop.permute.xlu0 %717 }
 0x33e   : > { %v700_v43 = vsel %vm699_vm1, %v696_v23, %v698_v26  ;;  %v701_v44 = vsel %vm699_vm1, %v698_v26, %v696_v23 }
 0x33f   : > { %v707_v56 = vmul.f32 %v3661_v29, %v701_v44  ;;  %v708_v57 = vmul.f32 %v705_v40, %v700_v43 }
 0x341   : > { %v720_v36 = vpop.permute.xlu1 %719  ;;  %v740_v37 = vpop.permute.xlu0 %739  ;;  %v711_v16 = vrot.slane %v707_v56, 4  ;;  %v712_v17 = vrot.slane %v708_v57, 4 }
 0x342   : > { %v722_v50 = vsel %vm721_vm2, %v718_v27, %v720_v36  ;;  %v723_v51 = vsel %vm721_vm2, %v720_v36, %v718_v27  ;;  %v3667_v36 = vld [vmem:[%s6074_s5 + $0x40] sm:$0xff] }
 0x343   : > { %v729_v2 = vmul.f32 %v3662_v33, %v723_v51  ;;  %v730_v3 = vmul.f32 %v727_v47, %v722_v50 }
 0x345   : > { %v742_v52 = vpop.permute.xlu1 %741  ;;  %v675_v54 = vpop.permute.xlu0 %674  ;;  %v733_v22 = vrot.slane %v729_v2, 4  ;;  %v734_v23 = vrot.slane %v730_v3, 4 }
 0x346   : > { %v679_v58 = vsel %vm678_vm3, %v673_v24, %v675_v54  ;;  %v680_v59 = vsel %vm678_vm3, %v675_v54, %v673_v24  ;;  %v744_v61 = vsel %vm743_vm4, %v740_v37, %v742_v52  ;;  %v745_v62 = vsel %vm743_vm4, %v742_v52, %v740_v37 }
 0x347   : > { %v685_v63 = vmul.f32 %v681_v32, %v680_v59  ;;  %v686_v1 = vmul.f32 %v683_v45, %v679_v58  ;;  %v751_v12 = vmul.f32 %v3663_v38, %v745_v62  ;;  %v752_v13 = vmul.f32 %v749_v49, %v744_v61 }
 0x348   : > { %v815_v24 = vcombine.high %v3666_v11, %v3666_v11  ;;  %v837_v49 = vcombine.high %v3667_v36, %v3667_v36 }
 0x349   : > { %v689_v6 = vrot.slane %v685_v63, 4  ;;  %v690_v7 = vrot.slane %v686_v1, 4  ;;  %v764_v8 = vpop.permute.xlu1 %763  ;;  %v762_v9 = vpop.permute.xlu0 %761  ;;  %v755_v37 = vrot.slane %v751_v12, 4  ;;  %v756_v38 = vrot.slane %v752_v13, 4 }
 0x34a   : > { %v766_v14 = vsel %vm765_vm5, %v762_v9, %v764_v8  ;;  %v767_v15 = vsel %vm765_vm5, %v764_v8, %v762_v9 }
 0x34b   : > { %v693_v18 = vadd.f32 %v689_v6, %v670_v53  ;;  %v694_v19 = vadd.f32 %v690_v7, %v671_v4  ;;  %v773_v28 = vmul.f32 %v3664_v55, %v766_v14  ;;  %v774_v29 = vmul.f32 %v771_v5, %v767_v15  ;;  %v849_v6 = vld [vmem:[%s6075_s6] sm:$0xff] }
 0x34d   : > { %v715_v26 = vadd.f32 %v711_v16, %v693_v18  ;;  %v716_v27 = vadd.f32 %v712_v17, %v694_v19  ;;  %v786_v32 = vpop.permute.xlu1 %785  ;;  %v784_v33 = vpop.permute.xlu0 %783  ;;  %v777_v52 = vrot.slane %v773_v28, 4  ;;  %v778_v53 = vrot.slane %v774_v29, 4  ;;  %v3672_v28 = vld [vmem:[%s6076_s7 + $0x60] sm:$0xff]  ;;  %v3673_v29 = vld [vmem:[%s6076_s7 + $0x68] sm:$0xff] }
 0x34e   : > { %v788_v39 = vsel %vm787_vm6, %v784_v33, %v786_v32  ;;  %v789_v40 = vsel %vm787_vm6, %v786_v32, %v784_v33  ;;  %v3674_v32 = vld [vmem:[%s6076_s7 + $0x70] sm:$0xff]  ;;  %v3675_v33 = vld [vmem:[%s6076_s7 + $0x78] sm:$0xff] }
 0x34f   : > { %v737_v43 = vadd.f32 %v733_v22, %v715_v26  ;;  %v738_v44 = vadd.f32 %v734_v23, %v716_v27  ;;  %v795_v45 = vmul.f32 %v3665_v60, %v788_v39  ;;  %v796_v47 = vmul.f32 %v793_v10, %v789_v40  ;;  %v3668_v26 = vld [vmem:[%s6076_s7 + $0x40] sm:$0xff]  ;;  %v3669_v27 = vld [vmem:[%s6076_s7 + $0x48] sm:$0xff] }
 0x350   : > { %v3697_v39 = vld [vmem:[%s6074_s5 + $0x48] sm:$0xff] }
 0x351   : > { %v759_v50 = vadd.f32 %v755_v37, %v737_v43  ;;  %v760_v51 = vadd.f32 %v756_v38, %v738_v44  ;;  %v808_v54 = vpop.permute.xlu1 %807  ;;  %v806_v55 = vpop.permute.xlu0 %805  ;;  %v799_v56 = vrot.slane %v795_v45, 4  ;;  %v800_v57 = vrot.slane %v796_v47, 4  ;;  %v3698_v44 = vld [vmem:[%s6074_s5 + $0x50] sm:$0xff] }
 0x352   : > { %v810_v58 = vsel %vm809_vm7, %v806_v55, %v808_v54  ;;  %v811_v59 = vsel %vm809_vm7, %v808_v54, %v806_v55  ;;  %v1172_v45 = vcombine.high %v3697_v39, %v3697_v39 }
 0x353   : > { %v781_v61 = vadd.f32 %v777_v52, %v759_v50  ;;  %v782_v60 = vadd.f32 %v778_v53, %v760_v51  ;;  %v817_v62 = vmul.f32 %v3666_v11, %v810_v58  ;;  %v818_v63 = vmul.f32 %v815_v24, %v811_v59  ;;  %v3696_v51 = vld [vmem:[%s6074_s5 + $0x68] sm:$0xff]  ;;  %v3699_v53 = vld [vmem:[%s6074_s5 + $0x58] sm:$0xff]  ;;  %v3700_v59 = vld [vmem:[%s6074_s5 + $0x60] sm:$0xff] }
 0x354   : > { %v851_v11 = vcombine.low %v849_v6, %v849_v6  ;;  %v1193_v52 = vcombine.high %v3698_v44, %v3698_v44 }
 0x355   : > { %v803_v1 = vadd.f32 %v799_v56, %v781_v61  ;;  %v804_v2 = vadd.f32 %v800_v57, %v782_v60  ;;  %v821_v3 = vrot.slane %v817_v62, 4  ;;  %v822_v4 = vrot.slane %v818_v63, 4  ;;  %v830_v5 = vpop.permute.xlu1 %829  ;;  %v828_v7 = vpop.permute.xlu0 %827 }
 0x356   : > { %v832_v8 = vsel %vm831_vm8, %v828_v7, %v830_v5  ;;  %v833_v9 = vsel %vm831_vm8, %v830_v5, %v828_v7  ;;  %v1157_v61 = vcombine.low %v3696_v51, %v3696_v51  ;;  %v1214_v60 = vcombine.high %v3699_v53, %v3699_v53 }
 0x357   : > { %v839_v10 = vmul.f32 %v3667_v36, %v832_v8  ;;  %v840_v12 = vmul.f32 %v837_v49, %v833_v9  ;;  %v825_v13 = vadd.f32 %v821_v3, %v803_v1  ;;  %v826_v14 = vadd.f32 %v822_v4, %v804_v2  ;;  %v649_v36 = vld [vmem:[%s6076_s7] sm:$0xff] }
 0x358   : > { %v1235_v5 = vcombine.high %v3700_v59, %v3700_v59 }
 0x359   : > { %v843_v15 = vrot.slane %v839_v10, 4  ;;  %v844_v16 = vrot.slane %v840_v12, 4 }
 0x35b   : > { %v847_v17 = vadd.f32 %v843_v15, %v825_v13  ;;  %v848_v18 = vadd.f32 %v844_v16, %v826_v14  ;;  %v3702_v15 = vld [vmem:[%s6074_s5 + $0x78] sm:$0xff] }
 0x35d   : > { %v4986_v19 = vadd.f32 %v851_v11, %v847_v17  ;;  %v4988_v22 = vadd.f32 %v849_v6, %v848_v18  ;;  %v3701_v6 = vld [vmem:[%s6074_s5 + $0x70] sm:$0xff] }
 0x35f   : > { %v866_v23 = vrot.slane %v4986_v19, 4  ;;  %v867_v24 = vrot.slane %v4988_v22, 4  ;;  %v1159_v12 = vmul.f32 %v1157_v61, %v4986_v19  ;;  %v1160_v16 = vmul.f32 %v3696_v51, %v4988_v22  ;;  %v3703_v22 = vld [vmem:[%s6074_s5 + $0x80] sm:$0xff] }
 0x361   : > { %1165 = vrot.lane.b32.xlu1 %v867_v24, %s4492_s23  ;;  %3676 = vmatprep.subr.msk.mxu0 %vm893_vm9, %v867_v24 }
 0x362   : > { %1163 = vrot.lane.b32.xlu0 %v866_v23, %s4492_s23  ;;  %3677 = vmatpush1.msk.msra.mxu0 %vm893_vm9, %v866_v23 }
 0x363   : > { %3686 = vmatprep.subr.msk.mxu0 %vm893_vm9, %v4897_v21  ;;  %3678 = vmatmul.mubr.msk.f32.vlgmr.msra.gmra.mrb[8].mxu0 %vm868_vm10, %v3668_v26  ;;  %v3670_v21 = vld [vmem:[%s6076_s7 + $0x50] sm:$0xff] }
 0x364   : > { %3687 = vmatpush1.msk.msra.mxu0 %vm893_vm9, %v4894_v20  ;;  %968 = vmatprep.mubr.f32.mxu0 %v4489_v0  ;;  %v3671_v20 = vld [vmem:[%s6076_s7 + $0x58] sm:$0xff] }
 0x365   : > { %1186 = vrot.lane.b32.xlu1 %v867_v24, %s4491_s15 }
 0x366   : > { %1184 = vrot.lane.b32.xlu0 %v866_v23, %s4491_s15 }
 0x367   : > { %3679 = vmatmul.mubr.msk.f32.gmra.mrb[10].mxu0 %vm868_vm10, %v3669_v27 }
 0x368   : > { %974 = vmatprep.mubr.f32.mxu0 %v4489_v0 }
 0x369   : > { %1207 = vrot.lane.b32.xlu1 %v867_v24, %s4493_s22 }
 0x36a   : > { %1205 = vrot.lane.b32.xlu0 %v866_v23, %s4493_s22 }
 0x36b   : > { %3680 = vmatmul.mubr.msk.f32.gmra.mrb[12].mxu0 %vm868_vm10, %v3670_v21 }
 0x36c   : > { %980 = vmatprep.mubr.f32.mxu0 %v4489_v0 }
 0x36d   : > { %1228 = vrot.lane.b32.xlu1 %v867_v24, %s4494_s30 }
 0x36e   : > { %1226 = vrot.lane.b32.xlu0 %v866_v23, %s4494_s30 }
 0x36f   : > { %3681 = vmatmul.mubr.msk.f32.gmra.mrb[14].mxu0 %vm868_vm10, %v3671_v20 }
 0x370   : > { %986 = vmatprep.mubr.f32.mxu0 %v4489_v0 }
 0x371   : > { %1249 = vrot.lane.b32.xlu1 %v867_v24, %s4495_s25 }
 0x372   : > { %1247 = vrot.lane.b32.xlu0 %v866_v23, %s4495_s25 }
 0x373   : > { %3682 = vmatmul.mubr.msk.f32.gmra.mrb[16].mxu0 %vm868_vm10, %v3672_v28 }
 0x374   : > { %992 = vmatprep.mubr.f32.mxu0 %v4489_v0 }
 0x375   : > { %1270 = vrot.lane.b32.xlu1 %v867_v24, %s4496_s2 }
 0x376   : > { %1268 = vrot.lane.b32.xlu0 %v866_v23, %s4496_s2 }
 0x377   : > { %3683 = vmatmul.mubr.msk.f32.gmra.mrb[18].mxu0 %vm868_vm10, %v3673_v29  ;;  %v1277_v29 = vcombine.high %v3702_v15, %v3702_v15 }
 0x378   : > { %998 = vmatprep.mubr.f32.mxu0 %v4489_v0 }
 0x379   : > { %1291 = vrot.lane.b32.xlu1 %v867_v24, %s4497_s20 }
 0x37a   : > { %1289 = vrot.lane.b32.xlu0 %v866_v23, %s4497_s20 }
 0x37b   : > { %3684 = vmatmul.mubr.msk.f32.gmra.mrb[20].mxu0 %vm868_vm10, %v3674_v32 }
 0x37c   : > { %1004 = vmatprep.mubr.f32.mxu0 %v4489_v0 }
 0x37d   : > { %1312 = vrot.lane.b32.xlu1 %v867_v24, %s6119_s19 }
 0x37e   : > { %1310 = vrot.lane.b32.xlu0 %v866_v23, %s6119_s19  ;;  %v1256_v23 = vcombine.high %v3701_v6, %v3701_v6 }
 0x37f   : > { %3685 = vmatmul.mubr.msk.f32.gmra.mrb[22].mxu0 %vm868_vm10, %v3675_v33 }
 0x380   : > { %1105 = vmatprep.mubr.f32.mxu0 %v4489_v0 }
 0x383   : > { %3688 = vmatmul.mubr.msk.f32.vlgmr.msra.gmra.mrb[8].mxu0 %vm868_vm10, %v649_v36 }
 0x384   : > { %1111 = vmatprep.mubr.f32.mxu0 %v4489_v0 }
 0x3d3   : > { %v1166_v37 = vpop.permute.xlu1 %1165 }
 0x3d4   : > { %v1164_v38 = vpop.permute.xlu0 %1163 }
 0x3d5   : > { %v1167_v47 = vsel %vm678_vm3, %v1164_v38, %v1166_v37  ;;  %v1168_v49 = vsel %vm678_vm3, %v1166_v37, %v1164_v38 }
 0x3d6   : > { %v1174_v57 = vmul.f32 %v3697_v39, %v1168_v49  ;;  %v1175_v58 = vmul.f32 %v1172_v45, %v1167_v47 }
 0x3d7   : > { %v1187_v40 = vpop.permute.xlu1 %1186 }
 0x3d8   : > { %v1185_v43 = vpop.permute.xlu0 %1184  ;;  %v1178_v7 = vrot.slane %v1174_v57, 4  ;;  %v1179_v8 = vrot.slane %v1175_v58, 4 }
 0x3d9   : > { %v1188_v55 = vsel %vm699_vm1, %v1185_v43, %v1187_v40  ;;  %v1189_v56 = vsel %vm699_vm1, %v1187_v40, %v1185_v43 }
 0x3da   : > { %v1195_v63 = vmul.f32 %v3698_v44, %v1189_v56  ;;  %v1196_v1 = vmul.f32 %v1193_v52, %v1188_v55  ;;  %v1182_v20 = vadd.f32 %v1178_v7, %v1159_v12  ;;  %v1183_v28 = vadd.f32 %v1179_v8, %v1160_v16  ;;  %v3705_v12 = vld [vmem:[%s6075_s6 + $0x8] sm:$0xff] }
 0x3db   : > { %v1208_v50 = vpop.permute.xlu1 %1207 }
 0x3dc   : > { %v1206_v54 = vpop.permute.xlu0 %1205  ;;  %v1199_v17 = vrot.slane %v1195_v63, 4  ;;  %v1200_v18 = vrot.slane %v1196_v1, 4 }
 0x3dd   : > { %v1209_v2 = vsel %vm721_vm2, %v1206_v54, %v1208_v50  ;;  %v1210_v3 = vsel %vm721_vm2, %v1208_v50, %v1206_v54  ;;  %v3704_v50 = vld [vmem:[%s6074_s5 + $0x88] sm:$0xff] }
 0x3de   : > { %v1216_v11 = vmul.f32 %v3699_v53, %v1210_v3  ;;  %v1217_v13 = vmul.f32 %v1214_v60, %v1209_v2  ;;  %v1203_v37 = vadd.f32 %v1199_v17, %v1182_v20  ;;  %v1204_v38 = vadd.f32 %v1200_v18, %v1183_v28 }
 0x3df   : > { %v1229_v62 = vpop.permute.xlu1 %1228  ;;  %v1298_v53 = vcombine.high %v3703_v22, %v3703_v22  ;;  %v1319_v61 = vcombine.high %v3704_v50, %v3704_v50 }
 0x3e0   : > { %v1227_v4 = vpop.permute.xlu0 %1226  ;;  %v1220_v32 = vrot.slane %v1216_v11, 4  ;;  %v1221_v33 = vrot.slane %v1217_v13, 4 }
 0x3e1   : > { %v1230_v9 = vsel %vm743_vm4, %v1227_v4, %v1229_v62  ;;  %v1231_v10 = vsel %vm743_vm4, %v1229_v62, %v1227_v4 }
 0x3e2   : > { %v1237_v26 = vmul.f32 %v3700_v59, %v1231_v10  ;;  %v1238_v27 = vmul.f32 %v1235_v5, %v1230_v9  ;;  %v1224_v54 = vadd.f32 %v1220_v32, %v1203_v37  ;;  %v1225_v55 = vadd.f32 %v1221_v33, %v1204_v38  ;;  %v652_v37 = vld [vmem:[%s6076_s7 + $0x18] sm:$0xff]  ;;  %v653_v38 = vld [vmem:[%s6076_s7 + $0x20] sm:$0xff] }
 0x3e3   : > { %v1250_v14 = vpop.permute.xlu1 %1249 }
 0x3e4   : > { %v1248_v24 = vpop.permute.xlu0 %1247  ;;  %v1241_v44 = vrot.slane %v1237_v26, 4  ;;  %v1242_v45 = vrot.slane %v1238_v27, 4 }
 0x3e5   : > { %v1251_v21 = vsel %vm765_vm5, %v1248_v24, %v1250_v14  ;;  %v1252_v19 = vsel %vm765_vm5, %v1250_v14, %v1248_v24 }
 0x3e6   : > { %v1258_v39 = vmul.f32 %v3701_v6, %v1251_v21  ;;  %v1259_v40 = vmul.f32 %v1256_v23, %v1252_v19  ;;  %v1245_v60 = vadd.f32 %v1241_v44, %v1224_v54  ;;  %v1246_v62 = vadd.f32 %v1242_v45, %v1225_v55  ;;  %v3706_v44 = vld [vmem:[%s6076_s7 + $0x80] sm:$0xff] }
 0x3e7   : > { %v1271_v36 = vpop.permute.xlu1 %1270  ;;  %v1334_v23 = vcombine.low %v3705_v12, %v3705_v12 }
 0x3e8   : > { %v1269_v43 = vpop.permute.xlu0 %1268  ;;  %v1262_v57 = vrot.slane %v1258_v39, 4  ;;  %v1263_v58 = vrot.slane %v1259_v40, 4  ;;  %v654_v39 = vld [vmem:[%s6076_s7 + $0x28] sm:$0xff]  ;;  %v655_v40 = vld [vmem:[%s6076_s7 + $0x30] sm:$0xff] }
 0x3e9   : > { %v1272_v47 = vsel %vm787_vm6, %v1269_v43, %v1271_v36  ;;  %v1273_v49 = vsel %vm787_vm6, %v1271_v36, %v1269_v43  ;;  %v650_v36 = vld [vmem:[%s6076_s7 + $0x8] sm:$0xff]  ;;  %v656_v43 = vld [vmem:[%s6076_s7 + $0x38] sm:$0xff] }
 0x3ea   : > { %v1279_v51 = vmul.f32 %v3702_v15, %v1272_v47  ;;  %v1280_v52 = vmul.f32 %v1277_v29, %v1273_v49  ;;  %v1266_v7 = vadd.f32 %v1262_v57, %v1245_v60  ;;  %v1267_v8 = vadd.f32 %v1263_v58, %v1246_v62  ;;  %3689 = vmatmul.mubr.msk.f32.gmra.mrb[10].mxu0 %vm868_vm10, %v650_v36  ;;  %v3725_v49 = vld [vmem:[%s6074_s5 + $0x90] sm:$0xff] }
 0x3eb   : > { %v1292_v56 = vpop.permute.xlu1 %1291  ;;  %1117 = vmatprep.mubr.f32.mxu0 %v4489_v0 }
 0x3ec   : > { %v1290_v59 = vpop.permute.xlu0 %1289  ;;  %v1283_v2 = vrot.slane %v1279_v51, 4  ;;  %v1284_v3 = vrot.slane %v1280_v52, 4  ;;  %v3726_v52 = vld [vmem:[%s6074_s5 + $0x98] sm:$0xff] }
 0x3ed   : > { %v1293_v63 = vsel %vm809_vm7, %v1290_v59, %v1292_v56  ;;  %v1294_v1 = vsel %vm809_vm7, %v1292_v56, %v1290_v59  ;;  %v3724_v56 = vld [vmem:[%s6074_s5 + $0xb0] sm:$0xff]  ;;  %v1547_v57 = vcombine.high %v3726_v52, %v3726_v52  ;;  %v3727_v59 = vld [vmem:[%s6074_s5 + $0xa0] sm:$0xff] }
 0x3ee   : > { %v1300_v4 = vmul.f32 %v3703_v22, %v1293_v63  ;;  %v1301_v5 = vmul.f32 %v1298_v53, %v1294_v1  ;;  %v1287_v15 = vadd.f32 %v1283_v2, %v1266_v7  ;;  %v1288_v16 = vadd.f32 %v1284_v3, %v1267_v8  ;;  %v651_v22 = vld [vmem:[%s6076_s7 + $0x10] sm:$0xff]  ;;  %v3728_v2 = vld [vmem:[%s6074_s5 + $0xa8] sm:$0xff] }
 0x3ef   : > { %v1313_v6 = vpop.permute.xlu1 %1312  ;;  %3690 = vmatmul.mubr.msk.f32.gmra.mrb[12].mxu0 %vm868_vm10, %v651_v22  ;;  %v1526_v53 = vcombine.high %v3725_v49, %v3725_v49  ;;  %v1511_v3 = vcombine.low %v3724_v56, %v3724_v56 }
 0x3f0   : > { %v1304_v9 = vrot.slane %v1300_v4, 4  ;;  %v1305_v10 = vrot.slane %v1301_v5, 4  ;;  %v1311_v11 = vpop.permute.xlu0 %1310  ;;  %1123 = vmatprep.mubr.f32.mxu0 %v4489_v0  ;;  %v1568_v4 = vcombine.high %v3727_v59, %v3727_v59 }
 0x3f1   : > { %v1314_v13 = vsel %vm831_vm8, %v1311_v11, %v1313_v6  ;;  %v1315_v14 = vsel %vm831_vm8, %v1313_v6, %v1311_v11  ;;  %v3729_v11 = vld [vmem:[%s6074_s5 + $0xb8] sm:$0xff] }
 0x3f2   : > { %v1321_v17 = vmul.f32 %v3704_v50, %v1314_v13  ;;  %v1322_v18 = vmul.f32 %v1319_v61, %v1315_v14  ;;  %v1308_v24 = vadd.f32 %v1304_v9, %v1287_v15  ;;  %v1309_v26 = vadd.f32 %v1305_v10, %v1288_v16 }
 0x3f3   : > { %3691 = vmatmul.mubr.msk.f32.gmra.mrb[14].mxu0 %vm868_vm10, %v652_v37 }
 0x3f4   : > { %v1325_v27 = vrot.slane %v1321_v17, 4  ;;  %v1326_v21 = vrot.slane %v1322_v18, 4  ;;  %1129 = vmatprep.mubr.f32.mxu0 %v4489_v0 }
 0x3f6   : > { %v1329_v19 = vadd.f32 %v1325_v27, %v1308_v24  ;;  %v1330_v20 = vadd.f32 %v1326_v21, %v1309_v26  ;;  %v3730_v24 = vld [vmem:[%s6074_s5 + $0xc0] sm:$0xff] }
 0x3f7   : > { %3692 = vmatmul.mubr.msk.f32.gmra.mrb[16].mxu0 %vm868_vm10, %v653_v38 }
 0x3f8   : > { %v5123_v28 = vadd.f32 %v1334_v23, %v1329_v19  ;;  %v5125_v29 = vadd.f32 %v3705_v12, %v1330_v20  ;;  %1135 = vmatprep.mubr.f32.mxu0 %v4489_v0  ;;  %v1589_v12 = vcombine.high %v3728_v2, %v3728_v2  ;;  %v1610_v20 = vcombine.high %v3729_v11, %v3729_v11 }
 0x3fa   : > { %v1349_v32 = vrot.slane %v5123_v28, 4  ;;  %v1350_v33 = vrot.slane %v5125_v29, 4  ;;  %v1513_v17 = vmul.f32 %v1511_v3, %v5123_v28  ;;  %v1514_v26 = vmul.f32 %v3724_v56, %v5125_v29  ;;  %v3731_v29 = vld [vmem:[%s6074_s5 + $0xc8] sm:$0xff]  ;;  %v3732_v56 = vld [vmem:[%s6074_s5 + $0xd0] sm:$0xff] }
 0x3fb   : > { %3693 = vmatmul.mubr.msk.f32.gmra.mrb[18].mxu0 %vm868_vm10, %v654_v39  ;;  %v1631_v39 = vcombine.high %v3730_v24, %v3730_v24  ;;  %v1673_v3 = vcombine.high %v3732_v56, %v3732_v56 }
 0x3fc   : > { %1519 = vrot.lane.b32.xlu1 %v1350_v33, %s4492_s23  ;;  %1517 = vrot.lane.b32.xlu0 %v1349_v32, %s4492_s23 }
 0x3fd   : > { %3714 = vmatprep.subr.msk.mxu0 %vm893_vm9, %v1350_v33  ;;  %1141 = vmatprep.mubr.f32.mxu0 %v4489_v0 }
 0x3fe   : > { %3715 = vmatpush1.msk.msra.mxu0 %vm893_vm9, %v1349_v32 }
 0x3ff   : > { %3694 = vmatmul.mubr.msk.f32.gmra.mrb[20].mxu0 %vm868_vm10, %v655_v40 }
 0x400   : > { %1540 = vrot.lane.b32.xlu1 %v1350_v33, %s4491_s15  ;;  %1538 = vrot.lane.b32.xlu0 %v1349_v32, %s4491_s15 }
 0x401   : > { %1147 = vmatprep.mubr.f32.mxu0 %v4489_v0 }
 0x403   : > { %3695 = vmatmul.mubr.msk.f32.gmra.mrb[22].mxu0 %vm868_vm10, %v656_v43 }
 0x404   : > { %1561 = vrot.lane.b32.xlu1 %v1350_v33, %s4493_s22  ;;  %1559 = vrot.lane.b32.xlu0 %v1349_v32, %s4493_s22 }
 0x405   : > { %1443 = vmatprep.mubr.f32.mxu0 %v4489_v0 }
 0x407   : > { %3716 = vmatmul.mubr.msk.f32.vlgmr.msra.gmra.mrb[8].mxu0 %vm868_vm10, %v3706_v44 }
 0x408   : > { %1582 = vrot.lane.b32.xlu1 %v1350_v33, %s4494_s30  ;;  %1580 = vrot.lane.b32.xlu0 %v1349_v32, %s4494_s30 }
 0x409   : > { %1449 = vmatprep.mubr.f32.mxu0 %v4489_v0 }
 0x40c   : > { %1603 = vrot.lane.b32.xlu1 %v1350_v33, %s4495_s25  ;;  %1601 = vrot.lane.b32.xlu0 %v1349_v32, %s4495_s25 }
 0x410   : > { %1624 = vrot.lane.b32.xlu1 %v1350_v33, %s4496_s2  ;;  %1622 = vrot.lane.b32.xlu0 %v1349_v32, %s4496_s2 }
 0x414   : > { %1645 = vrot.lane.b32.xlu1 %v1350_v33, %s4497_s20  ;;  %1643 = vrot.lane.b32.xlu0 %v1349_v32, %s4497_s20 }
 0x418   : > { %1666 = vrot.lane.b32.xlu1 %v1350_v33, %s6119_s19  ;;  %1664 = vrot.lane.b32.xlu0 %v1349_v32, %s6119_s19 }
 0x46e   : > { %v1520_v45 = vpop.permute.xlu1 %1519  ;;  %v1518_v47 = vpop.permute.xlu0 %1517 }
 0x46f   : > { %v1521_v54 = vsel %vm678_vm3, %v1518_v47, %v1520_v45  ;;  %v1522_v55 = vsel %vm678_vm3, %v1520_v45, %v1518_v47 }
 0x470   : > { %v1528_v63 = vmul.f32 %v3725_v49, %v1522_v55  ;;  %v1529_v1 = vmul.f32 %v1526_v53, %v1521_v54 }
 0x472   : > { %v1541_v50 = vpop.permute.xlu1 %1540  ;;  %v1539_v51 = vpop.permute.xlu0 %1538  ;;  %v1532_v13 = vrot.slane %v1528_v63, 4  ;;  %v1533_v14 = vrot.slane %v1529_v1, 4 }
 0x473   : > { %v1542_v60 = vsel %vm699_vm1, %v1539_v51, %v1541_v50  ;;  %v1543_v62 = vsel %vm699_vm1, %v1541_v50, %v1539_v51 }
 0x474   : > { %v1549_v5 = vmul.f32 %v3726_v52, %v1543_v62  ;;  %v1550_v6 = vmul.f32 %v1547_v57, %v1542_v60  ;;  %v1536_v37 = vadd.f32 %v1532_v13, %v1513_v17  ;;  %v1537_v38 = vadd.f32 %v1533_v14, %v1514_v26  ;;  %v3733_v17 = vld [vmem:[%s6075_s6 + $0x10] sm:$0xff] }
 0x476   : > { %v1562_v58 = vpop.permute.xlu1 %1561  ;;  %v1560_v61 = vpop.permute.xlu0 %1559  ;;  %v1553_v27 = vrot.slane %v1549_v5, 4  ;;  %v1554_v21 = vrot.slane %v1550_v6, 4 }
 0x477   : > { %v1563_v7 = vsel %vm721_vm2, %v1560_v61, %v1562_v58  ;;  %v1564_v8 = vsel %vm721_vm2, %v1562_v58, %v1560_v61 }
 0x478   : > { %v1570_v18 = vmul.f32 %v3727_v59, %v1564_v8  ;;  %v1571_v23 = vmul.f32 %v1568_v4, %v1563_v7  ;;  %v1557_v44 = vadd.f32 %v1553_v27, %v1536_v37  ;;  %v1558_v45 = vadd.f32 %v1554_v21, %v1537_v38 }
 0x479   : > { %v1652_v59 = vcombine.high %v3731_v29, %v3731_v29 }
 0x47a   : > { %v1583_v9 = vpop.permute.xlu1 %1582  ;;  %v1581_v10 = vpop.permute.xlu0 %1580  ;;  %v1574_v40 = vrot.slane %v1570_v18, 4  ;;  %v1575_v43 = vrot.slane %v1571_v23, 4 }
 0x47b   : > { %v1584_v15 = vsel %vm743_vm4, %v1581_v10, %v1583_v9  ;;  %v1585_v16 = vsel %vm743_vm4, %v1583_v9, %v1581_v10 }
 0x47c   : > { %v1591_v33 = vmul.f32 %v3728_v2, %v1585_v16  ;;  %v1592_v36 = vmul.f32 %v1589_v12, %v1584_v15  ;;  %v1578_v61 = vadd.f32 %v1574_v40, %v1557_v44  ;;  %v1579_v60 = vadd.f32 %v1575_v43, %v1558_v45 }
 0x47e   : > { %v1604_v19 = vpop.permute.xlu1 %1603  ;;  %v1602_v32 = vpop.permute.xlu0 %1601  ;;  %v1595_v52 = vrot.slane %v1591_v33, 4  ;;  %v1596_v53 = vrot.slane %v1592_v36, 4 }
 0x47f   : > { %v1605_v22 = vsel %vm765_vm5, %v1602_v32, %v1604_v19  ;;  %v1606_v28 = vsel %vm765_vm5, %v1604_v19, %v1602_v32 }
 0x480   : > { %v1612_v47 = vmul.f32 %v3729_v11, %v1605_v22  ;;  %v1613_v49 = vmul.f32 %v1610_v20, %v1606_v28  ;;  %v1599_v4 = vadd.f32 %v1595_v52, %v1578_v61  ;;  %v1600_v5 = vadd.f32 %v1596_v53, %v1579_v60 }
 0x481   : > { %v1688_v20 = vcombine.low %v3733_v17, %v3733_v17 }
 0x482   : > { %v1625_v50 = vpop.permute.xlu1 %1624  ;;  %v1623_v51 = vpop.permute.xlu0 %1622  ;;  %v1616_v62 = vrot.slane %v1612_v47, 4  ;;  %v1617_v63 = vrot.slane %v1613_v49, 4  ;;  %v3753_v47 = vld [vmem:[%s6074_s5 + $0xd8] sm:$0xff] }
 0x483   : > { %v1626_v54 = vsel %vm787_vm6, %v1623_v51, %v1625_v50  ;;  %v1627_v55 = vsel %vm787_vm6, %v1625_v50, %v1623_v51  ;;  %v3754_v51 = vld [vmem:[%s6074_s5 + $0xe0] sm:$0xff]  ;;  %v1880_v52 = vcombine.high %v3753_v47, %v3753_v47 }
 0x484   : > { %v1633_v57 = vmul.f32 %v3730_v24, %v1626_v54  ;;  %v1634_v58 = vmul.f32 %v1631_v39, %v1627_v55  ;;  %v1620_v11 = vadd.f32 %v1616_v62, %v1599_v4  ;;  %v1621_v13 = vadd.f32 %v1617_v63, %v1600_v5 }
 0x486   : > { %v1646_v1 = vpop.permute.xlu1 %1645  ;;  %v1644_v2 = vpop.permute.xlu0 %1643  ;;  %v1637_v8 = vrot.slane %v1633_v57, 4  ;;  %v1638_v9 = vrot.slane %v1634_v58, 4  ;;  %v1901_v57 = vcombine.high %v3754_v51, %v3754_v51  ;;  %v3755_v58 = vld [vmem:[%s6074_s5 + $0xe8] sm:$0xff] }
 0x487   : > { %v1647_v6 = vsel %vm809_vm7, %v1644_v2, %v1646_v1  ;;  %v1648_v7 = vsel %vm809_vm7, %v1646_v1, %v1644_v2  ;;  %v3756_v1 = vld [vmem:[%s6074_s5 + $0xf0] sm:$0xff] }
 0x488   : > { %v1654_v10 = vmul.f32 %v3731_v29, %v1647_v6  ;;  %v1655_v12 = vmul.f32 %v1652_v59, %v1648_v7  ;;  %v1641_v26 = vadd.f32 %v1637_v8, %v1620_v11  ;;  %v1642_v27 = vadd.f32 %v1638_v9, %v1621_v13  ;;  %v3741_v29 = vld [vmem:[%s6076_s7 + $0xf8] sm:$0xff] }
 0x48a   : > { %v1658_v14 = vrot.slane %v1654_v10, 4  ;;  %v1659_v15 = vrot.slane %v1655_v12, 4  ;;  %v1667_v16 = vpop.permute.xlu1 %1666  ;;  %v1665_v18 = vpop.permute.xlu0 %1664  ;;  %v1943_v10 = vcombine.high %v3756_v1, %v3756_v1  ;;  %v3757_v12 = vld [vmem:[%s6074_s5 + $0x100] sm:$0xff] }
 0x48b   : > { %v1668_v23 = vsel %vm831_vm8, %v1665_v18, %v1667_v16  ;;  %v1669_v24 = vsel %vm831_vm8, %v1667_v16, %v1665_v18 }
 0x48c   : > { %v1675_v21 = vmul.f32 %v3732_v56, %v1668_v23  ;;  %v1676_v19 = vmul.f32 %v1673_v3, %v1669_v24  ;;  %v1662_v32 = vadd.f32 %v1658_v14, %v1641_v26  ;;  %v1663_v33 = vadd.f32 %v1659_v15, %v1642_v27  ;;  %v3752_v56 = vld [vmem:[%s6074_s5 + $0xf8] sm:$0xff]  ;;  %v3758_v24 = vld [vmem:[%s6074_s5 + $0x108] sm:$0xff] }
 0x48d   : > { %v1865_v2 = vcombine.low %v3752_v56, %v3752_v56  ;;  %v1922_v3 = vcombine.high %v3755_v58, %v3755_v58 }
 0x48e   : > { %v1679_v36 = vrot.slane %v1675_v21, 4  ;;  %v1680_v22 = vrot.slane %v1676_v19, 4  ;;  %v1964_v19 = vcombine.high %v3757_v12, %v3757_v12 }
 0x490   : > { %v1683_v28 = vadd.f32 %v1679_v36, %v1662_v32  ;;  %v1684_v37 = vadd.f32 %v1680_v22, %v1663_v33 }
 0x492   : > { %v1690_v38 = vadd.f32 %v1688_v20, %v1683_v28  ;;  %v5251_v39 = vadd.f32 %v3733_v17, %v1684_v37 }
 0x494   : > { %v1703_v40 = vrot.slane %v1690_v38, 4  ;;  %v1704_v43 = vrot.slane %v5251_v39, 4  ;;  %v1867_v16 = vmul.f32 %v1865_v2, %v1690_v38  ;;  %v1868_v26 = vmul.f32 %v3752_v56, %v5251_v39  ;;  %v3759_v39 = vld [vmem:[%s6074_s5 + $0x110] sm:$0xff] }
 0x495   : > { %v1985_v38 = vcombine.high %v3758_v24, %v3758_v24 }
 0x496   : > { %1873 = vrot.lane.b32.xlu1 %v1704_v43, %s4492_s23  ;;  %3888 = vmatprep.subr.msk.mxu1 %vm893_vm9, %v1704_v43 }
 0x497   : > { %1871 = vrot.lane.b32.xlu0 %v1703_v40, %s4492_s23  ;;  %3742 = vmatprep.subr.msk.mxu0 %vm893_vm9, %v1704_v43 }
 0x498   : > { %3743 = vmatpush1.msk.msra.mxu0 %vm893_vm9, %v1703_v40  ;;  %3889 = vmatpush1.msk.msra.mxu1 %vm893_vm9, %v1703_v40 }
 0x499   : > { %3751 = vmatmul.mubr.msk.f32.vlgmr.msra.gmra.mrb[4].mxu1 %vm868_vm10, %v3741_v29 }
 0x49a   : > { %1894 = vrot.lane.b32.xlu1 %v1704_v43, %s4491_s15  ;;  %2151 = vmatprep.mubr.f32.mxu1 %v4489_v0 }
 0x49b   : > { %1892 = vrot.lane.b32.xlu0 %v1703_v40, %s4491_s15 }
 0x49e   : > { %1915 = vrot.lane.b32.xlu1 %v1704_v43, %s4493_s22 }
 0x49f   : > { %1913 = vrot.lane.b32.xlu0 %v1703_v40, %s4493_s22 }
 0x4a2   : > { %1936 = vrot.lane.b32.xlu1 %v1704_v43, %s4494_s30 }
 0x4a3   : > { %1934 = vrot.lane.b32.xlu0 %v1703_v40, %s4494_s30 }
 0x4a6   : > { %1957 = vrot.lane.b32.xlu1 %v1704_v43, %s4495_s25 }
 0x4a7   : > { %1955 = vrot.lane.b32.xlu0 %v1703_v40, %s4495_s25 }
 0x4aa   : > { %1978 = vrot.lane.b32.xlu1 %v1704_v43, %s4496_s2 }
 0x4ab   : > { %1976 = vrot.lane.b32.xlu0 %v1703_v40, %s4496_s2 }
 0x4ae   : > { %1999 = vrot.lane.b32.xlu1 %v1704_v43, %s4497_s20 }
 0x4af   : > { %1997 = vrot.lane.b32.xlu0 %v1703_v40, %s4497_s20 }
 0x4b2   : > { %2020 = vrot.lane.b32.xlu1 %v1704_v43, %s6119_s19 }
 0x4b3   : > { %2018 = vrot.lane.b32.xlu0 %v1703_v40, %s6119_s19 }
 0x508   : > { %v1874_v44 = vpop.permute.xlu1 %1873 }
 0x509   : > { %v1872_v45 = vpop.permute.xlu0 %1871 }
 0x50a   : > { %v1875_v53 = vsel %vm678_vm3, %v1872_v45, %v1874_v44  ;;  %v1876_v54 = vsel %vm678_vm3, %v1874_v44, %v1872_v45 }
 0x50b   : > { %v1882_v62 = vmul.f32 %v3753_v47, %v1876_v54  ;;  %v1883_v63 = vmul.f32 %v1880_v52, %v1875_v53 }
 0x50c   : > { %v1895_v49 = vpop.permute.xlu1 %1894 }
 0x50d   : > { %v1893_v50 = vpop.permute.xlu0 %1892  ;;  %v1886_v11 = vrot.slane %v1882_v62, 4  ;;  %v1887_v13 = vrot.slane %v1883_v63, 4 }
 0x50e   : > { %v1896_v61 = vsel %vm699_vm1, %v1893_v50, %v1895_v49  ;;  %v1897_v60 = vsel %vm699_vm1, %v1895_v49, %v1893_v50 }
 0x50f   : > { %v1903_v5 = vmul.f32 %v3754_v51, %v1897_v60  ;;  %v1904_v6 = vmul.f32 %v1901_v57, %v1896_v61  ;;  %v1890_v28 = vadd.f32 %v1886_v11, %v1867_v16  ;;  %v1891_v37 = vadd.f32 %v1887_v13, %v1868_v26  ;;  %v3761_v16 = vld [vmem:[%s6075_s6 + $0x18] sm:$0xff] }
 0x510   : > { %v1916_v55 = vpop.permute.xlu1 %1915 }
 0x511   : > { %v1914_v59 = vpop.permute.xlu0 %1913  ;;  %v1907_v27 = vrot.slane %v1903_v5, 4  ;;  %v1908_v21 = vrot.slane %v1904_v6, 4 }
 0x512   : > { %v1917_v7 = vsel %vm721_vm2, %v1914_v59, %v1916_v55  ;;  %v1918_v8 = vsel %vm721_vm2, %v1916_v55, %v1914_v59  ;;  %v3760_v55 = vld [vmem:[%s6074_s5 + $0x118] sm:$0xff] }
 0x513   : > { %v1924_v17 = vmul.f32 %v3755_v58, %v1918_v8  ;;  %v1925_v18 = vmul.f32 %v1922_v3, %v1917_v7  ;;  %v1911_v44 = vadd.f32 %v1907_v27, %v1890_v28  ;;  %v1912_v45 = vadd.f32 %v1908_v21, %v1891_v37 }
 0x514   : > { %v1937_v4 = vpop.permute.xlu1 %1936  ;;  %v2006_v58 = vcombine.high %v3759_v39, %v3759_v39  ;;  %v2027_v2 = vcombine.high %v3760_v55, %v3760_v55 }
 0x515   : > { %v1935_v9 = vpop.permute.xlu0 %1934  ;;  %v1928_v40 = vrot.slane %v1924_v17, 4  ;;  %v1929_v43 = vrot.slane %v1925_v18, 4 }
 0x516   : > { %v1938_v14 = vsel %vm743_vm4, %v1935_v9, %v1937_v4  ;;  %v1939_v15 = vsel %vm743_vm4, %v1937_v4, %v1935_v9 }
 0x517   : > { %v1945_v32 = vmul.f32 %v3756_v1, %v1939_v15  ;;  %v1946_v33 = vmul.f32 %v1943_v10, %v1938_v14  ;;  %v1932_v59 = vadd.f32 %v1928_v40, %v1911_v44  ;;  %v1933_v61 = vadd.f32 %v1929_v43, %v1912_v45  ;;  %v3781_v45 = vld [vmem:[%s6074_s5 + $0x120] sm:$0xff] }
 0x518   : > { %v1958_v23 = vpop.permute.xlu1 %1957 }
 0x519   : > { %v1956_v20 = vpop.permute.xlu0 %1955  ;;  %v1949_v51 = vrot.slane %v1945_v32, 4  ;;  %v1950_v52 = vrot.slane %v1946_v33, 4 }
 0x51a   : > { %v1959_v36 = vsel %vm765_vm5, %v1956_v20, %v1958_v23  ;;  %v1960_v22 = vsel %vm765_vm5, %v1958_v23, %v1956_v20 }
 0x51b   : > { %v1966_v47 = vmul.f32 %v3757_v12, %v1959_v36  ;;  %v1967_v49 = vmul.f32 %v1964_v19, %v1960_v22  ;;  %v1953_v3 = vadd.f32 %v1949_v51, %v1932_v59  ;;  %v1954_v4 = vadd.f32 %v1950_v52, %v1933_v61 }
 0x51c   : > { %v1979_v29 = vpop.permute.xlu1 %1978  ;;  %v2042_v19 = vcombine.low %v3761_v16, %v3761_v16  ;;  %v2234_v51 = vcombine.high %v3781_v45, %v3781_v45 }
 0x51d   : > { %v1977_v50 = vpop.permute.xlu0 %1976  ;;  %v1970_v62 = vrot.slane %v1966_v47, 4  ;;  %v1971_v63 = vrot.slane %v1967_v49, 4 }
 0x51e   : > { %v1980_v53 = vsel %vm787_vm6, %v1977_v50, %v1979_v29  ;;  %v1981_v54 = vsel %vm787_vm6, %v1979_v29, %v1977_v50  ;;  %v3762_v29 = vld [vmem:[%s6076_s7 + $0x100] sm:$0xff]  ;;  %v3782_v50 = vld [vmem:[%s6074_s5 + $0x128] sm:$0xff] }
 0x51f   : > { %v1987_v56 = vmul.f32 %v3758_v24, %v1980_v53  ;;  %v1988_v57 = vmul.f32 %v1985_v38, %v1981_v54  ;;  %v1974_v11 = vadd.f32 %v1970_v62, %v1953_v3  ;;  %v1975_v13 = vadd.f32 %v1971_v63, %v1954_v4  ;;  %v3780_v54 = vld [vmem:[%s6074_s5 + $0x140] sm:$0xff]  ;;  %v3784_v63 = vld [vmem:[%s6074_s5 + $0x138] sm:$0xff] }
 0x520   : > { %v2000_v60 = vpop.permute.xlu1 %1999 }
 0x521   : > { %v1998_v1 = vpop.permute.xlu0 %1997  ;;  %v1991_v7 = vrot.slane %v1987_v56, 4  ;;  %v1992_v8 = vrot.slane %v1988_v57, 4  ;;  %v3783_v57 = vld [vmem:[%s6074_s5 + $0x130] sm:$0xff] }
 0x522   : > { %v2001_v5 = vsel %vm809_vm7, %v1998_v1, %v2000_v60  ;;  %v2002_v6 = vsel %vm809_vm7, %v2000_v60, %v1998_v1  ;;  %v2219_v1 = vcombine.low %v3780_v54, %v3780_v54 }
 0x523   : > { %v2008_v9 = vmul.f32 %v3759_v39, %v2001_v5  ;;  %v2009_v10 = vmul.f32 %v2006_v58, %v2002_v6  ;;  %v1995_v24 = vadd.f32 %v1991_v7, %v1974_v11  ;;  %v1996_v26 = vadd.f32 %v1992_v8, %v1975_v13 }
 0x524   : > { %v2021_v12 = vpop.permute.xlu1 %2020 }
 0x525   : > { %v2012_v14 = vrot.slane %v2008_v9, 4  ;;  %v2013_v15 = vrot.slane %v2009_v10, 4  ;;  %v2019_v17 = vpop.permute.xlu0 %2018  ;;  %v2297_v9 = vcombine.high %v3784_v63, %v3784_v63  ;;  %v3785_v10 = vld [vmem:[%s6074_s5 + $0x148] sm:$0xff] }
 0x526   : > { %v2022_v18 = vsel %vm831_vm8, %v2019_v17, %v2021_v12  ;;  %v2023_v23 = vsel %vm831_vm8, %v2021_v12, %v2019_v17 }
 0x527   : > { %v2029_v27 = vmul.f32 %v3760_v55, %v2022_v18  ;;  %v2030_v21 = vmul.f32 %v2027_v2, %v2023_v23  ;;  %v2016_v20 = vadd.f32 %v2012_v14, %v1995_v24  ;;  %v2017_v32 = vadd.f32 %v2013_v15, %v1996_v26  ;;  %v3786_v18 = vld [vmem:[%s6074_s5 + $0x150] sm:$0xff] }
 0x528   : > { %v2255_v55 = vcombine.high %v3782_v50, %v3782_v50  ;;  %v2276_v2 = vcombine.high %v3783_v57, %v3783_v57 }
 0x529   : > { %v2033_v33 = vrot.slane %v2029_v27, 4  ;;  %v2034_v36 = vrot.slane %v2030_v21, 4  ;;  %v2318_v21 = vcombine.high %v3785_v10, %v3785_v10 }
 0x52b   : > { %v2037_v22 = vadd.f32 %v2033_v33, %v2016_v20  ;;  %v2038_v28 = vadd.f32 %v2034_v36, %v2017_v32 }
 0x52d   : > { %v2044_v37 = vadd.f32 %v2042_v19, %v2037_v22  ;;  %v2045_v38 = vadd.f32 %v3761_v16, %v2038_v28 }
 0x52f   : > { %v2057_v40 = vrot.slane %v2044_v37, 4  ;;  %v2058_v43 = vrot.slane %v2045_v38, 4  ;;  %v2221_v15 = vmul.f32 %v2219_v1, %v2044_v37  ;;  %v2222_v23 = vmul.f32 %v3780_v54, %v2045_v38  ;;  %v3787_v38 = vld [vmem:[%s6074_s5 + $0x158] sm:$0xff]  ;;  %v3788_v54 = vld [vmem:[%s6074_s5 + $0x160] sm:$0xff] }
 0x530   : > { %v2339_v37 = vcombine.high %v3786_v18, %v3786_v18  ;;  %v2381_v1 = vcombine.high %v3788_v54, %v3788_v54 }
 0x531   : > { %2227 = vrot.lane.b32.xlu1 %v2058_v43, %s4492_s23  ;;  %2225 = vrot.lane.b32.xlu0 %v2057_v40, %s4492_s23 }
 0x532   : > { %3770 = vmatprep.subr.msk.mxu1 %vm893_vm9, %v2058_v43 }
 0x533   : > { %3771 = vmatpush1.msk.msra.mxu1 %vm893_vm9, %v2057_v40 }
 0x534   : > { %3772 = vmatmul.mubr.msk.f32.vlgmr.msra.gmra.mrb[6].mxu1 %vm868_vm10, %v3762_v29 }
 0x535   : > { %2248 = vrot.lane.b32.xlu1 %v2058_v43, %s4491_s15  ;;  %2246 = vrot.lane.b32.xlu0 %v2057_v40, %s4491_s15 }
 0x536   : > { %2157 = vmatprep.mubr.f32.mxu1 %v4489_v0 }
 0x539   : > { %2269 = vrot.lane.b32.xlu1 %v2058_v43, %s4493_s22  ;;  %2267 = vrot.lane.b32.xlu0 %v2057_v40, %s4493_s22 }
 0x53d   : > { %2290 = vrot.lane.b32.xlu1 %v2058_v43, %s4494_s30  ;;  %2288 = vrot.lane.b32.xlu0 %v2057_v40, %s4494_s30 }
 0x541   : > { %2311 = vrot.lane.b32.xlu1 %v2058_v43, %s4495_s25  ;;  %2309 = vrot.lane.b32.xlu0 %v2057_v40, %s4495_s25 }
 0x545   : > { %2332 = vrot.lane.b32.xlu1 %v2058_v43, %s4496_s2  ;;  %2330 = vrot.lane.b32.xlu0 %v2057_v40, %s4496_s2 }
 0x549   : > { %2353 = vrot.lane.b32.xlu1 %v2058_v43, %s4497_s20  ;;  %2351 = vrot.lane.b32.xlu0 %v2057_v40, %s4497_s20 }
 0x54d   : > { %2374 = vrot.lane.b32.xlu1 %v2058_v43, %s6119_s19  ;;  %2372 = vrot.lane.b32.xlu0 %v2057_v40, %s6119_s19 }
 0x5a3   : > { %v2228_v39 = vpop.permute.xlu1 %2227  ;;  %v2226_v44 = vpop.permute.xlu0 %2225 }
 0x5a4   : > { %v2229_v52 = vsel %vm678_vm3, %v2226_v44, %v2228_v39  ;;  %v2230_v53 = vsel %vm678_vm3, %v2228_v39, %v2226_v44 }
 0x5a5   : > { %v2236_v60 = vmul.f32 %v3781_v45, %v2230_v53  ;;  %v2237_v62 = vmul.f32 %v2234_v51, %v2229_v52 }
 0x5a7   : > { %v2249_v47 = vpop.permute.xlu1 %2248  ;;  %v2247_v49 = vpop.permute.xlu0 %2246  ;;  %v2240_v12 = vrot.slane %v2236_v60, 4  ;;  %v2241_v11 = vrot.slane %v2237_v62, 4 }
 0x5a8   : > { %v2250_v59 = vsel %vm699_vm1, %v2247_v49, %v2249_v47  ;;  %v2251_v61 = vsel %vm699_vm1, %v2249_v47, %v2247_v49 }
 0x5a9   : > { %v2257_v3 = vmul.f32 %v3782_v50, %v2251_v61  ;;  %v2258_v4 = vmul.f32 %v2255_v55, %v2250_v59  ;;  %v2244_v22 = vadd.f32 %v2240_v12, %v2221_v15  ;;  %v2245_v28 = vadd.f32 %v2241_v11, %v2222_v23  ;;  %v3789_v15 = vld [vmem:[%s6075_s6 + $0x20] sm:$0xff] }
 0x5ab   : > { %v2270_v56 = vpop.permute.xlu1 %2269  ;;  %v2268_v58 = vpop.permute.xlu0 %2267  ;;  %v2261_v24 = vrot.slane %v2257_v3, 4  ;;  %v2262_v26 = vrot.slane %v2258_v4, 4 }
 0x5ac   : > { %v2271_v5 = vsel %vm721_vm2, %v2268_v58, %v2270_v56  ;;  %v2272_v6 = vsel %vm721_vm2, %v2270_v56, %v2268_v58 }
 0x5ad   : > { %v2278_v16 = vmul.f32 %v3783_v57, %v2272_v6  ;;  %v2279_v17 = vmul.f32 %v2276_v2, %v2271_v5  ;;  %v2265_v29 = vadd.f32 %v2261_v24, %v2244_v22  ;;  %v2266_v39 = vadd.f32 %v2262_v26, %v2245_v28 }
 0x5ae   : > { %v2360_v57 = vcombine.high %v3787_v38, %v3787_v38 }
 0x5af   : > { %v2291_v7 = vpop.permute.xlu1 %2290  ;;  %v2289_v8 = vpop.permute.xlu0 %2288  ;;  %v2282_v40 = vrot.slane %v2278_v16, 4  ;;  %v2283_v43 = vrot.slane %v2279_v17, 4 }
 0x5b0   : > { %v2292_v13 = vsel %vm743_vm4, %v2289_v8, %v2291_v7  ;;  %v2293_v14 = vsel %vm743_vm4, %v2291_v7, %v2289_v8 }
 0x5b1   : > { %v2299_v20 = vmul.f32 %v3784_v63, %v2293_v14  ;;  %v2300_v32 = vmul.f32 %v2297_v9, %v2292_v13  ;;  %v2286_v58 = vadd.f32 %v2282_v40, %v2265_v29  ;;  %v2287_v59 = vadd.f32 %v2283_v43, %v2266_v39  ;;  %v3764_v29 = vld [vmem:[%s6076_s7 + $0x110] sm:$0xff]  ;;  %v3765_v39 = vld [vmem:[%s6076_s7 + $0x118] sm:$0xff] }
 0x5b3   : > { %v2312_v27 = vpop.permute.xlu1 %2311  ;;  %v2310_v19 = vpop.permute.xlu0 %2309  ;;  %v2303_v50 = vrot.slane %v2299_v20, 4  ;;  %v2304_v51 = vrot.slane %v2300_v32, 4 }
 0x5b4   : > { %v2313_v33 = vsel %vm765_vm5, %v2310_v19, %v2312_v27  ;;  %v2314_v36 = vsel %vm765_vm5, %v2312_v27, %v2310_v19 }
 0x5b5   : > { %v2320_v44 = vmul.f32 %v3785_v10, %v2313_v33  ;;  %v2321_v45 = vmul.f32 %v2318_v21, %v2314_v36  ;;  %v2307_v2 = vadd.f32 %v2303_v50, %v2286_v58  ;;  %v2308_v3 = vadd.f32 %v2304_v51, %v2287_v59  ;;  %v3790_v50 = vld [vmem:[%s6076_s7 + $0x140] sm:$0xff]  ;;  %v3707_v51 = vld [vmem:[%s6076_s7 + $0x88] sm:$0xff] }
 0x5b6   : > { %v2396_v21 = vcombine.low %v3789_v15, %v3789_v15  ;;  %3717 = vmatmul.mubr.msk.f32.gmra.mrb[10].mxu0 %vm868_vm10, %v3707_v51  ;;  %v3794_v58 = vld [vmem:[%s6076_s7 + $0x160] sm:$0xff]  ;;  %v3711_v59 = vld [vmem:[%s6076_s7 + $0xa8] sm:$0xff] }
 0x5b7   : > { %v2333_v47 = vpop.permute.xlu1 %2332  ;;  %v2331_v49 = vpop.permute.xlu0 %2330  ;;  %v2324_v61 = vrot.slane %v2320_v44, 4  ;;  %v2325_v60 = vrot.slane %v2321_v45, 4  ;;  %v3766_v44 = vld [vmem:[%s6076_s7 + $0x120] sm:$0xff]  ;;  %v3767_v45 = vld [vmem:[%s6076_s7 + $0x128] sm:$0xff]  ;;  %1455 = vmatprep.mubr.f32.mxu0 %v4489_v0 }
 0x5b8   : > { %v2334_v52 = vsel %vm787_vm6, %v2331_v49, %v2333_v47  ;;  %v2335_v53 = vsel %vm787_vm6, %v2333_v47, %v2331_v49  ;;  %v3768_v47 = vld [vmem:[%s6076_s7 + $0x130] sm:$0xff]  ;;  %v3769_v49 = vld [vmem:[%s6076_s7 + $0x138] sm:$0xff] }
 0x5b9   : > { %v2341_v55 = vmul.f32 %v3786_v18, %v2334_v52  ;;  %v2342_v56 = vmul.f32 %v2339_v37, %v2335_v53  ;;  %v2328_v10 = vadd.f32 %v2324_v61, %v2307_v2  ;;  %v2329_v12 = vadd.f32 %v2325_v60, %v2308_v3  ;;  %v3708_v52 = vld [vmem:[%s6076_s7 + $0x90] sm:$0xff]  ;;  %v3791_v53 = vld [vmem:[%s6076_s7 + $0x148] sm:$0xff]  ;;  %v3737_v3 = vld [vmem:[%s6076_s7 + $0xd8] sm:$0xff] }
 0x5ba   : > { %3718 = vmatmul.mubr.msk.f32.gmra.mrb[12].mxu0 %vm868_vm10, %v3708_v52  ;;  %v3795_v61 = vld [vmem:[%s6076_s7 + $0x168] sm:$0xff]  ;;  %v3712_v60 = vld [vmem:[%s6076_s7 + $0xb0] sm:$0xff] }
 0x5bb   : > { %v2354_v62 = vpop.permute.xlu1 %2353  ;;  %v2352_v63 = vpop.permute.xlu0 %2351  ;;  %v2345_v6 = vrot.slane %v2341_v55, 4  ;;  %v2346_v7 = vrot.slane %v2342_v56, 4  ;;  %1461 = vmatprep.mubr.f32.mxu0 %v4489_v0  ;;  %v3709_v55 = vld [vmem:[%s6076_s7 + $0x98] sm:$0xff]  ;;  %v3736_v2 = vld [vmem:[%s6076_s7 + $0xd0] sm:$0xff] }
 0x5bc   : > { %v2355_v4 = vsel %vm809_vm7, %v2352_v63, %v2354_v62  ;;  %v2356_v5 = vsel %vm809_vm7, %v2354_v62, %v2352_v63  ;;  %v3793_v56 = vld [vmem:[%s6076_s7 + $0x158] sm:$0xff]  ;;  %v3734_v63 = vld [vmem:[%s6076_s7 + $0xc0] sm:$0xff] }
 0x5bd   : > { %v2362_v8 = vmul.f32 %v3787_v38, %v2355_v4  ;;  %v2363_v9 = vmul.f32 %v2360_v57, %v2356_v5  ;;  %v2349_v23 = vadd.f32 %v2345_v6, %v2328_v10  ;;  %v2350_v24 = vadd.f32 %v2346_v7, %v2329_v12  ;;  %v3763_v38 = vld [vmem:[%s6076_s7 + $0x108] sm:$0xff]  ;;  %v3710_v57 = vld [vmem:[%s6076_s7 + $0xa0] sm:$0xff]  ;;  %v3713_v62 = vld [vmem:[%s6076_s7 + $0xb8] sm:$0xff] }
 0x5be   : > { %3773 = vmatmul.mubr.msk.f32.gmra.mrb[8].mxu1 %vm868_vm10, %v3763_v38  ;;  %3719 = vmatmul.mubr.msk.f32.gmra.mrb[14].mxu0 %vm868_vm10, %v3709_v55  ;;  %v3738_v4 = vld [vmem:[%s6076_s7 + $0xe0] sm:$0xff]  ;;  %v3739_v5 = vld [vmem:[%s6076_s7 + $0xe8] sm:$0xff]  ;;  %v3740_v6 = vld [vmem:[%s6076_s7 + $0xf0] sm:$0xff] }
 0x5bf   : > { %v2366_v11 = vrot.slane %v2362_v8, 4  ;;  %v2367_v13 = vrot.slane %v2363_v9, 4  ;;  %v2375_v14 = vpop.permute.xlu1 %2374  ;;  %v2373_v16 = vpop.permute.xlu0 %2372  ;;  %2163 = vmatprep.mubr.f32.mxu1 %v4489_v0  ;;  %1467 = vmatprep.mubr.f32.mxu0 %v4489_v0  ;;  %v3809_v9 = vld [vmem:[%s6074_s5 + $0x168] sm:$0xff] }
 0x5c0   : > { %v2376_v17 = vsel %vm831_vm8, %v2373_v16, %v2375_v14  ;;  %v2377_v18 = vsel %vm831_vm8, %v2375_v14, %v2373_v16  ;;  %v3808_v16 = vld [vmem:[%s6074_s5 + $0x188] sm:$0xff] }
 0x5c1   : > { %v2383_v26 = vmul.f32 %v3788_v54, %v2376_v17  ;;  %v2384_v27 = vmul.f32 %v2381_v1, %v2377_v18  ;;  %v2370_v19 = vadd.f32 %v2366_v11, %v2349_v23  ;;  %v2371_v20 = vadd.f32 %v2367_v13, %v2350_v24  ;;  %v3792_v54 = vld [vmem:[%s6076_s7 + $0x150] sm:$0xff]  ;;  %v3735_v1 = vld [vmem:[%s6076_s7 + $0xc8] sm:$0xff]  ;;  %v3811_v23 = vld [vmem:[%s6074_s5 + $0x178] sm:$0xff] }
 0x5c2   : > { %3774 = vmatmul.mubr.msk.f32.gmra.mrb[10].mxu1 %vm868_vm10, %v3764_v29  ;;  %3720 = vmatmul.mubr.msk.f32.gmra.mrb[16].mxu0 %vm868_vm10, %v3710_v57  ;;  %v3810_v11 = vld [vmem:[%s6074_s5 + $0x170] sm:$0xff]  ;;  %v2588_v13 = vcombine.high %v3809_v9, %v3809_v9 }
 0x5c3   : > { %v2387_v32 = vrot.slane %v2383_v26, 4  ;;  %v2388_v33 = vrot.slane %v2384_v27, 4  ;;  %2169 = vmatprep.mubr.f32.mxu1 %v4489_v0  ;;  %1473 = vmatprep.mubr.f32.mxu0 %v4489_v0  ;;  %v2609_v17 = vcombine.high %v3810_v11, %v3810_v11 }
 0x5c5   : > { %v2391_v36 = vadd.f32 %v2387_v32, %v2370_v19  ;;  %v2392_v22 = vadd.f32 %v2388_v33, %v2371_v20  ;;  %v3812_v20 = vld [vmem:[%s6074_s5 + $0x180] sm:$0xff]  ;;  %v2573_v32 = vcombine.low %v3808_v16, %v3808_v16  ;;  %v2630_v33 = vcombine.high %v3811_v23, %v3811_v23 }
 0x5c6   : > { %3775 = vmatmul.mubr.msk.f32.gmra.mrb[12].mxu1 %vm868_vm10, %v3765_v39  ;;  %3721 = vmatmul.mubr.msk.f32.gmra.mrb[18].mxu0 %vm868_vm10, %v3711_v59  ;;  %v2651_v39 = vcombine.high %v3812_v20, %v3812_v20 }
 0x5c7   : > { %v5427_v28 = vadd.f32 %v2396_v21, %v2391_v36  ;;  %v5429_v37 = vadd.f32 %v3789_v15, %v2392_v22  ;;  %2175 = vmatprep.mubr.f32.mxu1 %v4489_v0  ;;  %1479 = vmatprep.mubr.f32.mxu0 %v4489_v0 }
 0x5c9   : > { %v2411_v40 = vrot.slane %v5427_v28, 4  ;;  %v2412_v43 = vrot.slane %v5429_v37, 4  ;;  %v2575_v51 = vmul.f32 %v2573_v32, %v5427_v28  ;;  %v2576_v55 = vmul.f32 %v3808_v16, %v5429_v37  ;;  %v3815_v37 = vld [vmem:[%s6074_s5 + $0x1a0] sm:$0xff]  ;;  %v3816_v16 = vld [vmem:[%s6074_s5 + $0x1a8] sm:$0xff] }
 0x5ca   : > { %3776 = vmatmul.mubr.msk.f32.gmra.mrb[14].mxu1 %vm868_vm10, %v3766_v44  ;;  %3722 = vmatmul.mubr.msk.f32.gmra.mrb[20].mxu0 %vm868_vm10, %v3712_v60  ;;  %v3813_v44 = vld [vmem:[%s6074_s5 + $0x190] sm:$0xff]  ;;  %v2735_v32 = vcombine.high %v3816_v16, %v3816_v16 }
 0x5cb   : > { %2581 = vrot.lane.b32.xlu1 %v2412_v43, %s4492_s23  ;;  %2579 = vrot.lane.b32.xlu0 %v2411_v40, %s4492_s23  ;;  %v2672_v59 = vcombine.high %v3813_v44, %v3813_v44 }
 0x5cc   : > { %3798 = vmatprep.subr.msk.mxu1 %vm893_vm9, %v2412_v43  ;;  %2181 = vmatprep.mubr.f32.mxu1 %v4489_v0 }
 0x5cd   : > { %3799 = vmatpush1.msk.msra.mxu1 %vm893_vm9, %v2411_v40  ;;  %1485 = vmatprep.mubr.f32.mxu0 %v4489_v0 }
 0x5ce   : > { %3777 = vmatmul.mubr.msk.f32.gmra.mrb[16].mxu1 %vm868_vm10, %v3767_v45  ;;  %3723 = vmatmul.mubr.msk.f32.gmra.mrb[22].mxu0 %vm868_vm10, %v3713_v62 }
 0x5cf   : > { %2602 = vrot.lane.b32.xlu1 %v2412_v43, %s4491_s15  ;;  %2600 = vrot.lane.b32.xlu0 %v2411_v40, %s4491_s15 }
 0x5d0   : > { %2187 = vmatprep.mubr.f32.mxu1 %v4489_v0  ;;  %1797 = vmatprep.mubr.f32.mxu0 %v4489_v0 }
 0x5d2   : > { %3778 = vmatmul.mubr.msk.f32.gmra.mrb[18].mxu1 %vm868_vm10, %v3768_v47  ;;  %3744 = vmatmul.mubr.msk.f32.vlgmr.msra.gmra.mrb[8].mxu0 %vm868_vm10, %v3734_v63 }
 0x5d3   : > { %2623 = vrot.lane.b32.xlu1 %v2412_v43, %s4493_s22  ;;  %2621 = vrot.lane.b32.xlu0 %v2411_v40, %s4493_s22 }
 0x5d4   : > { %2193 = vmatprep.mubr.f32.mxu1 %v4489_v0  ;;  %1803 = vmatprep.mubr.f32.mxu0 %v4489_v0 }
 0x5d6   : > { %3779 = vmatmul.mubr.msk.f32.gmra.mrb[4].mxu1 %vm868_vm10, %v3769_v49  ;;  %3745 = vmatmul.mubr.msk.f32.gmra.mrb[10].mxu0 %vm868_vm10, %v3735_v1 }
 0x5d7   : > { %2644 = vrot.lane.b32.xlu1 %v2412_v43, %s4494_s30  ;;  %2642 = vrot.lane.b32.xlu0 %v2411_v40, %s4494_s30 }
 0x5d8   : > { %2505 = vmatprep.mubr.f32.mxu1 %v4489_v0  ;;  %1809 = vmatprep.mubr.f32.mxu0 %v4489_v0 }
 0x5da   : > { %3800 = vmatmul.mubr.msk.f32.vlgmr.msra.gmra.mrb[6].mxu1 %vm868_vm10, %v3790_v50  ;;  %3746 = vmatmul.mubr.msk.f32.gmra.mrb[12].mxu0 %vm868_vm10, %v3736_v2 }
 0x5db   : > { %2665 = vrot.lane.b32.xlu1 %v2412_v43, %s4495_s25  ;;  %2663 = vrot.lane.b32.xlu0 %v2411_v40, %s4495_s25 }
 0x5dc   : > { %2511 = vmatprep.mubr.f32.mxu1 %v4489_v0  ;;  %1815 = vmatprep.mubr.f32.mxu0 %v4489_v0 }
 0x5de   : > { %3801 = vmatmul.mubr.msk.f32.gmra.mrb[8].mxu1 %vm868_vm10, %v3791_v53  ;;  %3747 = vmatmul.mubr.msk.f32.gmra.mrb[14].mxu0 %vm868_vm10, %v3737_v3 }
 0x5df   : > { %2686 = vrot.lane.b32.xlu1 %v2412_v43, %s4496_s2  ;;  %2684 = vrot.lane.b32.xlu0 %v2411_v40, %s4496_s2 }
 0x5e0   : > { %2517 = vmatprep.mubr.f32.mxu1 %v4489_v0  ;;  %1821 = vmatprep.mubr.f32.mxu0 %v4489_v0 }
 0x5e2   : > { %3802 = vmatmul.mubr.msk.f32.gmra.mrb[10].mxu1 %vm868_vm10, %v3792_v54  ;;  %3748 = vmatmul.mubr.msk.f32.gmra.mrb[16].mxu0 %vm868_vm10, %v3738_v4  ;;  %v3814_v54 = vld [vmem:[%s6074_s5 + $0x198] sm:$0xff] }
 0x5e3   : > { %2707 = vrot.lane.b32.xlu1 %v2412_v43, %s4497_s20  ;;  %2705 = vrot.lane.b32.xlu0 %v2411_v40, %s4497_s20  ;;  %v2693_v3 = vcombine.high %v3814_v54, %v3814_v54 }
 0x5e4   : > { %2523 = vmatprep.mubr.f32.mxu1 %v4489_v0  ;;  %1827 = vmatprep.mubr.f32.mxu0 %v4489_v0 }
 0x5e6   : > { %3803 = vmatmul.mubr.msk.f32.gmra.mrb[12].mxu1 %vm868_vm10, %v3793_v56  ;;  %3749 = vmatmul.mubr.msk.f32.gmra.mrb[18].mxu0 %vm868_vm10, %v3739_v5 }
 0x5e7   : > { %2728 = vrot.lane.b32.xlu1 %v2412_v43, %s6119_s19  ;;  %2726 = vrot.lane.b32.xlu0 %v2411_v40, %s6119_s19 }
 0x5e8   : > { %2529 = vmatprep.mubr.f32.mxu1 %v4489_v0  ;;  %1833 = vmatprep.mubr.f32.mxu0 %v4489_v0 }
 0x5ea   : > { %3804 = vmatmul.mubr.msk.f32.gmra.mrb[14].mxu1 %vm868_vm10, %v3794_v58  ;;  %3750 = vmatmul.mubr.msk.f32.gmra.mrb[20].mxu0 %vm868_vm10, %v3740_v6 }
 0x5eb   : > { %2535 = vmatprep.mubr.f32.mxu1 %v4489_v0 }
 0x5ee   : > { %3805 = vmatmul.mubr.msk.f32.gmra.mrb[16].mxu1 %vm868_vm10, %v3795_v61 }
 0x5ef   : > { %2541 = vmatprep.mubr.f32.mxu1 %v4489_v0 }
 0x63d   : > { %v2582_v7 = vpop.permute.xlu1 %2581  ;;  %v2580_v8 = vpop.permute.xlu0 %2579 }
 0x63e   : > { %v2583_v14 = vsel %vm678_vm3, %v2580_v8, %v2582_v7  ;;  %v2584_v15 = vsel %vm678_vm3, %v2582_v7, %v2580_v8 }
 0x63f   : > { %v2590_v21 = vmul.f32 %v3809_v9, %v2584_v15  ;;  %v2591_v19 = vmul.f32 %v2588_v13, %v2583_v14 }
 0x641   : > { %v2603_v10 = vpop.permute.xlu1 %2602  ;;  %v2601_v12 = vpop.permute.xlu0 %2600  ;;  %v2594_v45 = vrot.slane %v2590_v21, 4  ;;  %v2595_v47 = vrot.slane %v2591_v19, 4 }
 0x642   : > { %v2604_v26 = vsel %vm699_vm1, %v2601_v12, %v2603_v10  ;;  %v2605_v27 = vsel %vm699_vm1, %v2603_v10, %v2601_v12 }
 0x643   : > { %v2611_v36 = vmul.f32 %v3810_v11, %v2605_v27  ;;  %v2612_v22 = vmul.f32 %v2609_v17, %v2604_v26  ;;  %v2598_v1 = vadd.f32 %v2594_v45, %v2575_v51  ;;  %v2599_v2 = vadd.f32 %v2595_v47, %v2576_v55  ;;  %v3817_v51 = vld [vmem:[%s6075_s6 + $0x28] sm:$0xff] }
 0x645   : > { %v2624_v18 = vpop.permute.xlu1 %2623  ;;  %v2622_v24 = vpop.permute.xlu0 %2621  ;;  %v2615_v56 = vrot.slane %v2611_v36, 4  ;;  %v2616_v57 = vrot.slane %v2612_v22, 4 }
 0x646   : > { %v2625_v40 = vsel %vm721_vm2, %v2622_v24, %v2624_v18  ;;  %v2626_v43 = vsel %vm721_vm2, %v2624_v18, %v2622_v24 }
 0x647   : > { %v2632_v52 = vmul.f32 %v3811_v23, %v2626_v43  ;;  %v2633_v53 = vmul.f32 %v2630_v33, %v2625_v40  ;;  %v2619_v6 = vadd.f32 %v2615_v56, %v2598_v1  ;;  %v2620_v7 = vadd.f32 %v2616_v57, %v2599_v2  ;;  %v3797_v1 = vld [vmem:[%s6076_s7 + $0x178] sm:$0xff] }
 0x648   : > { %v2714_v23 = vcombine.high %v3815_v37, %v3815_v37 }
 0x649   : > { %v2645_v38 = vpop.permute.xlu1 %2644  ;;  %v2643_v29 = vpop.permute.xlu0 %2642  ;;  %v2636_v4 = vrot.slane %v2632_v52, 4  ;;  %v2637_v5 = vrot.slane %v2633_v53, 4  ;;  %v3796_v53 = vld [vmem:[%s6076_s7 + $0x170] sm:$0xff] }
 0x64a   : > { %v2646_v49 = vsel %vm743_vm4, %v2643_v29, %v2645_v38  ;;  %v2647_v50 = vsel %vm743_vm4, %v2645_v38, %v2643_v29  ;;  %3806 = vmatmul.mubr.msk.f32.gmra.mrb[18].mxu1 %vm868_vm10, %v3796_v53 }
 0x64b   : > { %v2653_v60 = vmul.f32 %v3812_v20, %v2647_v50  ;;  %v2654_v62 = vmul.f32 %v2651_v39, %v2646_v49  ;;  %v2640_v24 = vadd.f32 %v2636_v4, %v2619_v6  ;;  %v2641_v26 = vadd.f32 %v2637_v5, %v2620_v7  ;;  %2547 = vmatprep.mubr.f32.mxu1 %v4489_v0  ;;  %v3818_v7 = vld [vmem:[%s6076_s7 + $0x180] sm:$0xff] }
 0x64d   : > { %v2666_v58 = vpop.permute.xlu1 %2665  ;;  %v2664_v61 = vpop.permute.xlu0 %2663  ;;  %v2657_v11 = vrot.slane %v2653_v60, 4  ;;  %v2658_v13 = vrot.slane %v2654_v62, 4 }
 0x64e   : > { %v2667_v63 = vsel %vm765_vm5, %v2664_v61, %v2666_v58  ;;  %v2668_v28 = vsel %vm765_vm5, %v2666_v58, %v2664_v61  ;;  %v2750_v61 = vcombine.low %v3817_v51, %v3817_v51  ;;  %3807 = vmatmul.mubr.msk.f32.gmra.mrb[4].mxu1 %vm868_vm10, %v3797_v1 }
 0x64f   : > { %v2674_v8 = vmul.f32 %v3813_v44, %v2667_v63  ;;  %v2675_v9 = vmul.f32 %v2672_v59, %v2668_v28  ;;  %v2661_v33 = vadd.f32 %v2657_v11, %v2640_v24  ;;  %v2662_v36 = vadd.f32 %v2658_v13, %v2641_v26  ;;  %2859 = vmatprep.mubr.f32.mxu1 %v4489_v0  ;;  %v3823_v11 = vld [vmem:[%s6076_s7 + $0x1a8] sm:$0xff]  ;;  %v3824_v13 = vld [vmem:[%s6076_s7 + $0x1b0] sm:$0xff]  ;;  %v3838_v24 = vld [vmem:[%s6074_s5 + $0x1b8] sm:$0xff] }
 0x651   : > { %v2687_v10 = vpop.permute.xlu1 %2686  ;;  %v2685_v12 = vpop.permute.xlu0 %2684  ;;  %v2678_v27 = vrot.slane %v2674_v8, 4  ;;  %v2679_v21 = vrot.slane %v2675_v9, 4  ;;  %v3819_v8 = vld [vmem:[%s6076_s7 + $0x188] sm:$0xff]  ;;  %v3820_v9 = vld [vmem:[%s6076_s7 + $0x190] sm:$0xff] }
 0x652   : > { %v2688_v14 = vsel %vm787_vm6, %v2685_v12, %v2687_v10  ;;  %v2689_v15 = vsel %vm787_vm6, %v2687_v10, %v2685_v12  ;;  %v3821_v10 = vld [vmem:[%s6076_s7 + $0x198] sm:$0xff]  ;;  %v3822_v12 = vld [vmem:[%s6076_s7 + $0x1a0] sm:$0xff] }
 0x653   : > { %v2695_v17 = vmul.f32 %v3814_v54, %v2688_v14  ;;  %v2696_v18 = vmul.f32 %v2693_v3, %v2689_v15  ;;  %v2682_v44 = vadd.f32 %v2678_v27, %v2661_v33  ;;  %v2683_v45 = vadd.f32 %v2679_v21, %v2662_v36  ;;  %v3825_v14 = vld [vmem:[%s6076_s7 + $0x1b8] sm:$0xff]  ;;  %v3839_v33 = vld [vmem:[%s6074_s5 + $0x1c0] sm:$0xff] }
 0x655   : > { %v2708_v19 = vpop.permute.xlu1 %2707  ;;  %v2706_v20 = vpop.permute.xlu0 %2705  ;;  %v2699_v43 = vrot.slane %v2695_v17, 4  ;;  %v2700_v38 = vrot.slane %v2696_v18, 4  ;;  %v3837_v17 = vld [vmem:[%s6074_s5 + $0x1b0] sm:$0xff] }
 0x656   : > { %v2709_v22 = vsel %vm809_vm7, %v2706_v20, %v2708_v19  ;;  %v2710_v40 = vsel %vm809_vm7, %v2708_v19, %v2706_v20  ;;  %v2942_v26 = vcombine.high %v3837_v17, %v3837_v17  ;;  %v3836_v19 = vld [vmem:[%s6074_s5 + $0x1d0] sm:$0xff]  ;;  %v2963_v20 = vcombine.high %v3838_v24, %v3838_v24 }
 0x657   : > { %v2716_v29 = vmul.f32 %v3815_v37, %v2709_v22  ;;  %v2717_v39 = vmul.f32 %v2714_v23, %v2710_v40  ;;  %v2703_v56 = vadd.f32 %v2699_v43, %v2682_v44  ;;  %v2704_v57 = vadd.f32 %v2700_v38, %v2683_v45 }
 0x658   : > { %v2984_v44 = vcombine.high %v3839_v33, %v3839_v33 }
 0x659   : > { %v2720_v47 = vrot.slane %v2716_v29, 4  ;;  %v2721_v49 = vrot.slane %v2717_v39, 4  ;;  %v2729_v50 = vpop.permute.xlu1 %2728  ;;  %v2727_v52 = vpop.permute.xlu0 %2726  ;;  %v3840_v29 = vld [vmem:[%s6074_s5 + $0x1c8] sm:$0xff]  ;;  %v2927_v39 = vcombine.low %v3836_v19, %v3836_v19 }
 0x65a   : > { %v2730_v54 = vsel %vm831_vm8, %v2727_v52, %v2729_v50  ;;  %v2731_v55 = vsel %vm831_vm8, %v2729_v50, %v2727_v52  ;;  %v3005_v53 = vcombine.high %v3840_v29, %v3840_v29 }
 0x65b   : > { %v2737_v58 = vmul.f32 %v3816_v16, %v2730_v54  ;;  %v2738_v59 = vmul.f32 %v2735_v32, %v2731_v55  ;;  %v2724_v60 = vadd.f32 %v2720_v47, %v2703_v56  ;;  %v2725_v62 = vadd.f32 %v2721_v49, %v2704_v57  ;;  %v3841_v54 = vld [vmem:[%s6074_s5 + $0x1d8] sm:$0xff] }
 0x65d   : > { %v2741_v63 = vrot.slane %v2737_v58, 4  ;;  %v2742_v28 = vrot.slane %v2738_v59, 4 }
 0x65f   : > { %v2745_v2 = vadd.f32 %v2741_v63, %v2724_v60  ;;  %v2746_v3 = vadd.f32 %v2742_v28, %v2725_v62  ;;  %v3842_v62 = vld [vmem:[%s6074_s5 + $0x1e0] sm:$0xff] }
 0x661   : > { %v5659_v4 = vadd.f32 %v2750_v61, %v2745_v2  ;;  %v5661_v5 = vadd.f32 %v3817_v51, %v2746_v3  ;;  %v3026_v3 = vcombine.high %v3841_v54, %v3841_v54 }
 0x663   : > { %v2765_v37 = vrot.slane %v5659_v4, 4  ;;  %v2766_v6 = vrot.slane %v5661_v5, 4  ;;  %v2929_v59 = vmul.f32 %v2927_v39, %v5659_v4  ;;  %v2930_v63 = vmul.f32 %v3836_v19, %v5661_v5  ;;  %v3843_v5 = vld [vmem:[%s6074_s5 + $0x1e8] sm:$0xff]  ;;  %v3844_v19 = vld [vmem:[%s6074_s5 + $0x1f0] sm:$0xff] }
 0x665   : > { %2935 = vrot.lane.b32.xlu1 %v2766_v6, %s4492_s23  ;;  %2933 = vrot.lane.b32.xlu0 %v2765_v37, %s4492_s23  ;;  %s3654_s23 = sshll.u32 %s4812_s18, 7 }
 0x666   : > { %3826 = vmatprep.subr.msk.mxu1 %vm893_vm9, %v2766_v6  ;;  %s5942_s24 = scalar_lea.vmem [#allocation13], %s3654_s23 }
 0x667   : > { %3827 = vmatpush1.msk.msra.mxu1 %vm893_vm9, %v2765_v37  ;;  %s3500_s16 = sshll.u32 %s5942_s24, 4  ;;  %s6023_s16 = int_to_ptr.vmem [resolvable:$true] %s3500_s16 }
 0x668   : > { %3828 = vmatmul.mubr.msk.f32.vlgmr.msra.gmra.mrb[6].mxu1 %vm868_vm10, %v3818_v7  ;;  %s4395_s0 = scalar_lea.vmem %s6023_s16, 2048 }
 0x669   : > { %2956 = vrot.lane.b32.xlu1 %v2766_v6, %s4491_s15  ;;  %2954 = vrot.lane.b32.xlu0 %v2765_v37, %s4491_s15  ;;  %p4396_p0 = scmp.ne.s32.totalorder %s6023_s16, %s4395_s0 }
 0x66a   : > { %2865 = vmatprep.mubr.f32.mxu1 %v4489_v0 }
 0x66b   : > { %p4397_p6 = pnand %p4396_p0, %p4716_p10 }
 0x66c   : > { %3829 = vmatmul.mubr.msk.f32.gmra.mrb[8].mxu1 %vm868_vm10, %v3819_v8 }
 0x66d   : > { %2977 = vrot.lane.b32.xlu1 %v2766_v6, %s4493_s22  ;;  %2975 = vrot.lane.b32.xlu0 %v2765_v37, %s4493_s22  ;;  %p4398_p8 = pneg %p4397_p6 }
 0x66e   : > { %2871 = vmatprep.mubr.f32.mxu1 %v4489_v0 }
 0x670   : > { %3830 = vmatmul.mubr.msk.f32.gmra.mrb[10].mxu1 %vm868_vm10, %v3820_v9 }
 0x671   : > { %2998 = vrot.lane.b32.xlu1 %v2766_v6, %s4494_s30  ;;  %2996 = vrot.lane.b32.xlu0 %v2765_v37, %s4494_s30  ;;  %s6120_s30 = sld [smem:[#allocation26_spill]] }
 0x672   : > { %2877 = vmatprep.mubr.f32.mxu1 %v4489_v0 }
 0x674   : > { %3831 = vmatmul.mubr.msk.f32.gmra.mrb[12].mxu1 %vm868_vm10, %v3821_v10 }
 0x675   : > { %3019 = vrot.lane.b32.xlu1 %v2766_v6, %s4495_s25  ;;  %3017 = vrot.lane.b32.xlu0 %v2765_v37, %s4495_s25 }
 0x676   : > { %2883 = vmatprep.mubr.f32.mxu1 %v4489_v0 }
 0x677   : > { %s6121_s29 = smov %s6120_s30  ;;  %s6020_s25 = scalar_lea.hbm %s6120_s30, %s3871_s4 }
 0x678   : > { %3832 = vmatmul.mubr.msk.f32.gmra.mrb[14].mxu1 %vm868_vm10, %v3822_v12  ;;  %v3047_v12 = vcombine.high %v3842_v62, %v3842_v62 }
 0x679   : > { %3040 = vrot.lane.b32.xlu1 %v2766_v6, %s4496_s2  ;;  %3038 = vrot.lane.b32.xlu0 %v2765_v37, %s4496_s2  ;;  %s4499_s2 = smov [#allocation13]  }
 0x67a   : > { %2889 = vmatprep.mubr.f32.mxu1 %v4489_v0  ;;  %s4399_s3 = sshll.u32 %s4499_s2, 4  ;;  %s4400_s3 = int_to_ptr.vmem [resolvable:$false] %s4399_s3 }
 0x67b   : > { %p4402_p3 = scmp.lt.s32.totalorder %s6023_s16, %s4400_s3 }
 0x67c   : > { %3833 = vmatmul.mubr.msk.f32.gmra.mrb[16].mxu1 %vm868_vm10, %v3823_v11 }
 0x67d   : > { %3061 = vrot.lane.b32.xlu1 %v2766_v6, %s4497_s20  ;;  %3059 = vrot.lane.b32.xlu0 %v2765_v37, %s4497_s20  ;;  %s4401_s20 = scalar_lea.vmem %s4400_s3, 4096 }
 0x67e   : > { %2895 = vmatprep.mubr.f32.mxu1 %v4489_v0  ;;  %p4403_p5 = scmp.lt.s32.totalorder %s4401_s20, %s4395_s0 }
 0x680   : > { %3834 = vmatmul.mubr.msk.f32.gmra.mrb[18].mxu1 %vm868_vm10, %v3824_v13  ;;  %p4404_p9 = por %p4403_p5, %p4402_p3 }
 0x681   : > { %3082 = vrot.lane.b32.xlu1 %v2766_v6, %s6119_s19  ;;  %3080 = vrot.lane.b32.xlu0 %v2765_v37, %s6119_s19 }
 0x682   : > { %2901 = vmatprep.mubr.f32.mxu1 %v4489_v0  ;;  %p4405_p4 = pnand %p4404_p9, %p4398_p8 }
 0x684   : > { %3835 = vmatmul.mubr.msk.f32.gmra.mrb[4].mxu1 %vm868_vm10, %v3825_v14 }
 0x685   : > { %3213 = vmatprep.mubr.f32.mxu1 %v4489_v0 }
 0x6d7   : > { %v2936_v15 = vpop.permute.xlu1 %2935  ;;  %v2934_v16 = vpop.permute.xlu0 %2933 }
 0x6d8   : > { %v2937_v27 = vsel %vm678_vm3, %v2934_v16, %v2936_v15  ;;  %v2938_v21 = vsel %vm678_vm3, %v2936_v15, %v2934_v16 }
 0x6d9   : > { %v2944_v43 = vmul.f32 %v3837_v17, %v2938_v21  ;;  %v2945_v38 = vmul.f32 %v2942_v26, %v2937_v27 }
 0x6db   : > { %v2957_v18 = vpop.permute.xlu1 %2956  ;;  %v2955_v23 = vpop.permute.xlu0 %2954  ;;  %v2948_v55 = vrot.slane %v2944_v43, 4  ;;  %v2949_v56 = vrot.slane %v2945_v38, 4 }
 0x6dc   : > { %v2958_v22 = vsel %vm699_vm1, %v2955_v23, %v2957_v18  ;;  %v2959_v40 = vsel %vm699_vm1, %v2957_v18, %v2955_v23 }
 0x6dd   : > { %v2965_v45 = vmul.f32 %v3838_v24, %v2959_v40  ;;  %v2966_v47 = vmul.f32 %v2963_v20, %v2958_v22  ;;  %v2952_v9 = vadd.f32 %v2948_v55, %v2929_v59  ;;  %v2953_v10 = vadd.f32 %v2949_v56, %v2930_v63  ;;  %v3845_v63 = vld [vmem:[%s6075_s6 + $0x30] sm:$0xff] }
 0x6df   : > { %v2978_v32 = vpop.permute.xlu1 %2977  ;;  %v2976_v36 = vpop.permute.xlu0 %2975  ;;  %v2969_v28 = vrot.slane %v2965_v45, 4  ;;  %v2970_v1 = vrot.slane %v2966_v47, 4  ;;  %v3089_v45 = vcombine.high %v3844_v19, %v3844_v19 }
 0x6e0   : > { %v2979_v49 = vsel %vm721_vm2, %v2976_v36, %v2978_v32  ;;  %v2980_v50 = vsel %vm721_vm2, %v2978_v32, %v2976_v36  ;;  %v5776_v36 = vpop.f32.mrb[22].mxu0 }
 0x6e1   : > { %v2986_v61 = vmul.f32 %v3839_v33, %v2980_v50  ;;  %v2987_v60 = vmul.f32 %v2984_v44, %v2979_v49  ;;  %v2973_v14 = vadd.f32 %v2969_v28, %v2952_v9  ;;  %v2974_v15 = vadd.f32 %v2970_v1, %v2953_v10  ;;  %v5778_v43 = vpop.f32.mrb[23].mxu0 }
 0x6e2   : > { %v3068_v33 = vcombine.high %v3843_v5, %v3843_v5  ;;  %v5784_v56 = vpop.f32.mrb[8].mxu0 }
 0x6e3   : > { %v2999_v51 = vpop.permute.xlu1 %2998  ;;  %v2997_v52 = vpop.permute.xlu0 %2996  ;;  %v2990_v11 = vrot.slane %v2986_v61, 4  ;;  %v2991_v13 = vrot.slane %v2987_v60, 4 }
 0x6e4   : > { %v3000_v57 = vsel %vm743_vm4, %v2997_v52, %v2999_v51  ;;  %v3001_v58 = vsel %vm743_vm4, %v2999_v51, %v2997_v52 }
 0x6e5   : > { %v3007_v6 = vmul.f32 %v3840_v29, %v3001_v58  ;;  %v3008_v7 = vmul.f32 %v3005_v53, %v3000_v57  ;;  %v2994_v22 = vadd.f32 %v2990_v11, %v2973_v14  ;;  %v2995_v40 = vadd.f32 %v2991_v13, %v2974_v15  ;;  %v5786_v57 = vpop.f32.mrb[9].mxu0 }
 0x6e7   : > { %v3020_v2 = vpop.permute.xlu1 %3019  ;;  %v3018_v37 = vpop.permute.xlu0 %3017  ;;  %v3011_v24 = vrot.slane %v3007_v6, 4  ;;  %v3012_v26 = vrot.slane %v3008_v7, 4 }
 0x6e8   : > { %v3021_v8 = vsel %vm765_vm5, %v3018_v37, %v3020_v2  ;;  %v3022_v4 = vsel %vm765_vm5, %v3020_v2, %v3018_v37 }
 0x6e9   : > { %v3028_v16 = vmul.f32 %v3841_v54, %v3021_v8  ;;  %v3029_v17 = vmul.f32 %v3026_v3, %v3022_v4  ;;  %v3015_v47 = vadd.f32 %v3011_v24, %v2994_v22  ;;  %v3016_v49 = vadd.f32 %v3012_v26, %v2995_v40  ;;  %v1805_v8 = vpop.f32.mrb[10].mxu0  ;;  %v3846_v26 = vld [vmem:[%s6076_s7 + $0x1c0] sm:$0xff] }
 0x6ea   : > { %v3104_v4 = vcombine.low %v3845_v63, %v3845_v63  ;;  %v1807_v9 = vpop.f32.mrb[11].mxu0 }
 0x6eb   : > { %v3041_v18 = vpop.permute.xlu1 %3040  ;;  %v3039_v23 = vpop.permute.xlu0 %3038  ;;  %v3032_v38 = vrot.slane %v3028_v16, 4  ;;  %v3033_v29 = vrot.slane %v3029_v17, 4 }
 0x6ec   : > { %v3042_v27 = vsel %vm787_vm6, %v3039_v23, %v3041_v18  ;;  %v3043_v21 = vsel %vm787_vm6, %v3041_v18, %v3039_v23  ;;  %v5795_v15 = vpop.f32.mrb[12].mxu0 }
 0x6ed   : > { %v3049_v20 = vmul.f32 %v3842_v62, %v3042_v27  ;;  %v3050_v32 = vmul.f32 %v3047_v12, %v3043_v21  ;;  %v3036_v58 = vadd.f32 %v3032_v38, %v3015_v47  ;;  %v3037_v59 = vadd.f32 %v3033_v29, %v3016_v49  ;;  %v5797_v16 = vpop.f32.mrb[13].mxu0  ;;  %v3850_v38 = vld [vmem:[%s6076_s7 + $0x1e0] sm:$0xff]  ;;  %v3853_v47 = vld [vmem:[%s6076_s7 + $0x1f8] sm:$0xff] }
 0x6ee   : > { %v5799_v24 = vpop.f32.mrb[14].mxu0 }
 0x6ef   : > { %v3062_v39 = vpop.permute.xlu1 %3061  ;;  %v3060_v44 = vpop.permute.xlu0 %3059  ;;  %v3053_v52 = vrot.slane %v3049_v20, 4  ;;  %v3054_v53 = vrot.slane %v3050_v32, 4  ;;  %v3848_v32 = vld [vmem:[%s6076_s7 + $0x1d0] sm:$0xff] }
 0x6f0   : > { %v3063_v50 = vsel %vm809_vm7, %v3060_v44, %v3062_v39  ;;  %v3064_v51 = vsel %vm809_vm7, %v3062_v39, %v3060_v44  ;;  %v5804_v27 = vpop.f32.mrb[15].mxu0  ;;  %v3851_v44 = vld [vmem:[%s6076_s7 + $0x1e8] sm:$0xff] }
 0x6f1   : > { %v3070_v54 = vmul.f32 %v3843_v5, %v3063_v50  ;;  %v3071_v55 = vmul.f32 %v3068_v33, %v3064_v51  ;;  %v3057_v3 = vadd.f32 %v3053_v52, %v3036_v58  ;;  %v3058_v37 = vadd.f32 %v3054_v53, %v3037_v59  ;;  %v5809_v21 = vpop.f32.mrb[16].mxu0  ;;  %v3849_v33 = vld [vmem:[%s6076_s7 + $0x1d8] sm:$0xff] }
 0x6f2   : > { %v5815_v20 = vpop.f32.mrb[17].mxu0  ;;  %v3278_v50 = vld [vmem:[#allocation11] sm:$0xff]  ;;  %v3279_v53 = vld [vmem:[#allocation11 + $0x8] sm:$0xff] }
 0x6f3   : > { %v3074_v61 = vrot.slane %v3070_v54, 4  ;;  %v3075_v60 = vrot.slane %v3071_v55, 4  ;;  %v3083_v62 = vpop.permute.xlu1 %3082  ;;  %v3081_v28 = vpop.permute.xlu0 %3080 }
 0x6f4   : > { %v3084_v1 = vsel %vm831_vm8, %v3081_v28, %v3083_v62  ;;  %v3085_v2 = vsel %vm831_vm8, %v3083_v62, %v3081_v28  ;;  %v5827_v22 = vpop.f32.mrb[18].mxu0 }
 0x6f5   : > { %v3091_v6 = vmul.f32 %v3844_v19, %v3084_v1  ;;  %v3092_v7 = vmul.f32 %v3089_v45, %v3085_v2  ;;  %v3078_v10 = vadd.f32 %v3074_v61, %v3057_v3  ;;  %v3079_v12 = vadd.f32 %v3075_v60, %v3058_v37  ;;  %v3847_v19 = vld [vmem:[%s6076_s7 + $0x1c8] sm:$0xff]  ;;  %v5830_v40 = vpop.f32.mrb[19].mxu0  ;;  %v3852_v45 = vld [vmem:[%s6076_s7 + $0x1f0] sm:$0xff] }
 0x6f6   : > { %v5836_v29 = vpop.f32.mrb[20].mxu0 }
 0x6f7   : > { %v3095_v11 = vrot.slane %v3091_v6, 4  ;;  %v3096_v13 = vrot.slane %v3092_v7, 4  ;;  %v5839_v39 = vpop.f32.mrb[21].mxu0  ;;  %v3282_v6 = vld [vmem:[#allocation11 + $0x20] sm:$0xff] }
 0x6f9   : > { %v3099_v5 = vadd.f32 %v3095_v11, %v3078_v10  ;;  %v3100_v14 = vadd.f32 %v3096_v13, %v3079_v12  ;;  %v3283_v12 = vld [vmem:[#allocation11 + $0x28] sm:$0xff] }
 0x6fb   : > { %v3106_v17 = vadd.f32 %v3104_v4, %v3099_v5  ;;  %v3107_v25 = vadd.f32 %v3845_v63, %v3100_v14  ;;  %v3281_v63 = vld [vmem:[#allocation11 + $0x18] sm:$0xff] }
 0x6fd   : > { %v3119_v18 = vrot.slane %v3106_v17, 4  ;;  %v3120_v23 = vrot.slane %v3107_v25, 4 }
 0x6ff   : > { %3854 = vmatprep.subr.msk.mxu1 %vm893_vm9, %v3120_v23 }
 0x700   : > { %3855 = vmatpush1.msk.msra.mxu1 %vm893_vm9, %v3119_v18 }
 0x701   : > { %3856 = vmatmul.mubr.msk.f32.vlgmr.msra.gmra.mrb[6].mxu1 %vm868_vm10, %v3846_v26 }
 0x702   : > { %3219 = vmatprep.mubr.f32.mxu1 %v4489_v0 }
 0x705   : > { %3857 = vmatmul.mubr.msk.f32.gmra.mrb[8].mxu1 %vm868_vm10, %v3847_v19 }
 0x706   : > { %3225 = vmatprep.mubr.f32.mxu1 %v4489_v0 }
 0x709   : > { %3858 = vmatmul.mubr.msk.f32.gmra.mrb[10].mxu1 %vm868_vm10, %v3848_v32 }
 0x70a   : > { %3231 = vmatprep.mubr.f32.mxu1 %v4489_v0 }
 0x70d   : > { %3859 = vmatmul.mubr.msk.f32.gmra.mrb[12].mxu1 %vm868_vm10, %v3849_v33 }
 0x70e   : > { %3237 = vmatprep.mubr.f32.mxu1 %v4489_v0 }
 0x711   : > { %3860 = vmatmul.mubr.msk.f32.gmra.mrb[14].mxu1 %vm868_vm10, %v3850_v38 }
 0x712   : > { %3243 = vmatprep.mubr.f32.mxu1 %v4489_v0 }
 0x715   : > { %3861 = vmatmul.mubr.msk.f32.gmra.mrb[16].mxu1 %vm868_vm10, %v3851_v44 }
 0x716   : > { %3249 = vmatprep.mubr.f32.mxu1 %v4489_v0 }
 0x719   : > { %3862 = vmatmul.mubr.msk.f32.gmra.mrb[18].mxu1 %vm868_vm10, %v3852_v45  ;;  %v3284_v45 = vld [vmem:[#allocation11 + $0x30] sm:$0xff] }
 0x71a   : > { %3255 = vmatprep.mubr.f32.mxu1 %v4489_v0  ;;  %v3280_v0 = vld [vmem:[#allocation11 + $0x10] sm:$0xff] }
 0x71d   : > { %3863 = vmatmul.mubr.msk.f32.gmra.mrb[4].mxu1 %vm868_vm10, %v3853_v47 }
 0x7d4   : > { %v3215_v49 = vpop.f32.mrb[6].mxu1 }
 0x7d5   : > { %v3890_v51 = vadd.f32 %v3215_v49, %v5784_v56  ;;  %v3217_v52 = vpop.f32.mrb[7].mxu1 }
 0x7d6   : > { %v3891_v54 = vadd.f32 %v3217_v52, %v5786_v57 }
 0x7d7   : > { %v5858_v55 = vadd.f32 %v3890_v51, %v3278_v50  ;;  %v3285_v51 = vld [vmem:[#allocation11 + $0x38] sm:$0xff] }
 0x7d8   : > { %v5860_v58 = vadd.f32 %v3891_v54, %v3279_v53  ;;  %v3221_v59 = vpop.f32.mrb[8].mxu1 }
 0x7d9   : > { %v3326_v61 = vmul.f32 %v5858_v55, %v5858_v55  ;;  %v3892_v60 = vadd.f32 %v3221_v59, %v1805_v8  ;;  %v3223_v62 = vpop.f32.mrb[9].mxu1 }
 0x7da   : > { %v3327_v28 = vmul.f32 %v5860_v58, %v5860_v58  ;;  %v3893_v56 = vadd.f32 %v3223_v62, %v1807_v9 }
 0x7db   : > { %v3342_v1 = vmul.f32 %v3326_v61, %v5858_v55  ;;  %v5867_v2 = vadd.f32 %v3892_v60, %v3280_v0 }
 0x7dc   : > { %v3343_v57 = vmul.f32 %v3327_v28, %v5860_v58  ;;  %v5870_v3 = vadd.f32 %v3893_v56, %v3281_v63  ;;  %v3227_v37 = vpop.f32.mrb[10].mxu1 }
 0x7dd   : > { %v3358_v7 = vmul.f32 0.044715, %v3342_v1  ;;  %v3328_v8 = vmul.f32 %v5867_v2, %v5867_v2  ;;  %v3894_v4 = vadd.f32 %v3227_v37, %v5795_v15  ;;  %v3229_v10 = vpop.f32.mrb[11].mxu1  ;;  %v3287_v37 = vld [vmem:[#allocation11 + $0x48] sm:$0xff] }
 0x7de   : > { %v3359_v11 = vmul.f32 0.044715, %v3343_v57  ;;  %v3329_v9 = vmul.f32 %v5870_v3, %v5870_v3  ;;  %v3895_v13 = vadd.f32 %v3229_v10, %v5797_v16 }
 0x7df   : > { %v3374_v5 = vadd.f32 %v3358_v7, %v5858_v55  ;;  %v3344_v14 = vmul.f32 %v3328_v8, %v5867_v2  ;;  %v5880_v17 = vadd.f32 %v3894_v4, %v3282_v6  ;;  %v3310_v7 = vmul.f32 0.5, %v5858_v55 }
 0x7e0   : > { %v3375_v25 = vadd.f32 %v3359_v11, %v5860_v58  ;;  %v3345_v18 = vmul.f32 %v3329_v9, %v5870_v3  ;;  %v5884_v23 = vadd.f32 %v3895_v13, %v3283_v12  ;;  %v3233_v15 = vpop.f32.mrb[12].mxu1 }
 0x7e1   : > { %v3390_v26 = vmul.f32 0.7978846, %v3374_v5  ;;  %v3360_v19 = vmul.f32 0.044715, %v3344_v14  ;;  %v3330_v32 = vmul.f32 %v5880_v17, %v5880_v17  ;;  %v3235_v33 = vpop.f32.mrb[13].mxu1  ;;  %v3896_v50 = vadd.f32 %v3233_v15, %v5799_v24  ;;  %v3286_v24 = vld [vmem:[#allocation11 + $0x40] sm:$0xff] }
 0x7e2   : > { %v3391_v16 = vmul.f32 0.7978846, %v3375_v25  ;;  %v3361_v38 = vmul.f32 0.044715, %v3345_v18  ;;  %v3331_v44 = vmul.f32 %v5884_v23, %v5884_v23  ;;  %v3897_v54 = vadd.f32 %v3235_v33, %v5804_v27  ;;  %v3288_v14 = vld [vmem:[#allocation11 + $0x50] sm:$0xff] }
 0x7e3   : > { %4183 = vtanh.f32 %v3390_v26  ;;  %v3376_v47 = vadd.f32 %v3360_v19, %v5867_v2  ;;  %v3346_v49 = vmul.f32 %v3330_v32, %v5880_v17  ;;  %v5896_v60 = vadd.f32 %v3896_v50, %v3284_v45 }
 0x7e4   : > { %4185 = vtanh.f32 %v3391_v16  ;;  %v3377_v52 = vadd.f32 %v3361_v38, %v5870_v3  ;;  %v3347_v53 = vmul.f32 %v3331_v44, %v5884_v23  ;;  %v3239_v59 = vpop.f32.mrb[14].mxu1  ;;  %v5899_v1 = vadd.f32 %v3897_v54, %v3285_v51  ;;  %v3289_v16 = vld [vmem:[#allocation11 + $0x58] sm:$0xff] }
 0x7e5   : > { %v3392_v0 = vmul.f32 0.7978846, %v3376_v47  ;;  %v3362_v61 = vmul.f32 0.044715, %v3346_v49  ;;  %v3898_v62 = vadd.f32 %v3239_v59, %v5809_v21  ;;  %v3241_v63 = vpop.f32.mrb[15].mxu1  ;;  %v3332_v27 = vmul.f32 %v5896_v60, %v5896_v60 }
 0x7e6   : > { %v3393_v28 = vmul.f32 0.7978846, %v3377_v52  ;;  %v3363_v56 = vmul.f32 0.044715, %v3347_v53  ;;  %v3899_v57 = vadd.f32 %v3241_v63, %v5815_v20  ;;  %v3333_v8 = vmul.f32 %v5899_v1, %v5899_v1 }
 0x7e7   : > { %4187 = vtanh.f32 %v3392_v0  ;;  %v3378_v6 = vadd.f32 %v3362_v61, %v5880_v17  ;;  %v3348_v12 = vmul.f32 %v3332_v27, %v5896_v60  ;;  %v5910_v20 = vadd.f32 %v3898_v62, %v3286_v24 }
 0x7e8   : > { %4189 = vtanh.f32 %v3393_v28  ;;  %v3379_v21 = vadd.f32 %v3363_v56, %v5884_v23  ;;  %v3245_v4 = vpop.f32.mrb[16].mxu1  ;;  %v5912_v11 = vadd.f32 %v3899_v57, %v3287_v37  ;;  %v3349_v5 = vmul.f32 %v3333_v8, %v5899_v1 }
 0x7e9   : > { %v3394_v10 = vmul.f32 0.7978846, %v3378_v6  ;;  %v3247_v9 = vpop.f32.mrb[17].mxu1  ;;  %v3900_v55 = vadd.f32 %v3245_v4, %v5827_v22  ;;  %v3311_v18 = vmul.f32 0.5, %v5860_v58  ;;  %v3364_v15 = vmul.f32 0.044715, %v3348_v12 }
 0x7ea   : > { %v3395_v13 = vmul.f32 0.7978846, %v3379_v21  ;;  %v3901_v25 = vadd.f32 %v3247_v9, %v5830_v40  ;;  %v3334_v26 = vmul.f32 %v5910_v20, %v5910_v20  ;;  %v3312_v19 = vmul.f32 0.5, %v5867_v2 }
 0x7eb   : > { %4191 = vtanh.f32 %v3394_v10  ;;  %v3365_v32 = vmul.f32 0.044715, %v3349_v5  ;;  %v3335_v33 = vmul.f32 %v5912_v11, %v5912_v11  ;;  %v3313_v40 = vmul.f32 0.5, %v5870_v3 }
 0x7ec   : > { %4193 = vtanh.f32 %v3395_v13  ;;  %v3251_v22 = vpop.f32.mrb[18].mxu1  ;;  %v3380_v58 = vadd.f32 %v3364_v15, %v5896_v60  ;;  %v3350_v44 = vmul.f32 %v3334_v26, %v5910_v20  ;;  %v5926_v45 = vadd.f32 %v3900_v55, %v3288_v14 }
 0x7ed   : > { %v4184_v38 = vpop.eup %4183  ;;  %v3253_v47 = vpop.f32.mrb[19].mxu1  ;;  %v3381_v50 = vadd.f32 %v3365_v32, %v5899_v1  ;;  %v3351_v51 = vmul.f32 %v3335_v33, %v5912_v11  ;;  %v3902_v52 = vadd.f32 %v3251_v22, %v5836_v29  ;;  %v5932_v3 = vadd.f32 %v3901_v25, %v3289_v16  ;;  %v3290_v29 = vld [vmem:[#allocation11 + $0x60] sm:$0xff] }
 0x7ee   : > { %v4186_v49 = vpop.eup %4185  ;;  %v3422_v2 = vadd.f32 1.0, %v4184_v38  ;;  %v3396_v54 = vmul.f32 0.7978846, %v3380_v58  ;;  %v3366_v59 = vmul.f32 0.044715, %v3350_v44  ;;  %v3336_v63 = vmul.f32 %v5926_v45, %v5926_v45  ;;  %v3292_v44 = vld [vmem:[#allocation11 + $0x70] sm:$0xff] }
 0x7ef   : > { %v3423_v53 = vadd.f32 1.0, %v4186_v49  ;;  %v3397_v61 = vmul.f32 0.7978846, %v3381_v50  ;;  %v3367_v62 = vmul.f32 0.044715, %v3351_v51  ;;  %v3314_v57 = vmul.f32 0.5, %v5880_v17 }
 0x7f0   : > { %v3438_v0 = vmul.f32 %v3422_v2, %v3310_v7  ;;  %v3257_v28 = vpop.f32.mrb[4].mxu1  ;;  %4195 = vtanh.f32 %v3396_v54  ;;  %v3382_v37 = vadd.f32 %v3366_v59, %v5910_v20  ;;  %v3352_v9 = vmul.f32 %v3336_v63, %v5926_v45  ;;  %v3293_v2 = vld [vmem:[#allocation11 + $0x78] sm:$0xff]  ;;  %v4215_v50 = vld [vmem:[%s4824_s9] sm:$0xff] }
 0x7f1   : > { %v4188_v56 = vpop.eup %4187  ;;  %v3439_v24 = vmul.f32 %v3423_v53, %v3311_v18  ;;  %v3259_v6 = vpop.f32.mrb[5].mxu1  ;;  %4197 = vtanh.f32 %v3397_v61  ;;  %v3383_v7 = vadd.f32 %v3367_v62, %v5912_v11  ;;  %v5947_v5 = vadd.f32 %v3902_v52, %v3290_v29  ;;  %v3291_v18 = vld [vmem:[#allocation11 + $0x68] sm:$0xff] }
 0x7f2   : > { %v4190_v27 = vpop.eup %4189  ;;  %v3454_v21 = vadd.f32 %v3438_v0, %v4855_v30  ;;  %v3424_v8 = vadd.f32 1.0, %v4188_v56  ;;  %v3398_v12 = vmul.f32 0.7978846, %v3382_v37  ;;  %v3337_v30 = vmul.f32 %v5932_v3, %v5932_v3  ;;  %v4216_v0 = vld [vmem:[%s4824_s9 + $0x8] sm:$0xff] }
 0x7f3   : > { %v3455_v4 = vadd.f32 %v3439_v24, %v4857_v31  ;;  %v3425_v10 = vadd.f32 1.0, %v4190_v27  ;;  %v3399_v13 = vmul.f32 0.7978846, %v3383_v7  ;;  %v3368_v14 = vmul.f32 0.044715, %v3352_v9  ;;  %v4217_v9 = vld [vmem:[%s4824_s9 + $0x10] sm:$0xff] }
 0x7f4   : > { %3470 = vst [vmem:[%s5942_s24] sm:$0xff] %v3454_v21  ;;  %v3440_v17 = vmul.f32 %v3424_v8, %v3312_v19  ;;  %4199 = vtanh.f32 %v3398_v12  ;;  %v3903_v25 = vadd.f32 %v3253_v47, %v5839_v39  ;;  %v3353_v32 = vmul.f32 %v3337_v30, %v5932_v3 }
 0x7f5   : > { %v4192_v55 = vpop.eup %4191  ;;  %3471 = vst [vmem:[%s5942_s24 + $0x8] sm:$0xff] %v3455_v4  ;;  %v3441_v31 = vmul.f32 %v3425_v10, %v3313_v40  ;;  %4201 = vtanh.f32 %v3399_v13  ;;  %v3315_v16 = vmul.f32 0.5, %v5884_v23  ;;  %v3384_v38 = vadd.f32 %v3368_v14, %v5926_v45 }
 0x7f6   : > { %v4194_v15 = vpop.eup %4193  ;;  %v3456_v26 = vadd.f32 %v3440_v17, %v4861_v34  ;;  %v3426_v19 = vadd.f32 1.0, %v4192_v55  ;;  %v3369_v39 = vmul.f32 0.044715, %v3353_v32  ;;  %v3338_v58 = vmul.f32 %v5947_v5, %v5947_v5  ;;  %v4218_v55 = vld [vmem:[%s4824_s9 + $0x18] sm:$0xff] }
 0x7f7   : > { %v3457_v33 = vadd.f32 %v3441_v31, %v4863_v35  ;;  %v3427_v22 = vadd.f32 1.0, %v4194_v15  ;;  %v5959_v34 = vadd.f32 %v3903_v25, %v3291_v18  ;;  %v3400_v49 = vmul.f32 0.7978846, %v3384_v38 }
 0x7f8   : > { %3472 = vst [vmem:[%s5942_s24 + $0x10] sm:$0xff] %v3456_v26  ;;  %v3442_v40 = vmul.f32 %v3426_v19, %v3314_v57  ;;  %v3904_v35 = vadd.f32 %v3257_v28, %v5776_v36  ;;  %v3905_v23 = vadd.f32 %v3259_v6, %v5778_v43  ;;  %v3316_v52 = vmul.f32 0.5, %v5896_v60 }
 0x7f9   : > { %3473 = vst [vmem:[%s5942_s24 + $0x18] sm:$0xff] %v3457_v33  ;;  %v3443_v47 = vmul.f32 %v3427_v22, %v3315_v16  ;;  %v3385_v53 = vadd.f32 %v3369_v39, %v5932_v3  ;;  %v3354_v54 = vmul.f32 %v3338_v58, %v5947_v5  ;;  %4203 = vtanh.f32 %v3400_v49 }
 0x7fa   : > { %v3458_v51 = vadd.f32 %v4215_v50, %v3442_v40  ;;  %v4196_v59 = vpop.eup %4195  ;;  %v3339_v62 = vmul.f32 %v5959_v34, %v5959_v34  ;;  %v5971_v36 = vadd.f32 %v3904_v35, %v3292_v44  ;;  %v5974_v24 = vadd.f32 %v3905_v23, %v3293_v2 }
 0x7fb   : > { %v3459_v61 = vadd.f32 %v4216_v0, %v3443_v47  ;;  %v4198_v43 = vpop.eup %4197  ;;  %v3428_v63 = vadd.f32 1.0, %v4196_v59  ;;  %v3401_v28 = vmul.f32 0.7978846, %v3385_v53  ;;  %v3370_v56 = vmul.f32 0.044715, %v3354_v54  ;;  %v4219_v0 = vld [vmem:[%s4824_s9 + $0x20] sm:$0xff] }
 0x7fc   : > { %3474 = vst [vmem:[%s5942_s24 + $0x20] sm:$0xff] %v3458_v51  ;;  %v3317_v60 = vmul.f32 0.5, %v5899_v1  ;;  %v3429_v57 = vadd.f32 1.0, %v4198_v43  ;;  %v3355_v37 = vmul.f32 %v3339_v62, %v5959_v34  ;;  %v3340_v29 = vmul.f32 %v5971_v36, %v5971_v36 }
 0x7fd   : > { %3475 = vst [vmem:[%s5942_s24 + $0x28] sm:$0xff] %v3459_v61  ;;  %v3444_v6 = vmul.f32 %v3428_v63, %v3316_v52  ;;  %v3318_v27 = vmul.f32 0.5, %v5910_v20  ;;  %4205 = vtanh.f32 %v3401_v28  ;;  %v3386_v21 = vadd.f32 %v3370_v56, %v5947_v5  ;;  %v4220_v63 = vld [vmem:[%s4824_s9 + $0x28] sm:$0xff] }
 0x7fe   : > { %v4200_v8 = vpop.eup %4199  ;;  %v3445_v7 = vmul.f32 %v3429_v57, %v3317_v60  ;;  %v3371_v4 = vmul.f32 0.044715, %v3355_v37  ;;  %v3356_v10 = vmul.f32 %v3340_v29, %v5971_v36  ;;  %v3341_v1 = vmul.f32 %v5974_v24, %v5974_v24  ;;  %v4221_v57 = vld [vmem:[%s4824_s9 + $0x30] sm:$0xff] }
 0x7ff   : > { %v4202_v12 = vpop.eup %4201  ;;  %v3460_v17 = vadd.f32 %v4217_v9, %v3444_v6  ;;  %v3430_v13 = vadd.f32 1.0, %v4200_v8  ;;  %v3319_v30 = vmul.f32 0.5, %v5912_v11  ;;  %v3402_v20 = vmul.f32 0.7978846, %v3386_v21 }
 0x800   : > { %v3461_v31 = vadd.f32 %v4218_v55, %v3445_v7  ;;  %v3431_v14 = vadd.f32 1.0, %v4202_v12  ;;  %v3387_v25 = vadd.f32 %v3371_v4, %v5959_v34  ;;  %v3372_v18 = vmul.f32 0.044715, %v3356_v10 }
 0x801   : > { %3476 = vst [vmem:[%s5942_s24 + $0x30] sm:$0xff] %v3460_v17  ;;  %v3446_v15 = vmul.f32 %v3430_v13, %v3318_v27  ;;  %4207 = vtanh.f32 %v3402_v20  ;;  %v3357_v26 = vmul.f32 %v3341_v1, %v5974_v24  ;;  %v3320_v39 = vmul.f32 0.5, %v5926_v45 }
 0x802   : > { %3477 = vst [vmem:[%s5942_s24 + $0x38] sm:$0xff] %v3461_v31  ;;  %v3447_v19 = vmul.f32 %v3431_v14, %v3319_v30  ;;  %v3403_v32 = vmul.f32 0.7978846, %v3387_v25  ;;  %v3388_v33 = vadd.f32 %v3372_v18, %v5971_v36  ;;  %v3322_v51 = vmul.f32 0.5, %v5947_v5 }
 0x803   : > { %v3462_v11 = vadd.f32 %v3446_v15, %v4871_v41  ;;  %v3373_v16 = vmul.f32 0.044715, %v3357_v26  ;;  %v4204_v22 = vpop.eup %4203  ;;  %v3321_v41 = vmul.f32 0.5, %v5932_v3  ;;  %v3323_v3 = vmul.f32 0.5, %v5959_v34 }
 0x804   : > { %v3463_v38 = vadd.f32 %v3447_v19, %v4873_v42  ;;  %4209 = vtanh.f32 %v3403_v32  ;;  %v3404_v40 = vmul.f32 0.7978846, %v3388_v33  ;;  %v3432_v58 = vadd.f32 1.0, %v4204_v22 }
 0x805   : > { %3478 = vst [vmem:[%s5942_s24 + $0x40] sm:$0xff] %v3462_v11  ;;  %v3389_v44 = vadd.f32 %v3373_v16, %v5974_v24  ;;  %v3325_v56 = vmul.f32 0.5, %v5974_v24 }
 0x806   : > { %3479 = vst [vmem:[%s5942_s24 + $0x48] sm:$0xff] %v3463_v38  ;;  %4211 = vtanh.f32 %v3404_v40  ;;  %v3448_v49 = vmul.f32 %v3432_v58, %v3320_v39 }
 0x807   : > { %v4206_v47 = vpop.eup %4205  ;;  %v3405_v35 = vmul.f32 0.7978846, %v3389_v44 }
 0x808   : > { %v3433_v23 = vadd.f32 1.0, %v4206_v47  ;;  %v3464_v42 = vadd.f32 %v3448_v49, %v4877_v46 }
 0x809   : > { %4213 = vtanh.f32 %v3405_v35 }
 0x80a   : > { %v3449_v2 = vmul.f32 %v3433_v23, %v3321_v41  ;;  %3480 = vst [vmem:[%s5942_s24 + $0x50] sm:$0xff] %v3464_v42 }
 0x80b   : > { %v4208_v50 = vpop.eup %4207 }
 0x80c   : > { %v3465_v45 = vadd.f32 %v3449_v2, %v4881_v48  ;;  %v3434_v52 = vadd.f32 1.0, %v4208_v50  ;;  %v3324_v48 = vmul.f32 0.5, %v5971_v36  ;;  %v4222_v36 = vld [vmem:[%s4824_s9 + $0x38] sm:$0xff] }
 0x80e   : > { %v4210_v53 = vpop.eup %4209  ;;  %3481 = vst [vmem:[%s5942_s24 + $0x58] sm:$0xff] %v3465_v45  ;;  %v3450_v54 = vmul.f32 %v3434_v52, %v3322_v51 }
 0x80f   : > { %v3435_v59 = vadd.f32 1.0, %v4210_v53 }
 0x810   : > { %v4212_v46 = vpop.eup %4211  ;;  %v3466_v61 = vadd.f32 %v4219_v0, %v3450_v54 }
 0x811   : > { %v3451_v62 = vmul.f32 %v3435_v59, %v3323_v3  ;;  %v3436_v43 = vadd.f32 1.0, %v4212_v46 }
 0x812   : > { %3482 = vst [vmem:[%s5942_s24 + $0x60] sm:$0xff] %v3466_v61 }
 0x813   : > { %v4214_v5 = vpop.eup %4213  ;;  %v3467_v28 = vadd.f32 %v4220_v63, %v3451_v62  ;;  %v3452_v34 = vmul.f32 %v3436_v43, %v3324_v48 }
 0x814   : > { %v3437_v60 = vadd.f32 1.0, %v4214_v5 }
 0x815   : > { %3483 = vst [vmem:[%s5942_s24 + $0x68] sm:$0xff] %v3467_v28  ;;  %v3468_v37 = vadd.f32 %v4221_v57, %v3452_v34 }
 0x816   : > { %v3453_v29 = vmul.f32 %v3437_v60, %v3325_v56 }
 0x817   : > { %3484 = vst [vmem:[%s5942_s24 + $0x70] sm:$0xff] %v3468_v37 }
 0x818   : > { %v3469_v6 = vadd.f32 %v4222_v36, %v3453_v29 }
 0x81a   : > { %3485 = vst [vmem:[%s5942_s24 + $0x78] sm:$0xff] %v3469_v6 }
 0x81b   : > { %4408 = shalt.err (!%p4405_p4)
}
 0x81c   : > { %s4409_s9 = scalar_lea.hbm %s6020_s25, 2048  ;;  %s4413_s19 = scalar_lea.hbm %s6121_s29, 4096 }
 0x81d   : > { %p4410_p11 = scmp.ne.s32.totalorder %s6020_s25, %s4409_s9  ;;  %p4414_p1 = scmp.lt.u32.totalorder %s6020_s25, %s6121_s29 }
 0x81e   : > { %p4415_p2 = scmp.lt.u32.totalorder %s4413_s19, %s4409_s9  ;;  %p4417_p0 = scmp.lt.u32.totalorder %s4409_s9, %s6020_s25 }
 0x81f   : > { %p4411_p7 = pnand %p4410_p11, %p4716_p10 }
 0x820   : > { %p4416_p13 = por %p4415_p2, %p4414_p1 }
 0x821   : > { %p4412_p12 = pneg %p4411_p7 }
 0x822   : > { %p4418_p6 = por %p4417_p0, %p4416_p13 }
 0x824   : > { %p4419_p8 = pnand %p4418_p6, %p4412_p12 }
 0x826   : > { %4422 = shalt.err (!%p4419_p8)
}
 0x827   : > { %s4500_s4 = smov 256  }
 0x828   : > { %4022 = dma.vmem_to_hbm [thread:$0]  (%p4716_p10), %s6023_s16, 2048, %s6020_s25, %s3487_s13, %s4500_s4, %s4500_s4, %s4491_s15  }
 0x829 PF: > { %s6122_s22 = sld [smem:[#allocation20_spill]]  ;;  %s6123_s26 = sld [smem:[#allocation21_spill]] }
 0x82a   : > { %p6125_p5 = scmp.ge.s32.totalorder %s4477_s12, 2 }
 0x82f   : > { %s3515_s30 = sand.u32 1, %s6122_s22   ;;  %p6124_p3 = scmp.ne.s32.totalorder %s6123_s26, 0 }
 0x830   : > { %s3516_s0 = scalar_lea.sflag [#allocation4], %s3515_s30 }
 0x831   : > { %p4045_p9 = pnand %p6125_p5, %p6124_p3 }
 0x833   : > { %4460 = dma.done.wait (!%p4045_p9), %s3516_s0, 2048  }
 0x834   : > { %4462 = vsyncadd (!%p4045_p9), %s3516_s0, 4294965248  ;;  %p27_p4 = scmp.ge.s32.totalorder %s4706_s14, 4   ;;  %s6126_s30 = smov %s4469_s10 }
 0x835   : > { %s6127_s10 = smov %s4473_s11  ;;  %s6128_s11 = smov %s4722_s28 }
 0x836   : > { %s6129_s12 = smov %s4706_s14  ;;  %29 = sbr.rel (!%p27_p4) target bundleno = 15 (0xf), region = 205 }
 0x83d   :  { %3521 = vsyncpa [#allocation3], 1 }
 0x83e   :  { %3523 = vsyncpa [#allocation3 + $0x1], 1 }
 0x83f   :  { %3524 = vsyncpa [#allocation6], 1 }
 0x840   :  { %3526 = vsyncpa [#allocation6 + $0x1], 1 }
 0x841   :  { %3527 = vsyncpa [#allocation9], 1 }
 0x842   :  { %3528 = vsyncpa [#allocation12], 1 }
 0x843   :  { %3529 = vsyncpa [#allocation4], 1 }
 0x844   :  { %3531 = vsyncpa [#allocation4 + $0x1], 1 }

</bundles_post_ra>
